<compile_context>
chip_gen: v6e
topology: v6e:2x2x1
jax: 0.10.0
libtpu: 0.0.40
codegen_flags: <defaults>
</compile_context>

<pallas_src>
import jax
import jax.numpy as jnp
from jax.experimental import pallas as pl
from jax.experimental.pallas import tpu as pltpu

CONV_OUT_CHANNELS = 4   # nn.Conv1d(in_channels=1, out_channels=4, kernel_size=3)
CONV_K = 3
LANE = 128
SUBLANE = 8
MAX_BATCH_TILE = 512    # rows per grid step; sized against v7x's smaller VMEM


def _round_up(n, m):
    return ((n + m - 1) // m) * m


def _dyhpo_kernel(x_ref, lc_ref, w1_ref, b1_ref, wc_ref, bc_ref,
                  w2h_ref, w2lc_ref, b2_ref, out_ref):
    # ---- fc1 + ReLU (one MXU matmul, N = Hp = 128 lane-dense) ----
    h = jnp.dot(x_ref[...], w1_ref[...], preferred_element_type=jnp.float32)
    h = jnp.maximum(h + b1_ref[...], 0.0)                 # (TB, Hp); zero-padded cols stay 0

    # ---- Conv1d(1 -> 4, k=3) + AdaptiveMaxPool1d(1), all channels at once ----
    lv = lc_ref[...]                                      # (TB, L)
    L = lv.shape[1]
    T = L - CONV_K + 1                                    # valid conv output length
    taps = [lv[:, k:k + T] for k in range(CONV_K)]        # 3 shifted views, built once, reused
    wc = wc_ref[...]                                      # (4, 3) conv weight in VMEM
    conv = taps[0][:, None, :] * wc[None, :, 0:1]         # (TB, 4, T) broadcast FMA chain
    for k in range(1, CONV_K):
        conv = conv + taps[k][:, None, :] * wc[None, :, k:k + 1]
    # Bias is constant along the time axis, so max(conv) + bc == max(conv + bc),
    # matching PyTorch's Conv1d bias followed by AdaptiveMaxPool1d(1).
    y = jnp.max(conv, axis=-1) + bc_ref[...]              # single XLU reduce -> (TB, 4)

    # ---- fc2 split: MXU for the h rows, 4 rank-1 VPU updates for the lc rows ----
    out = jnp.dot(h, w2h_ref[...], preferred_element_type=jnp.float32) + b2_ref[...]
    w2lc = w2lc_ref[...]                                  # (4, Op)
    for c in range(CONV_OUT_CHANNELS):                    # static unroll: 4 rank-1 updates
        out = out + y[:, c:c + 1] * w2lc[c:c + 1, :]      # (TB,1)*(1,Op) broadcasts on VPU
    # Final ReLU: the PyTorch module applies self.nonlinearity after fc2.
    out_ref[...] = jnp.maximum(out, 0.0)


def dyhpo_mlp_forward(x, l_curve, params):
    """x: (B, d_in-1) f32, l_curve: (B, 1, L) f32. Returns (B, out_features) f32."""
    w1, b1, wc, bc, w2, b2 = params
    B, Din = x.shape
    H = w1.shape[1]
    O = w2.shape[1]
    L = l_curve.shape[-1]

    x = x.astype(jnp.float32)
    lc2 = l_curve.reshape(B, L).astype(jnp.float32)       # squeeze in_channels == 1

    # ---- zero-pad feature dims to 128 lanes (weights are tiny; done once per call) ----
    Hp = _round_up(H, LANE)
    Op = _round_up(O, LANE)
    w1p = jnp.zeros((Din, Hp), jnp.float32).at[:, :H].set(w1)
    b1p = jnp.zeros((1, Hp), jnp.float32).at[:, :H].set(b1.reshape(1, H))
    # fc2 weight is (H + 4, O) in (in, out) layout: split into the h rows (MXU matmul)
    # and the 4 learning-curve rows (rank-1 VPU updates inside the kernel).
    w2h = jnp.zeros((Hp, Op), jnp.float32).at[:H, :O].set(w2[:H, :])
    w2lc = jnp.zeros((CONV_OUT_CHANNELS, Op), jnp.float32).at[:, :O].set(w2[H:, :])
    b2p = jnp.zeros((1, Op), jnp.float32).at[:, :O].set(b2.reshape(1, O))
    bc2 = bc.reshape(1, CONV_OUT_CHANNELS).astype(jnp.float32)
    wcf = wc.astype(jnp.float32)

    # ---- batch tiling: pad B up to a multiple of the tile, grid over the batch ----
    TB = min(_round_up(B, SUBLANE), MAX_BATCH_TILE)
    Bp = _round_up(B, TB)
    if Bp != B:
        x = jnp.pad(x, ((0, Bp - B), (0, 0)))
        lc2 = jnp.pad(lc2, ((0, Bp - B), (0, 0)))
    grid = (Bp // TB,)

    out = pl.pallas_call(
        _dyhpo_kernel,
        out_shape=jax.ShapeDtypeStruct((Bp, Op), jnp.float32),
        grid=grid,
        in_specs=[
            pl.BlockSpec((TB, Din), lambda i: (i, 0)),                      # x (batch-tiled)
            pl.BlockSpec((TB, L), lambda i: (i, 0)),                        # l_curve (batch-tiled)
            pl.BlockSpec((Din, Hp), lambda i: (0, 0)),                      # W1 (resident)
            pl.BlockSpec((1, Hp), lambda i: (0, 0)),                        # b1
            pl.BlockSpec((CONV_OUT_CHANNELS, CONV_K), lambda i: (0, 0)),    # conv weight
            pl.BlockSpec((1, CONV_OUT_CHANNELS), lambda i: (0, 0)),         # conv bias
            pl.BlockSpec((Hp, Op), lambda i: (0, 0)),                       # W2 (h rows)
            pl.BlockSpec((CONV_OUT_CHANNELS, Op), lambda i: (0, 0)),        # W2 (lc rows)
            pl.BlockSpec((1, Op), lambda i: (0, 0)),                        # b2
        ],
        out_specs=pl.BlockSpec((TB, Op), lambda i: (i, 0)),
        compiler_params=pltpu.CompilerParams(
            dimension_semantics=("parallel",)),     # shards the batch across TCs on v7x
    )(x, lc2, w1p, b1p, wcf, bc2, w2h, w2lc, b2p)

    return out[:B, :O]


def init_params(key, d_in, output_sizes, lc_features=3, budget_features=1):
    """Deterministic synthetic init matching dyhpo_mlp.__init__ shapes.
    Weights are stored as (in, out) so the kernel does x @ W (== x @ W_pt^T)."""
    k1, k2, k3, k4, k5, k6 = jax.random.split(key, 6)
    din1 = d_in - 1
    h = output_sizes[0]
    o = output_sizes[-1]
    fc2_in = h + lc_features + budget_features
    w1 = jax.random.normal(k1, (din1, h), jnp.float32) * 0.1
    b1 = jax.random.normal(k2, (h,), jnp.float32) * 0.1
    wc = jax.random.normal(k3, (CONV_OUT_CHANNELS, CONV_K), jnp.float32) * 0.1  # Conv1d (4,1,3) squeezed
    bc = jax.random.normal(k4, (CONV_OUT_CHANNELS,), jnp.float32) * 0.1
    w2 = jax.random.normal(k5, (fc2_in, o), jnp.float32) * 0.1
    b2 = jax.random.normal(k6, (o,), jnp.float32) * 0.1
    return (w1, b1, wc, bc, w2, b2)


def reference_forward(x, l_curve, params):
    """Pure-JAX reference mirroring the PyTorch forward (for sanity check)."""
    w1, b1, wc, bc, w2, b2 = params
    h = jax.nn.relu(x @ w1 + b1)
    lc = l_curve[:, 0, :]                                        # (B, L)
    L = lc.shape[1]
    # conv1d: y[b, c, t] = sum_k wc[c, k] * lc[b, t + k] + bc[c]
    windows = jnp.stack([lc[:, k:L - CONV_K + 1 + k] for k in range(CONV_K)], axis=-1)  # (B, L-2, 3)
    conv = jnp.einsum('btk,ck->bct', windows, wc) + bc[None, :, None]                   # (B, 4, L-2)
    y = jnp.max(conv, axis=-1)                                                          # (B, 4)
    z = jnp.concatenate([h, y], axis=-1)
    return jax.nn.relu(z @ w2 + b2)


if __name__ == "__main__":
    key = jax.random.PRNGKey(0)
    kx, kl, kp = jax.random.split(key, 3)

    # Small shapes consistent with the module: d_in=33 -> fc1 in=32, hidden=32, out=32,
    # learning-curve length L=16, batch B=8.
    B, d_in, L = 8, 33, 16
    output_sizes = [32, 32]

    x = jax.random.normal(kx, (B, d_in - 1), jnp.float32)
    l_curve = jax.random.normal(kl, (B, 1, L), jnp.float32)      # NCL, in_channels=1
    params = init_params(kp, d_in, output_sizes)

    out = dyhpo_mlp_forward(x, l_curve, params)
    out = jax.block_until_ready(out)

    ref = reference_forward(x, l_curve, params)
    assert out.shape == (B, output_sizes[-1])
    # Tolerance covers the different summation order: the kernel splits fc2 into an MXU
    # matmul plus exact-f32 rank-1 updates, while the reference fuses all 36 K-terms
    # into one matmul (different MXU pass rounding). Structural errors are O(0.1+).
    assert jnp.allclose(out, ref, atol=1e-3, rtol=1e-3), "mismatch vs JAX reference"

    print("KERNEL_OK")
</pallas_src>

<mosaic_0001>
module attributes {stable_mosaic.version = 11 : i64} {
  func.func @_dyhpo_kernel(%arg0: i32, %arg1: memref<8x32xf32, #tpu.memory_space<vmem>>, %arg2: memref<8x16xf32, #tpu.memory_space<vmem>>, %arg3: memref<32x128xf32, #tpu.memory_space<vmem>>, %arg4: memref<1x128xf32, #tpu.memory_space<vmem>>, %arg5: memref<4x3xf32, #tpu.memory_space<vmem>>, %arg6: memref<1x4xf32, #tpu.memory_space<vmem>>, %arg7: memref<128x128xf32, #tpu.memory_space<vmem>>, %arg8: memref<4x128xf32, #tpu.memory_space<vmem>>, %arg9: memref<1x128xf32, #tpu.memory_space<vmem>>, %arg10: memref<8x128xf32, #tpu.memory_space<vmem>>) attributes {dimension_semantics = [#tpu.dimension_semantics<parallel>], iteration_bounds = array<i64: 1>, scalar_prefetch = 0 : i64, scratch_operands = 0 : i64, tpu.core_type = #tpu.core_type<tc>, window_params = [{transform_indices = @transform_0, window_bounds = array<i64: 8, 32>}, {transform_indices = @transform_1, window_bounds = array<i64: 8, 16>}, {pipeline_mode = #tpu.pipeline_mode<synchronous>, transform_indices = @transform_2, window_bounds = array<i64: 32, 128>}, {pipeline_mode = #tpu.pipeline_mode<synchronous>, transform_indices = @transform_3, window_bounds = array<i64: 1, 128>}, {pipeline_mode = #tpu.pipeline_mode<synchronous>, transform_indices = @transform_4, window_bounds = array<i64: 4, 3>}, {pipeline_mode = #tpu.pipeline_mode<synchronous>, transform_indices = @transform_5, window_bounds = array<i64: 1, 4>}, {pipeline_mode = #tpu.pipeline_mode<synchronous>, transform_indices = @transform_6, window_bounds = array<i64: 128, 128>}, {pipeline_mode = #tpu.pipeline_mode<synchronous>, transform_indices = @transform_7, window_bounds = array<i64: 4, 128>}, {pipeline_mode = #tpu.pipeline_mode<synchronous>, transform_indices = @transform_8, window_bounds = array<i64: 1, 128>}, {transform_indices = @transform_9, window_bounds = array<i64: 8, 128>}]} {
    %c0 = arith.constant 0 : index
    %c0_0 = arith.constant 0 : index
    %0 = vector.load %arg1[%c0, %c0_0] : memref<8x32xf32, #tpu.memory_space<vmem>>, vector<8x32xf32>
    %c0_1 = arith.constant 0 : index
    %c0_2 = arith.constant 0 : index
    %1 = vector.load %arg3[%c0_1, %c0_2] : memref<32x128xf32, #tpu.memory_space<vmem>>, vector<32x128xf32>
    %cst = arith.constant dense<0.000000e+00> : vector<8x128xf32>
    %2 = tpu.matmul %0, %1, %cst {dimension_numbers = #tpu.dot_dimension_numbers<[1], [0], [0], [1], [0, 0, 1, 1], [], []>} : vector<8x32xf32>, vector<32x128xf32>, vector<8x128xf32> -> vector<8x128xf32>
    %c0_3 = arith.constant 0 : index
    %c0_4 = arith.constant 0 : index
    %3 = vector.load %arg4[%c0_3, %c0_4] : memref<1x128xf32, #tpu.memory_space<vmem>>, vector<1x128xf32>
    %4 = vector.broadcast %3 : vector<1x128xf32> to vector<8x128xf32>
    %5 = arith.addf %2, %4 : vector<8x128xf32>
    %cst_5 = arith.constant 0.000000e+00 : f32
    %6 = vector.broadcast %cst_5 : f32 to vector<8x128xf32>
    %7 = arith.maximumf %5, %6 : vector<8x128xf32>
    %c0_6 = arith.constant 0 : index
    %c0_7 = arith.constant 0 : index
    %8 = vector.load %arg2[%c0_6, %c0_7] : memref<8x16xf32, #tpu.memory_space<vmem>>, vector<8x16xf32>
    %9 = vector.extract_strided_slice %8 {offsets = [0, 0], sizes = [8, 14], strides = [1, 1]} : vector<8x16xf32> to vector<8x14xf32>
    %10 = vector.extract_strided_slice %8 {offsets = [0, 1], sizes = [8, 14], strides = [1, 1]} : vector<8x16xf32> to vector<8x14xf32>
    %11 = vector.extract_strided_slice %8 {offsets = [0, 2], sizes = [8, 14], strides = [1, 1]} : vector<8x16xf32> to vector<8x14xf32>
    %c0_8 = arith.constant 0 : index
    %c0_9 = arith.constant 0 : index
    %12 = vector.load %arg5[%c0_8, %c0_9] : memref<4x3xf32, #tpu.memory_space<vmem>>, vector<4x3xf32>
    %13 = vector.shape_cast %9 : vector<8x14xf32> to vector<8x1x14xf32>
    %14 = vector.extract_strided_slice %12 {offsets = [0, 0], sizes = [4, 1], strides = [1, 1]} : vector<4x3xf32> to vector<4x1xf32>
    %15 = vector.shape_cast %14 : vector<4x1xf32> to vector<1x4x1xf32>
    %16 = vector.broadcast %13 : vector<8x1x14xf32> to vector<8x4x14xf32>
    %17 = vector.broadcast %15 : vector<1x4x1xf32> to vector<8x4x14xf32>
    %18 = arith.mulf %16, %17 : vector<8x4x14xf32>
    %19 = vector.shape_cast %10 : vector<8x14xf32> to vector<8x1x14xf32>
    %20 = vector.extract_strided_slice %12 {offsets = [0, 1], sizes = [4, 1], strides = [1, 1]} : vector<4x3xf32> to vector<4x1xf32>
    %21 = vector.shape_cast %20 : vector<4x1xf32> to vector<1x4x1xf32>
    %22 = vector.broadcast %19 : vector<8x1x14xf32> to vector<8x4x14xf32>
    %23 = vector.broadcast %21 : vector<1x4x1xf32> to vector<8x4x14xf32>
    %24 = arith.mulf %22, %23 : vector<8x4x14xf32>
    %25 = arith.addf %18, %24 : vector<8x4x14xf32>
    %26 = vector.shape_cast %11 : vector<8x14xf32> to vector<8x1x14xf32>
    %27 = vector.extract_strided_slice %12 {offsets = [0, 2], sizes = [4, 1], strides = [1, 1]} : vector<4x3xf32> to vector<4x1xf32>
    %28 = vector.shape_cast %27 : vector<4x1xf32> to vector<1x4x1xf32>
    %29 = vector.broadcast %26 : vector<8x1x14xf32> to vector<8x4x14xf32>
    %30 = vector.broadcast %28 : vector<1x4x1xf32> to vector<8x4x14xf32>
    %31 = arith.mulf %29, %30 : vector<8x4x14xf32>
    %32 = arith.addf %25, %31 : vector<8x4x14xf32>
    %cst_10 = arith.constant dense<0xFF800000> : vector<8x4xf32>
    %33 = vector.multi_reduction <maximumf>, %32, %cst_10 [2] : vector<8x4x14xf32> to vector<8x4xf32>
    %c0_11 = arith.constant 0 : index
    %c0_12 = arith.constant 0 : index
    %34 = vector.load %arg6[%c0_11, %c0_12] : memref<1x4xf32, #tpu.memory_space<vmem>>, vector<1x4xf32>
    %35 = vector.broadcast %34 : vector<1x4xf32> to vector<8x4xf32>
    %36 = arith.addf %33, %35 : vector<8x4xf32>
    %c0_13 = arith.constant 0 : index
    %c0_14 = arith.constant 0 : index
    %37 = vector.load %arg7[%c0_13, %c0_14] : memref<128x128xf32, #tpu.memory_space<vmem>>, vector<128x128xf32>
    %cst_15 = arith.constant dense<0.000000e+00> : vector<8x128xf32>
    %38 = tpu.matmul %7, %37, %cst_15 {dimension_numbers = #tpu.dot_dimension_numbers<[1], [0], [0], [1], [0, 0, 1, 1], [], []>} : vector<8x128xf32>, vector<128x128xf32>, vector<8x128xf32> -> vector<8x128xf32>
    %c0_16 = arith.constant 0 : index
    %c0_17 = arith.constant 0 : index
    %39 = vector.load %arg9[%c0_16, %c0_17] : memref<1x128xf32, #tpu.memory_space<vmem>>, vector<1x128xf32>
    %40 = vector.broadcast %39 : vector<1x128xf32> to vector<8x128xf32>
    %41 = arith.addf %38, %40 : vector<8x128xf32>
    %c0_18 = arith.constant 0 : index
    %c0_19 = arith.constant 0 : index
    %42 = vector.load %arg8[%c0_18, %c0_19] : memref<4x128xf32, #tpu.memory_space<vmem>>, vector<4x128xf32>
    %43 = vector.extract_strided_slice %36 {offsets = [0, 0], sizes = [8, 1], strides = [1, 1]} : vector<8x4xf32> to vector<8x1xf32>
    %44 = vector.extract_strided_slice %42 {offsets = [0, 0], sizes = [1, 128], strides = [1, 1]} : vector<4x128xf32> to vector<1x128xf32>
    %45 = vector.broadcast %43 : vector<8x1xf32> to vector<8x128xf32>
    %46 = vector.broadcast %44 : vector<1x128xf32> to vector<8x128xf32>
    %47 = arith.mulf %45, %46 : vector<8x128xf32>
    %48 = arith.addf %41, %47 : vector<8x128xf32>
    %49 = vector.extract_strided_slice %36 {offsets = [0, 1], sizes = [8, 1], strides = [1, 1]} : vector<8x4xf32> to vector<8x1xf32>
    %50 = vector.extract_strided_slice %42 {offsets = [1, 0], sizes = [1, 128], strides = [1, 1]} : vector<4x128xf32> to vector<1x128xf32>
    %51 = vector.broadcast %49 : vector<8x1xf32> to vector<8x128xf32>
    %52 = vector.broadcast %50 : vector<1x128xf32> to vector<8x128xf32>
    %53 = arith.mulf %51, %52 : vector<8x128xf32>
    %54 = arith.addf %48, %53 : vector<8x128xf32>
    %55 = vector.extract_strided_slice %36 {offsets = [0, 2], sizes = [8, 1], strides = [1, 1]} : vector<8x4xf32> to vector<8x1xf32>
    %56 = vector.extract_strided_slice %42 {offsets = [2, 0], sizes = [1, 128], strides = [1, 1]} : vector<4x128xf32> to vector<1x128xf32>
    %57 = vector.broadcast %55 : vector<8x1xf32> to vector<8x128xf32>
    %58 = vector.broadcast %56 : vector<1x128xf32> to vector<8x128xf32>
    %59 = arith.mulf %57, %58 : vector<8x128xf32>
    %60 = arith.addf %54, %59 : vector<8x128xf32>
    %61 = vector.extract_strided_slice %36 {offsets = [0, 3], sizes = [8, 1], strides = [1, 1]} : vector<8x4xf32> to vector<8x1xf32>
    %62 = vector.extract_strided_slice %42 {offsets = [3, 0], sizes = [1, 128], strides = [1, 1]} : vector<4x128xf32> to vector<1x128xf32>
    %63 = vector.broadcast %61 : vector<8x1xf32> to vector<8x128xf32>
    %64 = vector.broadcast %62 : vector<1x128xf32> to vector<8x128xf32>
    %65 = arith.mulf %63, %64 : vector<8x128xf32>
    %66 = arith.addf %60, %65 : vector<8x128xf32>
    %cst_20 = arith.constant 0.000000e+00 : f32
    %67 = vector.broadcast %cst_20 : f32 to vector<8x128xf32>
    %68 = arith.maximumf %66, %67 : vector<8x128xf32>
    %c0_21 = arith.constant 0 : index
    %c0_22 = arith.constant 0 : index
    %69 = vector.load %arg10[%c0_21, %c0_22] : memref<8x128xf32, #tpu.memory_space<vmem>>, vector<8x128xf32>
    tpu.vector_store %arg10[%c0_21, %c0_22], %68 {strides = array<i32>} : memref<8x128xf32, #tpu.memory_space<vmem>>, vector<8x128xf32>,
    return
  }
  func.func @transform_0(%arg0: i32) -> (i32, i32) {
    %c0_i32 = arith.constant 0 : i32
    %c0_i32_0 = arith.constant 0 : i32
    return %arg0, %c0_i32 : i32, i32
  }
  func.func @transform_1(%arg0: i32) -> (i32, i32) {
    %c0_i32 = arith.constant 0 : i32
    %c0_i32_0 = arith.constant 0 : i32
    return %arg0, %c0_i32 : i32, i32
  }
  func.func @transform_2(%arg0: i32) -> (i32, i32) {
    %c0_i32 = arith.constant 0 : i32
    %c0_i32_0 = arith.constant 0 : i32
    %c0_i32_1 = arith.constant 0 : i32
    return %c0_i32, %c0_i32_0 : i32, i32
  }
  func.func @transform_3(%arg0: i32) -> (i32, i32) {
    %c0_i32 = arith.constant 0 : i32
    %c0_i32_0 = arith.constant 0 : i32
    %c0_i32_1 = arith.constant 0 : i32
    return %c0_i32, %c0_i32_0 : i32, i32
  }
  func.func @transform_4(%arg0: i32) -> (i32, i32) {
    %c0_i32 = arith.constant 0 : i32
    %c0_i32_0 = arith.constant 0 : i32
    %c0_i32_1 = arith.constant 0 : i32
    return %c0_i32, %c0_i32_0 : i32, i32
  }
  func.func @transform_5(%arg0: i32) -> (i32, i32) {
    %c0_i32 = arith.constant 0 : i32
    %c0_i32_0 = arith.constant 0 : i32
    %c0_i32_1 = arith.constant 0 : i32
    return %c0_i32, %c0_i32_0 : i32, i32
  }
  func.func @transform_6(%arg0: i32) -> (i32, i32) {
    %c0_i32 = arith.constant 0 : i32
    %c0_i32_0 = arith.constant 0 : i32
    %c0_i32_1 = arith.constant 0 : i32
    return %c0_i32, %c0_i32_0 : i32, i32
  }
  func.func @transform_7(%arg0: i32) -> (i32, i32) {
    %c0_i32 = arith.constant 0 : i32
    %c0_i32_0 = arith.constant 0 : i32
    %c0_i32_1 = arith.constant 0 : i32
    return %c0_i32, %c0_i32_0 : i32, i32
  }
  func.func @transform_8(%arg0: i32) -> (i32, i32) {
    %c0_i32 = arith.constant 0 : i32
    %c0_i32_0 = arith.constant 0 : i32
    %c0_i32_1 = arith.constant 0 : i32
    return %c0_i32, %c0_i32_0 : i32, i32
  }
  func.func @transform_9(%arg0: i32) -> (i32, i32) {
    %c0_i32 = arith.constant 0 : i32
    %c0_i32_0 = arith.constant 0 : i32
    return %arg0, %c0_i32 : i32, i32
  }
}

</mosaic_0001>

<bundles_post_ra>
// kernel: tpu_custom_call.1
= control target key start
LH: loop header
LB: loop body
LE: loop exit
PB: predicated region body
PF: predicated region fallthrough
CT: control target
= control target key end

     0   :  { %14 = vsyncpa [#allocation3], 0  ;;  %s9786_s0 = inlined_call_operand.hbm [shape: f32[8,32], index: 0, kind: input, shape index: {}]   ;;  %s9787_s1 = inlined_call_operand.hbm [shape: f32[8,16], index: 1, kind: input, shape index: {}]   ;;  %s9788_s2 = inlined_call_operand.hbm [shape: f32[32,128], index: 2, kind: input, shape index: {}]   ;;  %s9789_s3 = inlined_call_operand.vmem [shape: f32[1,128], index: 3, kind: input, shape index: {}]   ;;  %s9790_s4 = inlined_call_operand.vmem [shape: f32[4,3], index: 4, kind: input, shape index: {}]   ;;  %s9791_s5 = inlined_call_operand.hbm [shape: f32[1,4], index: 5, kind: input, shape index: {}]   ;;  %s9792_s6 = inlined_call_operand.hbm [shape: f32[128,128], index: 6, kind: input, shape index: {}]   ;;  %s9793_s7 = inlined_call_operand.vmem [shape: f32[4,128], index: 7, kind: input, shape index: {}]   ;;  %s9794_s8 = inlined_call_operand.vmem [shape: f32[1,128], index: 8, kind: input, shape index: {}]   ;;  %s9795_s9 = inlined_call_operand.hbm [shape: f32[8,128], index: 9, kind: output, shape index: {}]  }
   0x1   :  { %15 = vsyncpa [#allocation6], 0 }
   0x2   :  { %16 = vsyncpa [#allocation9], 0 }
   0x3   :  { %17 = vsyncpa [#allocation4], 0  ;;  %s6398_s30 = smov [#allocation5]   ;;  %s6399_s11 = smov [#allocation8]  }
   0x4   :  { %s34_s10 = sshll.u32 %s6398_s30, 4  ;;  %s60_s12 = sshll.u32 %s6399_s11, 4  ;;  %s35_s10 = int_to_ptr.vmem [resolvable:$true] %s34_s10  ;;  %s61_s12 = int_to_ptr.vmem [resolvable:$true] %s60_s12 }
   0x5   :  { %s6278_s13 = scalar_lea.vmem %s35_s10, 128  ;;  %p6283_p1 = scmp.lt.s32.totalorder %s35_s10, %s35_s10 }
   0x6   :  { %p6279_p0 = scmp.ne.s32.totalorder %s35_s10, %s6278_s13  ;;  %p6284_p2 = scmp.lt.s32.totalorder %s6278_s13, %s6278_s13 }
   0x8   :  { %p6285_p3 = por %p6284_p2, %p6283_p1 }
   0xa   :  { %p6286_p4 = pnand %p6285_p3, %p6279_p0 }
   0xc   :  { %6289 = shalt.err (!%p6286_p4)
}
   0xd   :  { %37 = dma.hbm_to_vmem [thread:$0]  %s9787_s1, 128, %s35_s10, [#allocation6]  }
   0xe   :  { %s6298_s16 = scalar_lea.vmem %s61_s12, 16  ;;  %s6302_s17 = scalar_lea.vmem %s61_s12, 32 }
   0xf   :  { %p6299_p5 = scmp.ne.s32.totalorder %s61_s12, %s6298_s16  ;;  %p6303_p6 = scmp.lt.s32.totalorder %s61_s12, %s61_s12 }
  0x10   :  { %p6304_p7 = scmp.lt.s32.totalorder %s6302_s17, %s6298_s16 }
  0x12   :  { %p6305_p8 = por %p6304_p7, %p6303_p6 }
  0x14   :  { %p6306_p9 = pnand %p6305_p8, %p6299_p5 }
  0x16   :  { %6309 = shalt.err (!%p6306_p9)
}
  0x17   :  { %63 = dma.hbm_to_vmem [thread:$0]  %s9791_s5, 16, %s61_s12, [#allocation9]  }
  0x18   :  { %s6400_s20 = smov [#allocation2]   ;;  %s6401_s22 = smov [#allocation7]  }
  0x19   :  { %s24_s21 = sshll.u32 %s6400_s20, 4  ;;  %s43_s23 = sshll.u32 %s6401_s22, 4  ;;  %s25_s21 = int_to_ptr.vmem [resolvable:$true] %s24_s21  ;;  %s44_s23 = int_to_ptr.vmem [resolvable:$true] %s43_s23 }
  0x1a   :  { %s6318_s24 = scalar_lea.vmem %s25_s21, 128  ;;  %p6323_p11 = scmp.lt.s32.totalorder %s25_s21, %s25_s21 }
  0x1b   :  { %p6319_p10 = scmp.ne.s32.totalorder %s25_s21, %s6318_s24  ;;  %p6324_p12 = scmp.lt.s32.totalorder %s6318_s24, %s6318_s24 }
  0x1d   :  { %p6325_p13 = por %p6324_p12, %p6323_p11 }
  0x1f   :  { %p6326_p0 = pnand %p6325_p13, %p6319_p10 }
  0x21   :  { %6329 = shalt.err (!%p6326_p0)
}
  0x22   :  { %27 = dma.hbm_to_vmem [thread:$0]  %s9786_s0, 128, %s25_s21, [#allocation3]  }
  0x23   :  { %s6338_s26 = scalar_lea.vmem %s44_s23, 512  ;;  %p6343_p2 = scmp.lt.s32.totalorder %s44_s23, %s44_s23 }
  0x24   :  { %p6339_p1 = scmp.ne.s32.totalorder %s44_s23, %s6338_s26  ;;  %p6344_p3 = scmp.lt.s32.totalorder %s6338_s26, %s6338_s26 }
  0x26   :  { %p6345_p4 = por %p6344_p3, %p6343_p2 }
  0x28   :  { %p6346_p5 = pnand %p6345_p4, %p6339_p1 }
  0x2a   :  { %6349 = shalt.err (!%p6346_p5)
}
  0x2b   :  { %s6402_s5 = smov 128   ;;  %s6403_s27 = smov 8  }
  0x2c   :  { %49 = dma.hbm_to_vmem [thread:$0]  %s9788_s2, 512, %s44_s23, [#allocation6], %s6402_s5, %s6402_s5, %s6403_s27  }
  0x2d   :  { %s6404_s30 = smov [#allocation10]  }
  0x2e   :  { %s69_s10 = sshll.u32 %s6404_s30, 4  ;;  %s70_s10 = int_to_ptr.vmem [resolvable:$true] %s69_s10 }
  0x2f   :  { %s6358_s11 = scalar_lea.vmem %s70_s10, 2048  ;;  %p6363_p7 = scmp.lt.s32.totalorder %s70_s10, %s70_s10 }
  0x30   :  { %p6359_p6 = scmp.ne.s32.totalorder %s70_s10, %s6358_s11  ;;  %p6364_p8 = scmp.lt.s32.totalorder %s6358_s11, %s6358_s11 }
  0x32   :  { %p6365_p9 = por %p6364_p8, %p6363_p7 }
  0x34   :  { %p6366_p10 = pnand %p6365_p9, %p6359_p6 }
  0x36   :  { %6369 = shalt.err (!%p6366_p10)
}
  0x37   :  { %75 = dma.hbm_to_vmem [thread:$0]  %s9792_s6, 2048, %s70_s10, [#allocation9], %s6402_s5, %s6402_s5, %s6403_s27  }
  0x38   :  { %6390 = dma.done.wait [#allocation3], 128  }
  0x39   :  { %6391 = vsyncadd [#allocation3], 4294967168 }
  0x3a   :  { %6392 = dma.done.wait [#allocation6], 640  }
  0x3b   :  { %6393 = vsyncadd [#allocation6], 4294966656 }
  0x3c   :  { %6394 = dma.done.wait [#allocation9], 2064  }
  0x3d   :  { %6395 = vsyncadd [#allocation9], 4294965232  ;;  %v9796_v0 = vlaneseq  ;;  %v6405_v1 = vmov 0   ;;  %v6406_v2 = vmov 2   ;;  %v183_v4 = vld [vmem:[%s9790_s4] sm:$0xf] }
  0x3e   :  { %6262 = vset.pattern.permute.xlu0 %v6405_v1  ;;  %6264 = vset.pattern.permute.xlu1 %v6406_v2  ;;  %v6176_v6 = vld [vmem:[#allocation8] ss:$0 sm:$0xff]  ;;  %v527_v7 = vld [vmem:[%s9793_s7] sm:$0xf]  ;;  %v6407_v8 = vmov 1   ;;  %v182_v16 = vld [vmem:[#allocation5] sm:$0xff] }
  0x3f   :  { %v6480_v3 = vshrl.u32 %v9796_v0, 7  ;;  %276 = vperm.xlu0 %6262, %v183_v4   ;;  %340 = vperm.xlu1 %6264, %v183_v4   ;;  %v6408_v12 = vmov 1966171168   ;;  %v185_v18 = vcombine.high %v182_v16, %v182_v16  ;;  %s6409_s4 = smov 127   ;;  %s6410_s15 = smov 126   ;;  %v99_v55 = vld [vmem:[#allocation7 + $0x18] sm:$0xff] }
  0x40   :  { %v187_v13 = vunpack.c.l.s4 %v6408_v12  ;;  %v6411_v56 = vmov 0.0   ;;  %vm6412_vm0 = vmmov 0   ;;  %v98_v57 = vld [vmem:[#allocation7 + $0x10] sm:$0xff]  ;;  %v97_v59 = vld [vmem:[#allocation7 + $0x8] sm:$0xff]  ;;  %v96_v60 = vld [vmem:[#allocation7] sm:$0xff]  ;;  %vm107_vm1 = vcmask 261120  }
  0x41   :  { %9852 = vst [vmem:[#allocation16_spill] sm:$0xff] %v6480_v3  ;;  %v6486_v5 = vsub.s32 0, %v6480_v3  ;;  %v6493_v10 = vsub.s32 1, %v6480_v3  ;;  %6200 = vmatprep.subr.mxu0 %v6411_v56  ;;  %6208 = vmatprep.mubr.msk.f32.mxu0 %vm6412_vm0, %v6411_v56  ;;  %v95_v61 = vld [vmem:[#allocation2] sm:$0xff]  ;;  %vm391_vm2 = vcmask 109568   ;;  %vm1295_vm3 = vcmask 130112  }
  0x42   :  { %v188_v14 = vunpack.c.0.s8 %v187_v13  ;;  %6201 = vmatpush3.msra.mxu0 %v99_v55  ;;  %6211 = vmatprep.subr.mxu1 %v6411_v56  ;;  %vm1302_vm4 = vcmask 195712   ;;  %vm1309_vm5 = vcmask 261312   ;;  %vm1316_vm6 = vcmask 326912  }
  0x43   :  { %6263 = vset.pattern.permute.xlu0 %v6407_v8  ;;  %423 = vbcast.lane.b32.xlu1 %v6176_v6, 256  ;;  %v563_v9 = vrot.slane %v527_v7, %v6486_v5  ;;  %9853 = vst [vmem:[#allocation17_spill] sm:$0xff] %v6493_v10  ;;  %v6496_v11 = vrot.slane %v527_v7, %v6493_v10  ;;  %vm9846_vm7 = vcmask 392512   ;;  %vm9830_vm8 = vcmask 458112  }
  0x44   :  { %288 = vperm.xlu0 %6263, %v183_v4   ;;  %6265 = vset.pattern.permute.xlu1 %v6405_v1  ;;  %v191_v15 = vsub.s32 %v188_v14, %v6480_v3  ;;  %vm9829_vm9 = vcmask 523712   ;;  %vm1344_vm10 = vcmask 589312   ;;  %vm1351_vm11 = vcmask 654912  }
  0x45   :  { %6202 = vmatprep.subr.mxu0 %v6411_v56  ;;  %6243 = vmatprep.mubr.msk.f32.mxu1 %vm6412_vm0, %v6411_v56  ;;  %vm9826_vm12 = vcmask 720512   ;;  %vm1365_vm13 = vcmask 786112   ;;  %vm1372_vm14 = vcmask 851712   ;;  %vm9831_vm15 = vcmask 917312  }
  0x46   :  { %v192_v17 = vrot.slane %v182_v16, %v191_v15  ;;  %v199_v21 = vrot.slane %v185_v18, %v191_v15  ;;  %6203 = vmatpush3.msra.mxu0 %v98_v57  ;;  %vm1386_vm0 = vcmask 982912  }
  0x47   :  { %570 = vbcast.lane.b32.xlu1 %v563_v9, 264  ;;  %6204 = vmatprep.subr.mxu0 %v6411_v56 }
  0x48   :  { %566 = vbcast.lane.b32.xlu0 %v563_v9, 256  ;;  %v200_v19 = vcombine.high %v192_v17, %v192_v17  ;;  %v201_v24 = vcombine.high %v199_v21, %v199_v21  ;;  %v208_v25 = vrot.slane %v192_v17, %v191_v15  ;;  %v215_v40 = vrot.slane %v199_v21, %v191_v15 }
  0x49   :  { %6266 = vset.pattern.permute.xlu0 %v6405_v1  ;;  %6205 = vmatpush3.msra.mxu0 %v97_v59 }
  0x4a   :  { %v222_v20 = vrot.slane %v200_v19, %v191_v15  ;;  %v6506_v26 = vrot.slane %v208_v25, %v6486_v5  ;;  %v229_v28 = vrot.slane %v201_v24, %v191_v15  ;;  %v230_v32 = vcombine.high %v208_v25, %v208_v25  ;;  %6206 = vmatprep.subr.mxu0 %v6411_v56 }
  0x4b   :  { %574 = vbcast.lane.b32.xlu1 %v563_v9, 272  ;;  %v6530_v44 = vrot.slane %v215_v40, %v6486_v5  ;;  %v231_v46 = vcombine.high %v215_v40, %v215_v40  ;;  %6207 = vmatpush3.msra.mxu0 %v96_v60 }
  0x4c   :  { %578 = vbcast.lane.b32.xlu0 %v563_v9, 280  ;;  %v232_v23 = vcombine.high %v222_v20, %v222_v20  ;;  %v6514_v33 = vrot.slane %v222_v20, %v6486_v5  ;;  %v6517_v34 = vrot.slane %v229_v28, %v6486_v5  ;;  %v233_v35 = vcombine.high %v229_v28, %v229_v28 }
  0x4d   :  { %v6522_v38 = vrot.slane %v230_v32, %v6486_v5  ;;  %v6536_v48 = vrot.slane %v231_v46, %v6486_v5  ;;  %6209 = vmatmul.mubr.msk.f32.vlgmr.msra.gmra.mxu0 %vm107_vm1, %v95_v61  ;;  %vm1393_vm1 = vcmask 1048512  }
  0x4e   :  { %v6509_v27 = vrot.slane %v232_v23, %v6486_v5  ;;  %v6525_v39 = vrot.slane %v233_v35, %v6486_v5 }
  0x4f   :  { %582 = vbcast.lane.b32.xlu1 %v563_v9, 288 }
  0x50   :  { %586 = vbcast.lane.b32.xlu0 %v563_v9, 296 }
  0x53   :  { %590 = vbcast.lane.b32.xlu1 %v563_v9, 304 }
  0x54   :  { %594 = vbcast.lane.b32.xlu0 %v563_v9, 312 }
  0x57   :  { %598 = vbcast.lane.b32.xlu1 %v563_v9, 320 }
  0x58   :  { %602 = vbcast.lane.b32.xlu0 %v563_v9, 328 }
  0x5b   :  { %606 = vbcast.lane.b32.xlu1 %v563_v9, 336 }
  0x5c   :  { %610 = vbcast.lane.b32.xlu0 %v563_v9, 344 }
  0x5f   :  { %614 = vbcast.lane.b32.xlu1 %v563_v9, 352 }
  0x60   :  { %618 = vbcast.lane.b32.xlu0 %v563_v9, 360 }
  0x63   :  { %622 = vbcast.lane.b32.xlu1 %v563_v9, 368 }
  0x64   :  { %626 = vbcast.lane.b32.xlu0 %v563_v9, 376 }
  0x67   :  { %2006 = vbcast.lane.b32.xlu1 %v6496_v11, 264 }
  0x68   :  { %2002 = vbcast.lane.b32.xlu0 %v6496_v11, 256 }
  0x6b   :  { %2014 = vbcast.lane.b32.xlu1 %v6496_v11, 280 }
  0x6c   :  { %2010 = vbcast.lane.b32.xlu0 %v6496_v11, 272 }
  0xba   :  { %v6503_v22 = vpop.permute.xlu0 %276  ;;  %v341_v41 = vpop.permute.xlu1 %340 }
  0xbb   :  { %v343_v45 = vmul.f32 %v341_v41, %v6506_v26  ;;  %v345_v50 = vmul.f32 %v341_v41, %v6522_v38  ;;  %v344_v51 = vmul.f32 %v341_v41, %v6514_v33  ;;  %v347_v52 = vmul.f32 %v341_v41, %v6530_v44 }
  0xbc   :  { %v346_v53 = vmul.f32 %v341_v41, %v6509_v27  ;;  %v349_v54 = vmul.f32 %v341_v41, %v6536_v48  ;;  %v348_v58 = vmul.f32 %v341_v41, %v6517_v34  ;;  %v350_v62 = vmul.f32 %v341_v41, %v6525_v39 }
  0xbd   :  { %v282_v55 = vmul.f32 %v6503_v22, %v6509_v27  ;;  %v285_v60 = vmul.f32 %v6503_v22, %v6536_v48 }
  0xbe   :  { %v6560_v63 = vpop.permute.xlu1 %423 }
  0xbf   :  { %v289_v29 = vpop.permute.xlu0 %288 }
  0xc0   :  { %v291_v30 = vmul.f32 %v289_v29, %v6506_v26  ;;  %v294_v31 = vmul.f32 %v289_v29, %v6509_v27  ;;  %v292_v36 = vmul.f32 %v289_v29, %v6514_v33  ;;  %v296_v37 = vmul.f32 %v289_v29, %v6517_v34 }
  0xc1   :  { %v293_v42 = vmul.f32 %v289_v29, %v6522_v38  ;;  %v298_v43 = vmul.f32 %v289_v29, %v6525_v39  ;;  %v295_v47 = vmul.f32 %v289_v29, %v6530_v44  ;;  %v297_v49 = vmul.f32 %v289_v29, %v6536_v48 }
  0xc2   :  { %307 = vrot.lane.b32.xlu1 %v291_v30, %s6409_s4  ;;  %313 = vrot.lane.b32.xlu0 %v294_v31, %s6409_s4  ;;  %v6562_v1 = vpop.permute.xlu1 %570  ;;  %v286_v48 = vmul.f32 %v6503_v22, %v6525_v39 }
  0xc3   :  { %v6564_v2 = vpop.permute.xlu0 %566 }
  0xc6   :  { %309 = vrot.lane.b32.xlu1 %v292_v36, %s6409_s4  ;;  %317 = vrot.lane.b32.xlu0 %v296_v37, %s6409_s4  ;;  %v6566_v4 = vpop.permute.xlu1 %574  ;;  %v279_v36 = vmul.f32 %v6503_v22, %v6506_v26  ;;  %v283_v26 = vmul.f32 %v6503_v22, %v6530_v44 }
  0xc7   :  { %v6568_v6 = vpop.permute.xlu0 %578 }
  0xca   :  { %311 = vrot.lane.b32.xlu1 %v293_v42, %s6409_s4  ;;  %321 = vrot.lane.b32.xlu0 %v298_v43, %s6409_s4  ;;  %v6570_v7 = vpop.permute.xlu1 %582  ;;  %v281_v42 = vmul.f32 %v6503_v22, %v6522_v38 }
  0xcb   :  { %v6572_v8 = vpop.permute.xlu0 %586 }
  0xce   :  { %315 = vrot.lane.b32.xlu1 %v295_v47, %s6409_s4  ;;  %359 = vrot.lane.b32.xlu0 %v343_v45, %s6410_s15  ;;  %v6574_v9 = vpop.permute.xlu1 %590 }
  0xcf   :  { %v6576_v12 = vpop.permute.xlu0 %594 }
  0xd2   :  { %319 = vrot.lane.b32.xlu1 %v297_v49, %s6409_s4  ;;  %363 = vrot.lane.b32.xlu0 %v345_v50, %s6410_s15  ;;  %v6578_v13 = vpop.permute.xlu1 %598  ;;  %v280_v50 = vmul.f32 %v6503_v22, %v6514_v33 }
  0xd3   :  { %v6580_v14 = vpop.permute.xlu0 %602 }
  0xd6   :  { %361 = vrot.lane.b32.xlu1 %v344_v51, %s6410_s15  ;;  %367 = vrot.lane.b32.xlu0 %v347_v52, %s6410_s15  ;;  %v6582_v15 = vpop.permute.xlu1 %606 }
  0xd7   :  { %v6584_v16 = vpop.permute.xlu0 %610 }
  0xda   :  { %365 = vrot.lane.b32.xlu1 %v346_v53, %s6410_s15  ;;  %371 = vrot.lane.b32.xlu0 %v349_v54, %s6410_s15  ;;  %v6586_v17 = vpop.permute.xlu1 %614 }
  0xdb   :  { %v6588_v18 = vpop.permute.xlu0 %618 }
  0xde   :  { %369 = vrot.lane.b32.xlu1 %v348_v58, %s6410_s15  ;;  %v6590_v19 = vpop.permute.xlu1 %622 }
  0xdf   :  { %v6592_v20 = vpop.permute.xlu0 %626 }
  0xe2   :  { %373 = vrot.lane.b32.xlu1 %v350_v62, %s6410_s15  ;;  %v6594_v21 = vpop.permute.xlu1 %2006 }
  0xe3   :  { %9854 = vst [vmem:[#allocation18_spill] sm:$0xff] %v6594_v21  ;;  %v6596_v23 = vpop.permute.xlu0 %2002 }
  0xe4   :  { %9855 = vst [vmem:[#allocation19_spill] sm:$0xff] %v6596_v23 }
  0xe6   :  { %v6598_v24 = vpop.permute.xlu1 %2014 }
  0xe7   :  { %9856 = vst [vmem:[#allocation20_spill] sm:$0xff] %v6598_v24  ;;  %v6600_v25 = vpop.permute.xlu0 %2010 }
  0xe8   :  { %9857 = vst [vmem:[#allocation21_spill] sm:$0xff] %v6600_v25 }
 0x134   :  { %v308_v28 = vpop.permute.xlu1 %307  ;;  %v314_v29 = vpop.permute.xlu0 %313 }
 0x135   :  { %v331_v37 = vadd.f32 %v308_v28, %v279_v36  ;;  %v334_v59 = vadd.f32 %v314_v29, %v282_v55  ;;  %v284_v28 = vmul.f32 %v6503_v22, %v6517_v34 }
 0x138   :  { %v310_v30 = vpop.permute.xlu1 %309  ;;  %v318_v31 = vpop.permute.xlu0 %317 }
 0x139   :  { %v332_v52 = vadd.f32 %v310_v30, %v280_v50  ;;  %v336_v36 = vadd.f32 %v318_v31, %v284_v28 }
 0x13c   :  { %v312_v32 = vpop.permute.xlu1 %311  ;;  %v322_v35 = vpop.permute.xlu0 %321 }
 0x13d   :  { %v333_v45 = vadd.f32 %v312_v32, %v281_v42  ;;  %v338_v42 = vadd.f32 %v322_v35, %v286_v48 }
 0x140   :  { %v316_v40 = vpop.permute.xlu1 %315  ;;  %v360_v41 = vpop.permute.xlu0 %359 }
 0x141   :  { %v383_v43 = vadd.f32 %v360_v41, %v331_v37  ;;  %v335_v57 = vadd.f32 %v316_v40, %v283_v26 }
 0x143   :  { %v392_v46 = vsel %vm391_vm2, %v383_v43, -inf }
 0x144   :  { %v320_v47 = vpop.permute.xlu1 %319  ;;  %393 = vmax.xlane.f32.xlu0 %v392_v46  ;;  %v364_v49 = vpop.permute.xlu0 %363 }
 0x145   :  { %v385_v51 = vadd.f32 %v364_v49, %v333_v45  ;;  %v337_v30 = vadd.f32 %v320_v47, %v285_v60 }
 0x147   :  { %v398_v53 = vsel %vm391_vm2, %v385_v51, -inf }
 0x148   :  { %v362_v54 = vpop.permute.xlu1 %361  ;;  %399 = vmax.xlane.f32.xlu0 %v398_v53  ;;  %v368_v38 = vpop.permute.xlu0 %367 }
 0x149   :  { %v384_v58 = vadd.f32 %v362_v54, %v332_v52  ;;  %v387_v33 = vadd.f32 %v368_v38, %v335_v57 }
 0x14b   :  { %v395_v61 = vsel %vm391_vm2, %v384_v58, -inf  ;;  %v404_v29 = vsel %vm391_vm2, %v387_v33, -inf }
 0x14c   :  { %v366_v62 = vpop.permute.xlu1 %365  ;;  %396 = vmax.xlane.f32.xlu1 %v395_v61  ;;  %v372_v44 = vpop.permute.xlu0 %371 }
 0x14d   :  { %v386_v32 = vadd.f32 %v366_v62, %v334_v59  ;;  %v389_v37 = vadd.f32 %v372_v44, %v337_v30 }
 0x14f   :  { %v401_v27 = vsel %vm391_vm2, %v386_v32, -inf  ;;  %v410_v34 = vsel %vm391_vm2, %v389_v37, -inf  ;;  %v449_v32 = vld [vmem:[#allocation10 + $0x78] sm:$0xff] }
 0x150   :  { %v370_v40 = vpop.permute.xlu1 %369  ;;  %402 = vmax.xlane.f32.xlu0 %v401_v27  ;;  %405 = vmax.xlane.f32.xlu1 %v404_v29  ;;  %v448_v27 = vld [vmem:[#allocation10 + $0x70] sm:$0xff]  ;;  %v447_v29 = vld [vmem:[#allocation10 + $0x68] sm:$0xff] }
 0x151   :  { %v388_v41 = vadd.f32 %v370_v40, %v336_v36  ;;  %6212 = vmatpush3.msra.mxu1 %v449_v32 }
 0x152   :  { %6213 = vmatprep.subr.mxu1 %v6411_v56 }
 0x153   :  { %v407_v43 = vsel %vm391_vm2, %v388_v41, -inf  ;;  %6214 = vmatpush3.msra.mxu1 %v448_v27  ;;  %v446_v41 = vld [vmem:[#allocation10 + $0x60] sm:$0xff] }
 0x154   :  { %v374_v45 = vpop.permute.xlu1 %373  ;;  %408 = vmax.xlane.f32.xlu0 %v407_v43  ;;  %411 = vmax.xlane.f32.xlu1 %v410_v34 }
 0x155   :  { %v390_v31 = vadd.f32 %v374_v45, %v338_v42  ;;  %6215 = vmatprep.subr.mxu1 %v6411_v56  ;;  %v445_v42 = vld [vmem:[#allocation10 + $0x58] sm:$0xff]  ;;  %v444_v45 = vld [vmem:[#allocation10 + $0x50] sm:$0xff] }
 0x156   :  { %6216 = vmatpush3.msra.mxu1 %v447_v29 }
 0x157   :  { %v413_v46 = vsel %vm391_vm2, %v390_v31, -inf  ;;  %6217 = vmatprep.subr.mxu1 %v6411_v56  ;;  %v443_v31 = vld [vmem:[#allocation10 + $0x48] sm:$0xff]  ;;  %vm9828_vm2 = vcmask 1041409  }
 0x158   :  { %414 = vmax.xlane.f32.xlu0 %v413_v46  ;;  %6218 = vmatpush3.msra.mxu1 %v446_v41 }
 0x159   :  { %6219 = vmatprep.subr.mxu1 %v6411_v56 }
 0x15a   :  { %6220 = vmatpush3.msra.mxu1 %v445_v42 }
 0x15b   :  { %6221 = vmatprep.subr.mxu1 %v6411_v56 }
 0x15c   :  { %6222 = vmatpush3.msra.mxu1 %v444_v45 }
 0x15d   :  { %6223 = vmatprep.subr.mxu1 %v6411_v56 }
 0x15e   :  { %6224 = vmatpush3.msra.mxu1 %v443_v31 }
 0x15f   :  { %6225 = vmatprep.subr.mxu1 %v6411_v56 }
 0x1cd   :  { %v394_v47 = vpop.xlane.xlu0 %393 }
 0x1ce   :  { %v6627_v49 = vadd.f32 %v6560_v63, %v394_v47 }
 0x1d0   :  { %9858 = vst [vmem:[#allocation22_spill] sm:$0xff] %v6627_v49  ;;  %v531_v22 = vrot.slane %v6627_v49, %v6486_v5 }
 0x1d2   :  { %v644_v39 = vmul.f32 %v6564_v2, %v531_v22  ;;  %v645_v35 = vmul.f32 %v6562_v1, %v531_v22  ;;  %v646_v50 = vmul.f32 %v6566_v4, %v531_v22  ;;  %v648_v51 = vmul.f32 %v6570_v7, %v531_v22 }
 0x1d3   :  { %v647_v52 = vmul.f32 %v6568_v6, %v531_v22  ;;  %v650_v26 = vmul.f32 %v6574_v9, %v531_v22  ;;  %v649_v53 = vmul.f32 %v6572_v8, %v531_v22  ;;  %v652_v54 = vmul.f32 %v6578_v13, %v531_v22 }
 0x1d4   :  { %901 = vperm.xlu1 %6265, %v644_v39   ;;  %904 = vperm.xlu0 %6266, %v645_v35   ;;  %v651_v38 = vmul.f32 %v6576_v12, %v531_v22  ;;  %v654_v55 = vmul.f32 %v6582_v15, %v531_v22  ;;  %v653_v58 = vmul.f32 %v6580_v14, %v531_v22  ;;  %v441_v39 = vld [vmem:[#allocation10 + $0x38] sm:$0xff] }
 0x1d5   :  { %v397_v57 = vpop.xlane.xlu1 %396  ;;  %v656_v60 = vmul.f32 %v6586_v17, %v531_v22  ;;  %v655_v33 = vmul.f32 %v6584_v16, %v531_v22  ;;  %v658_v62 = vmul.f32 %v6590_v19, %v531_v22  ;;  %v657_v44 = vmul.f32 %v6588_v18, %v531_v22 }
 0x1d6   :  { %v6643_v59 = vadd.f32 %v6560_v63, %v397_v57  ;;  %v659_v30 = vmul.f32 %v6592_v20, %v531_v22  ;;  %v442_v22 = vld [vmem:[#allocation10 + $0x40] sm:$0xff]  ;;  %v437_v57 = vld [vmem:[#allocation10 + $0x18] sm:$0xff] }
 0x1d7   :  { %6226 = vmatpush3.msra.mxu1 %v442_v22 }
 0x1d8   :  { %907 = vperm.xlu1 %6265, %v646_v50   ;;  %913 = vperm.xlu0 %6266, %v648_v51   ;;  %9859 = vst [vmem:[#allocation23_spill] sm:$0xff] %v6643_v59  ;;  %v6649_v61 = vrot.slane %v6643_v59, %v6486_v5  ;;  %v400_v50 = vpop.xlane.xlu0 %399 }
 0x1d9   :  { %6227 = vmatprep.subr.mxu1 %v6411_v56 }
 0x1da   :  { %v660_v28 = vmul.f32 %v6564_v2, %v6649_v61  ;;  %v662_v36 = vmul.f32 %v6566_v4, %v6649_v61  ;;  %v661_v37 = vmul.f32 %v6562_v1, %v6649_v61  ;;  %v664_v40 = vmul.f32 %v6570_v7, %v6649_v61  ;;  %6228 = vmatpush3.msra.mxu1 %v441_v39 }
 0x1db   :  { %v663_v48 = vmul.f32 %v6568_v6, %v6649_v61  ;;  %v666_v43 = vmul.f32 %v6574_v9, %v6649_v61  ;;  %v665_v34 = vmul.f32 %v6572_v8, %v6649_v61  ;;  %v668_v46 = vmul.f32 %v6578_v13, %v6649_v61  ;;  %6229 = vmatprep.subr.mxu1 %v6411_v56 }
 0x1dc   :  { %910 = vperm.xlu1 %6265, %v647_v52   ;;  %919 = vperm.xlu0 %6266, %v650_v26   ;;  %v667_v47 = vmul.f32 %v6576_v12, %v6649_v61  ;;  %v670_v35 = vmul.f32 %v6582_v15, %v6649_v61  ;;  %v669_v51 = vmul.f32 %v6580_v14, %v6649_v61  ;;  %v440_v52 = vld [vmem:[#allocation10 + $0x30] sm:$0xff]  ;;  %v439_v26 = vld [vmem:[#allocation10 + $0x28] sm:$0xff] }
 0x1dd   :  { %6230 = vmatpush3.msra.mxu1 %v440_v52  ;;  %v675_v29 = vmul.f32 %v6592_v20, %v6649_v61 }
 0x1de   :  { %6231 = vmatprep.subr.mxu1 %v6411_v56 }
 0x1df   :  { %6232 = vmatpush3.msra.mxu1 %v439_v26 }
 0x1e0   :  { %916 = vperm.xlu1 %6265, %v649_v53   ;;  %925 = vperm.xlu0 %6266, %v652_v54   ;;  %v6686_v53 = vadd.f32 %v6560_v63, %v400_v50  ;;  %v672_v54 = vmul.f32 %v6586_v17, %v6649_v61 }
 0x1e1   :  { %6233 = vmatprep.subr.mxu1 %v6411_v56 }
 0x1e2   :  { %9860 = vst [vmem:[#allocation24_spill] sm:$0xff] %v6686_v53 }
 0x1e4   :  { %922 = vperm.xlu1 %6265, %v651_v38   ;;  %931 = vperm.xlu0 %6266, %v654_v55   ;;  %v671_v38 = vmul.f32 %v6584_v16, %v6649_v61  ;;  %v438_v55 = vld [vmem:[#allocation10 + $0x20] sm:$0xff] }
 0x1e5   :  { %6234 = vmatpush3.msra.mxu1 %v438_v55 }
 0x1e6   :  { %6235 = vmatprep.subr.mxu1 %v6411_v56 }
 0x1e7   :  { %6236 = vmatpush3.msra.mxu1 %v437_v57 }
 0x1e8   :  { %928 = vperm.xlu1 %6265, %v653_v58   ;;  %937 = vperm.xlu0 %6266, %v656_v60   ;;  %v539_v58 = vrot.slane %v6686_v53, %v6486_v5  ;;  %v674_v60 = vmul.f32 %v6590_v19, %v6649_v61 }
 0x1e9   :  { %6237 = vmatprep.subr.mxu1 %v6411_v56 }
 0x1ea   :  { %v676_v32 = vmul.f32 %v6564_v2, %v539_v58  ;;  %v677_v41 = vmul.f32 %v6562_v1, %v539_v58  ;;  %v680_v42 = vmul.f32 %v6570_v7, %v539_v58  ;;  %v683_v45 = vmul.f32 %v6576_v12, %v539_v58 }
 0x1eb   :  { %v686_v31 = vmul.f32 %v6582_v15, %v539_v58  ;;  %v688_v39 = vmul.f32 %v6586_v17, %v539_v58  ;;  %v689_v52 = vmul.f32 %v6588_v18, %v539_v58 }
 0x1ec   :  { %934 = vperm.xlu1 %6265, %v655_v33   ;;  %943 = vperm.xlu0 %6266, %v658_v62   ;;  %v673_v33 = vmul.f32 %v6588_v18, %v6649_v61  ;;  %v436_v62 = vld [vmem:[#allocation10 + $0x10] sm:$0xff]  ;;  %v684_v61 = vmul.f32 %v6578_v13, %v539_v58 }
 0x1ed   :  { %6238 = vmatpush3.msra.mxu1 %v436_v62 }
 0x1ee   :  { %6239 = vmatprep.subr.mxu1 %v6411_v56 }
 0x1f0   :  { %940 = vperm.xlu1 %6265, %v657_v44   ;;  %949 = vperm.xlu0 %6266, %v660_v28   ;;  %v6174_v44 = vld [vmem:[%s9789_s3] ss:$0 sm:$0xff]  ;;  %v177_v28 = vpop.f32.mrf.mxu0 }
 0x1f4   :  { %946 = vperm.xlu1 %6265, %v659_v30   ;;  %955 = vperm.xlu0 %6266, %v662_v36   ;;  %v435_v30 = vld [vmem:[#allocation10 + $0x8] sm:$0xff]  ;;  %v178_v36 = vadd.f32 %v6174_v44, %v177_v28 }
 0x1f5   :  { %6240 = vmatpush3.msra.mxu1 %v435_v30  ;;  %v406_v30 = vpop.xlane.xlu1 %405 }
 0x1f6   :  { %v181_v27 = vmax.f32 %v178_v36, 0.0  ;;  %6241 = vmatprep.subr.mxu1 %v6411_v56  ;;  %v681_v56 = vmul.f32 %v6572_v8, %v539_v58 }
 0x1f8   :  { %952 = vperm.xlu1 %6265, %v661_v37   ;;  %961 = vperm.xlu0 %6266, %v664_v40   ;;  %v6210_v37 = vpop.f32.mrf.mxu0  ;;  %v678_v40 = vmul.f32 %v6566_v4, %v539_v58 }
 0x1f9   :  { %v6742_v37 = vadd.f32 %v6560_v63, %v406_v30 }
 0x1fb   :  { %9862 = vst [vmem:[#allocation26_spill] sm:$0xff] %v6742_v37 }
 0x1fc   :  { %958 = vperm.xlu1 %6265, %v663_v48   ;;  %967 = vperm.xlu0 %6266, %v666_v43   ;;  %v434_v48 = vld [vmem:[#allocation10] sm:$0xff]  ;;  %v679_v43 = vmul.f32 %v6568_v6, %v539_v58 }
 0x1fd   :  { %6242 = vmatpush3.msra.mxu1 %v434_v48  ;;  %v6748_v48 = vpop.xlane.xlu1 %411 }
 0x1fe   :  { %6244 = vmatmul.mubr.f32.vlgmr.msra.gmra.mxu1 %v181_v27 }
 0x200   :  { %964 = vperm.xlu1 %6265, %v665_v34   ;;  %973 = vperm.xlu0 %6266, %v668_v46   ;;  %v682_v34 = vmul.f32 %v6574_v9, %v539_v58  ;;  %v403_v46 = vpop.xlane.xlu0 %402 }
 0x201   :  { %v6721_v22 = vadd.f32 %v6560_v63, %v403_v46 }
 0x203   :  { %9861 = vst [vmem:[#allocation25_spill] sm:$0xff] %v6721_v22  ;;  %v543_v50 = vrot.slane %v6721_v22, %v6486_v5 }
 0x204   :  { %970 = vperm.xlu1 %6265, %v667_v47   ;;  %979 = vperm.xlu0 %6266, %v670_v35   ;;  %v685_v47 = vmul.f32 %v6580_v14, %v539_v58  ;;  %v687_v35 = vmul.f32 %v6584_v16, %v539_v58 }
 0x205   :  { %v692_v26 = vmul.f32 %v6564_v2, %v543_v50  ;;  %v693_v55 = vmul.f32 %v6562_v1, %v543_v50  ;;  %v696_v57 = vmul.f32 %v6570_v7, %v543_v50  ;;  %v697_v62 = vmul.f32 %v6572_v8, %v543_v50 }
 0x206   :  { %v699_v44 = vmul.f32 %v6576_v12, %v543_v50  ;;  %v702_v28 = vmul.f32 %v6582_v15, %v543_v50  ;;  %v701_v36 = vmul.f32 %v6580_v14, %v543_v50  ;;  %v704_v27 = vmul.f32 %v6586_v17, %v543_v50 }
 0x208   :  { %976 = vperm.xlu1 %6265, %v669_v51   ;;  %985 = vperm.xlu0 %6266, %v672_v54   ;;  %v690_v51 = vmul.f32 %v6590_v19, %v539_v58  ;;  %v691_v54 = vmul.f32 %v6592_v20, %v539_v58  ;;  %v700_v58 = vmul.f32 %v6578_v13, %v543_v50 }
 0x20c   :  { %982 = vperm.xlu1 %6265, %v671_v38   ;;  %991 = vperm.xlu0 %6266, %v674_v60   ;;  %v694_v38 = vmul.f32 %v6566_v4, %v543_v50  ;;  %v695_v60 = vmul.f32 %v6568_v6, %v543_v50 }
 0x210   :  { %988 = vperm.xlu1 %6265, %v673_v33   ;;  %997 = vperm.xlu0 %6266, %v676_v32   ;;  %v698_v33 = vmul.f32 %v6574_v9, %v543_v50  ;;  %v409_v32 = vpop.xlane.xlu0 %408 }
 0x214   :  { %994 = vperm.xlu1 %6265, %v675_v29   ;;  %1003 = vperm.xlu0 %6266, %v678_v40   ;;  %v703_v29 = vmul.f32 %v6584_v16, %v543_v50  ;;  %v547_v40 = vrot.slane %v6742_v37, %v6486_v5 }
 0x216   :  { %v710_v46 = vmul.f32 %v6566_v4, %v547_v40  ;;  %v717_v30 = vmul.f32 %v6580_v14, %v547_v40 }
 0x218   :  { %1000 = vperm.xlu1 %6265, %v677_v41   ;;  %1009 = vperm.xlu0 %6266, %v680_v42   ;;  %v706_v41 = vmul.f32 %v6590_v19, %v543_v50  ;;  %v6751_v42 = vpop.xlane.xlu0 %414 }
 0x21c   :  { %1006 = vperm.xlu1 %6265, %v679_v43   ;;  %1015 = vperm.xlu0 %6266, %v682_v34   ;;  %v705_v43 = vmul.f32 %v6588_v18, %v543_v50 }
 0x220   :  { %1012 = vperm.xlu1 %6265, %v681_v56   ;;  %1021 = vperm.xlu0 %6266, %v684_v61   ;;  %v708_v56 = vmul.f32 %v6564_v2, %v547_v40 }
 0x224   :  { %1018 = vperm.xlu1 %6265, %v683_v45   ;;  %1027 = vperm.xlu0 %6266, %v686_v31   ;;  %v707_v45 = vmul.f32 %v6592_v20, %v543_v50  ;;  %v711_v50 = vmul.f32 %v6568_v6, %v547_v40 }
 0x228   :  { %1024 = vperm.xlu1 %6265, %v685_v47   ;;  %1033 = vperm.xlu0 %6266, %v688_v39   ;;  %v709_v39 = vmul.f32 %v6562_v1, %v547_v40 }
 0x22c   :  { %1030 = vperm.xlu1 %6265, %v687_v35   ;;  %1039 = vperm.xlu0 %6266, %v690_v51   ;;  %v712_v51 = vmul.f32 %v6570_v7, %v547_v40 }
 0x230   :  { %1036 = vperm.xlu1 %6265, %v689_v52   ;;  %1045 = vperm.xlu0 %6266, %v692_v26  }
 0x234   :  { %1042 = vperm.xlu1 %6265, %v691_v54   ;;  %1051 = vperm.xlu0 %6266, %v694_v38   ;;  %v714_v54 = vmul.f32 %v6574_v9, %v547_v40 }
 0x238   :  { %1048 = vperm.xlu1 %6265, %v693_v55   ;;  %1057 = vperm.xlu0 %6266, %v696_v57   ;;  %v713_v55 = vmul.f32 %v6572_v8, %v547_v40 }
 0x23c   :  { %1054 = vperm.xlu1 %6265, %v695_v60   ;;  %1063 = vperm.xlu0 %6266, %v698_v33   ;;  %v716_v60 = vmul.f32 %v6578_v13, %v547_v40 }
 0x240   :  { %1060 = vperm.xlu1 %6265, %v697_v62   ;;  %1069 = vperm.xlu0 %6266, %v700_v58   ;;  %v715_v62 = vmul.f32 %v6576_v12, %v547_v40 }
 0x244   :  { %1066 = vperm.xlu1 %6265, %v699_v44   ;;  %1075 = vperm.xlu0 %6266, %v702_v28   ;;  %v718_v44 = vmul.f32 %v6582_v15, %v547_v40 }
 0x248   :  { %1072 = vperm.xlu1 %6265, %v701_v36   ;;  %1081 = vperm.xlu0 %6266, %v704_v27   ;;  %v6791_v36 = vadd.f32 %v6560_v63, %v409_v32  ;;  %v721_v32 = vmul.f32 %v6588_v18, %v547_v40 }
 0x24a   :  { %9865 = vst [vmem:[#allocation29_spill] sm:$0xff] %v6791_v36 }
 0x24c   :  { %1078 = vperm.xlu1 %6265, %v703_v29   ;;  %1087 = vperm.xlu0 %6266, %v706_v41   ;;  %v720_v29 = vmul.f32 %v6586_v17, %v547_v40 }
 0x24f   :  { %v6754_v34 = vpop.permute.xlu1 %901  ;;  %v6757_v61 = vpop.permute.xlu0 %904 }
 0x250   :  { %1084 = vperm.xlu1 %6265, %v705_v43   ;;  %1093 = vperm.xlu0 %6266, %v708_v56   ;;  %v719_v43 = vmul.f32 %v6584_v16, %v547_v40  ;;  %v551_v56 = vrot.slane %v6791_v36, %v6486_v5 }
 0x252   :  { %v732_v36 = vmul.f32 %v6578_v13, %v551_v56  ;;  %v734_v22 = vmul.f32 %v6582_v15, %v551_v56 }
 0x253   :  { %v6760_v31 = vpop.permute.xlu1 %907  ;;  %v6763_v47 = vpop.permute.xlu0 %913 }
 0x254   :  { %1090 = vperm.xlu1 %6265, %v707_v45   ;;  %1099 = vperm.xlu0 %6266, %v710_v46   ;;  %v722_v46 = vmul.f32 %v6590_v19, %v547_v40 }
 0x257   :  { %v6766_v35 = vpop.permute.xlu1 %910  ;;  %v6769_v52 = vpop.permute.xlu0 %919 }
 0x258   :  { %1096 = vperm.xlu1 %6265, %v709_v39   ;;  %1105 = vperm.xlu0 %6266, %v712_v51  }
 0x25b   :  { %v6772_v26 = vpop.permute.xlu1 %916  ;;  %v6775_v38 = vpop.permute.xlu0 %925 }
 0x25c   :  { %1102 = vperm.xlu1 %6265, %v711_v50   ;;  %1111 = vperm.xlu0 %6266, %v714_v54   ;;  %v724_v50 = vmul.f32 %v6564_v2, %v551_v56 }
 0x25f   :  { %v6778_v57 = vpop.permute.xlu1 %922  ;;  %v6781_v33 = vpop.permute.xlu0 %931 }
 0x260   :  { %9863 = vst [vmem:[#allocation27_spill] sm:$0xff] %v6781_v33  ;;  %1108 = vperm.xlu1 %6265, %v713_v55   ;;  %1117 = vperm.xlu0 %6266, %v716_v60   ;;  %v723_v55 = vmul.f32 %v6592_v20, %v547_v40  ;;  %v727_v40 = vmul.f32 %v6568_v6, %v551_v56 }
 0x263   :  { %v6784_v58 = vpop.permute.xlu1 %928  ;;  %v6787_v28 = vpop.permute.xlu0 %937 }
 0x264   :  { %9864 = vst [vmem:[#allocation28_spill] sm:$0xff] %v6787_v28  ;;  %1114 = vperm.xlu1 %6265, %v715_v62   ;;  %1123 = vperm.xlu0 %6266, %v718_v44   ;;  %v726_v62 = vmul.f32 %v6566_v4, %v551_v56 }
 0x267   :  { %v6793_v27 = vpop.permute.xlu1 %934  ;;  %v6796_v41 = vpop.permute.xlu0 %943 }
 0x268   :  { %9866 = vst [vmem:[#allocation30_spill] sm:$0xff] %v6793_v27  ;;  %9867 = vst [vmem:[#allocation31_spill] sm:$0xff] %v6796_v41  ;;  %1120 = vperm.xlu1 %6265, %v717_v30   ;;  %1129 = vperm.xlu0 %6266, %v720_v29   ;;  %v725_v30 = vmul.f32 %v6562_v1, %v551_v56  ;;  %v735_v41 = vmul.f32 %v6584_v16, %v551_v56 }
 0x26b   :  { %v6801_v45 = vpop.permute.xlu1 %940  ;;  %v6804_v39 = vpop.permute.xlu0 %949 }
 0x26c   :  { %9868 = vst [vmem:[#allocation32_spill] sm:$0xff] %v6801_v45  ;;  %1126 = vperm.xlu1 %6265, %v719_v43   ;;  %1135 = vperm.xlu0 %6266, %v722_v46   ;;  %v728_v43 = vmul.f32 %v6570_v7, %v551_v56 }
 0x26f   :  { %v6807_v51 = vpop.permute.xlu1 %946  ;;  %v6810_v54 = vpop.permute.xlu0 %955 }
 0x270   :  { %9869 = vst [vmem:[#allocation33_spill] sm:$0xff] %v6807_v51  ;;  %1132 = vperm.xlu1 %6265, %v721_v32   ;;  %1141 = vperm.xlu0 %6266, %v724_v50   ;;  %v730_v50 = vmul.f32 %v6574_v9, %v551_v56  ;;  %v738_v51 = vmul.f32 %v6590_v19, %v551_v56 }
 0x273   :  { %v6813_v60 = vpop.permute.xlu1 %952  ;;  %v6816_v44 = vpop.permute.xlu0 %961 }
 0x274   :  { %1138 = vperm.xlu1 %6265, %v723_v55   ;;  %1147 = vperm.xlu0 %6266, %v726_v62   ;;  %v729_v55 = vmul.f32 %v6572_v8, %v551_v56 }
 0x277   :  { %v6819_v29 = vpop.permute.xlu1 %958  ;;  %v6822_v46 = vpop.permute.xlu0 %967 }
 0x278   :  { %1144 = vperm.xlu1 %6265, %v725_v30   ;;  %1153 = vperm.xlu0 %6266, %v728_v43   ;;  %v731_v30 = vmul.f32 %v6576_v12, %v551_v56 }
 0x27b   :  { %v6825_v32 = vpop.permute.xlu1 %964  ;;  %v6828_v0 = vpop.permute.xlu0 %973 }
 0x27c   :  { %9870 = vst [vmem:[#allocation34_spill] sm:$0xff] %v6828_v0  ;;  %1150 = vperm.xlu1 %6265, %v727_v40   ;;  %1159 = vperm.xlu0 %6266, %v730_v50   ;;  %v733_v40 = vmul.f32 %v6580_v14, %v551_v56  ;;  %v6845_v50 = vadd.f32 %v6560_v63, %v6748_v48 }
 0x27d   :  { %v737_v48 = vmul.f32 %v6588_v18, %v551_v56 }
 0x27e   :  { %9874 = vst [vmem:[#allocation38_spill] sm:$0xff] %v6845_v50 }
 0x27f   :  { %v6831_v62 = vpop.permute.xlu1 %970  ;;  %v6834_v37 = vpop.permute.xlu0 %979 }
 0x280   :  { %9871 = vst [vmem:[#allocation35_spill] sm:$0xff] %v6834_v37  ;;  %1156 = vperm.xlu1 %6265, %v729_v55   ;;  %1165 = vperm.xlu0 %6266, %v732_v36   ;;  %v736_v36 = vmul.f32 %v6586_v17, %v551_v56 }
 0x283   :  { %v6837_v43 = vpop.permute.xlu1 %976  ;;  %v6840_v53 = vpop.permute.xlu0 %985 }
 0x284   :  { %9872 = vst [vmem:[#allocation36_spill] sm:$0xff] %v6837_v43  ;;  %9873 = vst [vmem:[#allocation37_spill] sm:$0xff] %v6840_v53  ;;  %1162 = vperm.xlu1 %6265, %v731_v30   ;;  %1171 = vperm.xlu0 %6266, %v734_v22   ;;  %v555_v30 = vrot.slane %v6845_v50, %v6486_v5  ;;  %v739_v50 = vmul.f32 %v6592_v20, %v551_v56 }
 0x286   :  { %v743_v56 = vmul.f32 %v6568_v6, %v555_v30  ;;  %v748_v33 = vmul.f32 %v6578_v13, %v555_v30  ;;  %v750_v0 = vmul.f32 %v6582_v15, %v555_v30 }
 0x287   :  { %v6847_v59 = vpop.permute.xlu1 %982  ;;  %v6850_v55 = vpop.permute.xlu0 %991 }
 0x288   :  { %9875 = vst [vmem:[#allocation39_spill] sm:$0xff] %v6847_v59  ;;  %9876 = vst [vmem:[#allocation40_spill] sm:$0xff] %v6850_v55  ;;  %1168 = vperm.xlu1 %6265, %v733_v40   ;;  %1177 = vperm.xlu0 %6266, %v736_v36   ;;  %v740_v40 = vmul.f32 %v6564_v2, %v555_v30 }
 0x28b   :  { %v6855_v22 = vpop.permute.xlu1 %988  ;;  %v6858_v53 = vpop.permute.xlu0 %997 }
 0x28c   :  { %9877 = vst [vmem:[#allocation41_spill] sm:$0xff] %v6855_v22  ;;  %1174 = vperm.xlu1 %6265, %v735_v41   ;;  %1183 = vperm.xlu0 %6266, %v738_v51   ;;  %v742_v22 = vmul.f32 %v6566_v4, %v555_v30  ;;  %v741_v41 = vmul.f32 %v6562_v1, %v555_v30 }
 0x28f   :  { %v6861_v45 = vpop.permute.xlu1 %994  ;;  %v6864_v36 = vpop.permute.xlu0 %1003 }
 0x290   :  { %9878 = vst [vmem:[#allocation42_spill] sm:$0xff] %v6861_v45  ;;  %1180 = vperm.xlu1 %6265, %v737_v48   ;;  %1189 = vperm.xlu0 %6266, %v740_v40   ;;  %v744_v45 = vmul.f32 %v6570_v7, %v555_v30  ;;  %v746_v40 = vmul.f32 %v6574_v9, %v555_v30 }
 0x293   :  { %v6867_v55 = vpop.permute.xlu1 %1000  ;;  %v6870_v28 = vpop.permute.xlu0 %1009 }
 0x294   :  { %1186 = vperm.xlu1 %6265, %v739_v50   ;;  %1195 = vperm.xlu0 %6266, %v742_v22   ;;  %v745_v50 = vmul.f32 %v6572_v8, %v555_v30 }
 0x297   :  { %v6873_v51 = vpop.permute.xlu1 %1006  ;;  %v6876_v37 = vpop.permute.xlu0 %1015 }
 0x298   :  { %1192 = vperm.xlu1 %6265, %v741_v41   ;;  %1201 = vperm.xlu0 %6266, %v744_v45   ;;  %v747_v45 = vmul.f32 %v6576_v12, %v555_v30 }
 0x29b   :  { %v6879_v48 = vpop.permute.xlu1 %1012  ;;  %v6882_v59 = vpop.permute.xlu0 %1021 }
 0x29c   :  { %9879 = vst [vmem:[#allocation43_spill] sm:$0xff] %v6882_v59  ;;  %1198 = vperm.xlu1 %6265, %v743_v56   ;;  %1207 = vperm.xlu0 %6266, %v746_v40   ;;  %v749_v56 = vmul.f32 %v6580_v14, %v555_v30  ;;  %v6899_v40 = vadd.f32 %v6560_v63, %v6751_v42 }
 0x29d   :  { %v753_v63 = vmul.f32 %v6588_v18, %v555_v30 }
 0x29e   :  { %9883 = vst [vmem:[#allocation47_spill] sm:$0xff] %v6899_v40 }
 0x29f   :  { %v6885_v22 = vpop.permute.xlu1 %1018  ;;  %v6888_v27 = vpop.permute.xlu0 %1027 }
 0x2a0   :  { %9880 = vst [vmem:[#allocation44_spill] sm:$0xff] %v6888_v27  ;;  %1204 = vperm.xlu1 %6265, %v745_v50   ;;  %1213 = vperm.xlu0 %6266, %v748_v33   ;;  %v752_v33 = vmul.f32 %v6586_v17, %v555_v30  ;;  %v751_v27 = vmul.f32 %v6584_v16, %v555_v30 }
 0x2a3   :  { %v6891_v41 = vpop.permute.xlu1 %1024  ;;  %v6894_v43 = vpop.permute.xlu0 %1033 }
 0x2a4   :  { %9881 = vst [vmem:[#allocation45_spill] sm:$0xff] %v6891_v41  ;;  %9882 = vst [vmem:[#allocation46_spill] sm:$0xff] %v6894_v43  ;;  %1210 = vperm.xlu1 %6265, %v747_v45   ;;  %1219 = vperm.xlu0 %6266, %v750_v0   ;;  %v559_v45 = vrot.slane %v6899_v40, %v6486_v5  ;;  %v754_v43 = vmul.f32 %v6590_v19, %v555_v30 }
 0x2a5   :  { %v755_v5 = vmul.f32 %v6592_v20, %v555_v30 }
 0x2a6   :  { %v759_v30 = vmul.f32 %v6568_v6, %v559_v45  ;;  %v763_v6 = vmul.f32 %v6576_v12, %v559_v45  ;;  %v767_v12 = vmul.f32 %v6584_v16, %v559_v45 }
 0x2a7   :  { %v6901_v59 = vpop.permute.xlu1 %1030  ;;  %v6904_v50 = vpop.permute.xlu0 %1039 }
 0x2a8   :  { %9884 = vst [vmem:[#allocation48_spill] sm:$0xff] %v6904_v50  ;;  %1216 = vperm.xlu1 %6265, %v749_v56   ;;  %1225 = vperm.xlu0 %6266, %v752_v33   ;;  %v756_v56 = vmul.f32 %v6564_v2, %v559_v45  ;;  %v758_v50 = vmul.f32 %v6566_v4, %v559_v45 }
 0x2a9   :  { %v760_v2 = vmul.f32 %v6570_v7, %v559_v45  ;;  %v762_v4 = vmul.f32 %v6574_v9, %v559_v45  ;;  %v764_v7 = vmul.f32 %v6578_v13, %v559_v45  ;;  %v766_v9 = vmul.f32 %v6582_v15, %v559_v45 }
 0x2aa   :  { %v768_v13 = vmul.f32 %v6586_v17, %v559_v45  ;;  %v770_v15 = vmul.f32 %v6590_v19, %v559_v45  ;;  %v771_v17 = vmul.f32 %v6592_v20, %v559_v45 }
 0x2ab   :  { %v6909_v0 = vpop.permute.xlu1 %1036  ;;  %v6912_v41 = vpop.permute.xlu0 %1045 }
 0x2ac   :  { %9885 = vst [vmem:[#allocation49_spill] sm:$0xff] %v6909_v0  ;;  %1222 = vperm.xlu1 %6265, %v751_v27   ;;  %1231 = vperm.xlu0 %6266, %v754_v43   ;;  %v757_v27 = vmul.f32 %v6562_v1, %v559_v45  ;;  %v761_v1 = vmul.f32 %v6572_v8, %v559_v45 }
 0x2ad   :  { %v765_v8 = vmul.f32 %v6580_v14, %v559_v45  ;;  %v769_v14 = vmul.f32 %v6588_v18, %v559_v45 }
 0x2af   :  { %v6915_v42 = vpop.permute.xlu1 %1042  ;;  %v6918_v33 = vpop.permute.xlu0 %1051 }
 0x2b0   :  { %9886 = vst [vmem:[#allocation50_spill] sm:$0xff] %v6915_v42  ;;  %1228 = vperm.xlu1 %6265, %v753_v63   ;;  %1237 = vperm.xlu0 %6266, %v756_v56  }
 0x2b3   :  { %v6921_v40 = vpop.permute.xlu1 %1048  ;;  %v6924_v0 = vpop.permute.xlu0 %1057 }
 0x2b4   :  { %1234 = vperm.xlu1 %6265, %v755_v5   ;;  %1243 = vperm.xlu0 %6266, %v758_v50  }
 0x2b7   :  { %v6927_v43 = vpop.permute.xlu1 %1054  ;;  %v6930_v42 = vpop.permute.xlu0 %1063 }
 0x2b8   :  { %1240 = vperm.xlu1 %6265, %v757_v27   ;;  %1249 = vperm.xlu0 %6266, %v760_v2  }
 0x2bb   :  { %v6933_v63 = vpop.permute.xlu1 %1060  ;;  %v6936_v56 = vpop.permute.xlu0 %1069 }
 0x2bc   :  { %1246 = vperm.xlu1 %6265, %v759_v30   ;;  %1255 = vperm.xlu0 %6266, %v762_v4  }
 0x2be   :  { %v6974_v19 = vpop.f32.mrf.mxu1 }
 0x2bf   :  { %v6939_v50 = vpop.permute.xlu1 %1066  ;;  %v6942_v5 = vpop.permute.xlu0 %1075  ;;  %9895 = vst [vmem:[#allocation59_spill] sm:$0xff] %v6974_v19 }
 0x2c0   :  { %1252 = vperm.xlu1 %6265, %v761_v1   ;;  %1261 = vperm.xlu0 %6266, %v764_v7   ;;  %v6245_v18 = vpop.f32.mrf.mxu1 }
 0x2c3   :  { %v6945_v27 = vpop.permute.xlu1 %1072  ;;  %v6948_v2 = vpop.permute.xlu0 %1081 }
 0x2c4   :  { %9887 = vst [vmem:[#allocation51_spill] sm:$0xff] %v6948_v2  ;;  %1258 = vperm.xlu1 %6265, %v763_v6   ;;  %1267 = vperm.xlu0 %6266, %v766_v9  }
 0x2c7   :  { %v6951_v30 = vpop.permute.xlu1 %1078  ;;  %v6954_v4 = vpop.permute.xlu0 %1087 }
 0x2c8   :  { %9888 = vst [vmem:[#allocation52_spill] sm:$0xff] %v6954_v4  ;;  %1264 = vperm.xlu1 %6265, %v765_v8   ;;  %1273 = vperm.xlu0 %6266, %v768_v13  }
 0x2cb   :  { %v6957_v1 = vpop.permute.xlu1 %1084  ;;  %v6960_v7 = vpop.permute.xlu0 %1093 }
 0x2cc   :  { %9889 = vst [vmem:[#allocation53_spill] sm:$0xff] %v6957_v1  ;;  %9890 = vst [vmem:[#allocation54_spill] sm:$0xff] %v6960_v7  ;;  %1270 = vperm.xlu1 %6265, %v767_v12   ;;  %1279 = vperm.xlu0 %6266, %v770_v15  }
 0x2cf   :  { %v6963_v6 = vpop.permute.xlu1 %1090  ;;  %v6965_v9 = vpop.permute.xlu0 %1099 }
 0x2d0   :  { %9891 = vst [vmem:[#allocation55_spill] sm:$0xff] %v6963_v6  ;;  %9892 = vst [vmem:[#allocation56_spill] sm:$0xff] %v6965_v9  ;;  %1276 = vperm.xlu1 %6265, %v769_v14   ;;  %2018 = vbcast.lane.b32.xlu0 %v6496_v11, 288 }
 0x2d3   :  { %v6969_v16 = vpop.permute.xlu1 %1096  ;;  %v6971_v8 = vpop.permute.xlu0 %1105 }
 0x2d4   :  { %9893 = vst [vmem:[#allocation57_spill] sm:$0xff] %v6969_v16  ;;  %9894 = vst [vmem:[#allocation58_spill] sm:$0xff] %v6971_v8  ;;  %1282 = vperm.xlu1 %6265, %v771_v17   ;;  %2026 = vbcast.lane.b32.xlu0 %v6496_v11, 304  ;;  %v6996_v17 = vrot.slane %v6627_v49, %v6493_v10 }
 0x2d6   :  { %9902 = vst [vmem:[#allocation66_spill] sm:$0xff] %v6996_v17  ;;  %v2082_v10 = vmul.f32 %v6600_v25, %v6996_v17 }
 0x2d7   :  { %v6976_v13 = vpop.permute.xlu1 %1102  ;;  %v6978_v12 = vpop.permute.xlu0 %1111 }
 0x2d8   :  { %9896 = vst [vmem:[#allocation60_spill] sm:$0xff] %v6976_v13  ;;  %9897 = vst [vmem:[#allocation61_spill] sm:$0xff] %v6978_v12  ;;  %2022 = vbcast.lane.b32.xlu1 %v6496_v11, 296  ;;  %2034 = vbcast.lane.b32.xlu0 %v6496_v11, 320 }
 0x2db   :  { %v6982_v15 = vpop.permute.xlu1 %1108  ;;  %v6984_v20 = vpop.permute.xlu0 %1117 }
 0x2dc   :  { %9898 = vst [vmem:[#allocation62_spill] sm:$0xff] %v6982_v15  ;;  %9899 = vst [vmem:[#allocation63_spill] sm:$0xff] %v6984_v20  ;;  %2030 = vbcast.lane.b32.xlu1 %v6496_v11, 312  ;;  %2042 = vbcast.lane.b32.xlu0 %v6496_v11, 336 }
 0x2df   :  { %v6988_v45 = vpop.permute.xlu1 %1114  ;;  %v6990_v14 = vpop.permute.xlu0 %1123 }
 0x2e0   :  { %9900 = vst [vmem:[#allocation64_spill] sm:$0xff] %v6988_v45  ;;  %9901 = vst [vmem:[#allocation65_spill] sm:$0xff] %v6990_v14  ;;  %2038 = vbcast.lane.b32.xlu1 %v6496_v11, 328  ;;  %2050 = vbcast.lane.b32.xlu0 %v6496_v11, 352  ;;  %v2080_v14 = vmul.f32 %v6596_v23, %v6996_v17 }
 0x2e3   :  { %v6998_v18 = vpop.permute.xlu1 %1120  ;;  %v7000_v19 = vpop.permute.xlu0 %1129 }
 0x2e4   :  { %9903 = vst [vmem:[#allocation67_spill] sm:$0xff] %v6998_v18  ;;  %9904 = vst [vmem:[#allocation68_spill] sm:$0xff] %v7000_v19  ;;  %2046 = vbcast.lane.b32.xlu1 %v6496_v11, 344  ;;  %2058 = vbcast.lane.b32.xlu0 %v6496_v11, 368 }
 0x2e7   :  { %v7004_v20 = vpop.permute.xlu1 %1126  ;;  %v7008_v45 = vpop.permute.xlu0 %1135 }
 0x2e8   :  { %9905 = vst [vmem:[#allocation69_spill] sm:$0xff] %v7004_v20  ;;  %9906 = vst [vmem:[#allocation70_spill] sm:$0xff] %v7008_v45  ;;  %2054 = vbcast.lane.b32.xlu1 %v6496_v11, 360  ;;  %2337 = vperm.xlu0 %6266, %v2080_v14   ;;  %v2081_v20 = vmul.f32 %v6594_v21, %v6996_v17  ;;  %v2083_v14 = vmul.f32 %v6598_v24, %v6996_v17 }
 0x2eb   :  { %v7011_v49 = vpop.permute.xlu1 %1132  ;;  %v7015_v19 = vpop.permute.xlu0 %1141 }
 0x2ec   :  { %9907 = vst [vmem:[#allocation71_spill] sm:$0xff] %v7011_v49  ;;  %9908 = vst [vmem:[#allocation72_spill] sm:$0xff] %v7015_v19  ;;  %2062 = vbcast.lane.b32.xlu1 %v6496_v11, 376  ;;  %2343 = vperm.xlu0 %6266, %v2082_v10  }
 0x2ef   :  { %v7020_v18 = vpop.permute.xlu1 %1138  ;;  %v7022_v23 = vpop.permute.xlu0 %1147 }
 0x2f0   :  { %9909 = vst [vmem:[#allocation73_spill] sm:$0xff] %v7020_v18  ;;  %9910 = vst [vmem:[#allocation74_spill] sm:$0xff] %v7022_v23  ;;  %2340 = vperm.xlu1 %6265, %v2081_v20   ;;  %v9919_v20 = vlaneseq }
 0x2f2   :  { %v7043_v15 = vand.u32 127, %v9919_v20 }
 0x2f3   :  { %v7026_v45 = vpop.permute.xlu1 %1144  ;;  %v7028_v49 = vpop.permute.xlu0 %1153 }
 0x2f4   :  { %9911 = vst [vmem:[#allocation75_spill] sm:$0xff] %v7026_v45  ;;  %9912 = vst [vmem:[#allocation76_spill] sm:$0xff] %v7028_v49  ;;  %2346 = vperm.xlu1 %6265, %v2083_v14   ;;  %v1290_v14 = vadd.s32 4294967288, %v7043_v15  ;;  %v1297_v49 = vadd.s32 4294967280, %v7043_v15  ;;  %v1339_v8 = vadd.s32 4294967232, %v7043_v15  ;;  %v1346_v13 = vadd.s32 4294967224, %v7043_v15 }
 0x2f5   :  { %v1367_v19 = vadd.s32 4294967200, %v7043_v15  ;;  %v1381_v4 = vadd.s32 4294967184, %v7043_v15 }
 0x2f6   :  { %v7068_v23 = vsub.s32 %v1297_v49, %v6480_v3 }
 0x2f7   :  { %v7030_v25 = vpop.permute.xlu1 %1150  ;;  %v7032_v11 = vpop.permute.xlu0 %1159 }
 0x2f8   :  { %9913 = vst [vmem:[#allocation77_spill] sm:$0xff] %v7030_v25  ;;  %9914 = vst [vmem:[#allocation78_spill] sm:$0xff] %v7032_v11  ;;  %v1311_v11 = vadd.s32 4294967264, %v7043_v15  ;;  %v1407_v1 = vrot.slane %v6810_v54, %v7068_v23 }
 0x2fa   :  { %v7072_v6 = vsub.s32 %v1311_v11, %v6480_v3 }
 0x2fb   :  { %v7034_v10 = vpop.permute.xlu1 %1156  ;;  %v7036_v21 = vpop.permute.xlu0 %1165 }
 0x2fc   :  { %9915 = vst [vmem:[#allocation79_spill] sm:$0xff] %v7034_v10  ;;  %9916 = vst [vmem:[#allocation80_spill] sm:$0xff] %v7036_v21  ;;  %v1304_v10 = vadd.s32 4294967272, %v7043_v15  ;;  %v1325_v21 = vadd.s32 4294967248, %v7043_v15  ;;  %v1315_v54 = vrot.slane %v6763_v47, %v7072_v6 }
 0x2fe   :  { %v7078_v25 = vsub.s32 %v1325_v21, %v6480_v3  ;;  %v1360_v21 = vadd.s32 4294967208, %v7043_v15 }
 0x2ff   :  { %v7038_v18 = vpop.permute.xlu1 %1162  ;;  %v7040_v12 = vpop.permute.xlu0 %1171 }
 0x300   :  { %9917 = vst [vmem:[#allocation81_spill] sm:$0xff] %v7038_v18  ;;  %9918 = vst [vmem:[#allocation82_spill] sm:$0xff] %v7040_v12  ;;  %v1318_v12 = vadd.s32 4294967256, %v7043_v15 }
 0x302   :  { %v7084_v49 = vsub.s32 %v1318_v12, %v6480_v3 }
 0x303   :  { %v7045_v24 = vpop.permute.xlu1 %1168  ;;  %v7047_v17 = vpop.permute.xlu0 %1177 }
 0x304   :  { %9920 = vst [vmem:[#allocation83_spill] sm:$0xff] %v7045_v24  ;;  %9921 = vst [vmem:[#allocation84_spill] sm:$0xff] %v7047_v17  ;;  %v7061_v24 = vsub.s32 %v7043_v15, %v6480_v3  ;;  %v7064_v17 = vsub.s32 %v1290_v14, %v6480_v3  ;;  %v1353_v14 = vadd.s32 4294967216, %v7043_v15 }
 0x306   :  { %v1289_v12 = vrot.slane %v6754_v34, %v7061_v24  ;;  %v1294_v7 = vrot.slane %v6757_v61, %v7064_v17  ;;  %v7109_v16 = vsub.s32 %v1353_v14, %v6480_v3  ;;  %v1398_v34 = vrot.slane %v6804_v39, %v7061_v24 }
 0x307   :  { %v7054_v18 = vpop.permute.xlu1 %1174  ;;  %v7057_v20 = vpop.permute.xlu0 %1183  ;;  %v7129_v39 = vsub.s32 %v1360_v21, %v6480_v3  ;;  %v1556_v47 = vrot.slane %v6912_v41, %v7061_v24 }
 0x308   :  { %9922 = vst [vmem:[#allocation85_spill] sm:$0xff] %v7054_v18  ;;  %9923 = vst [vmem:[#allocation86_spill] sm:$0xff] %v7057_v20  ;;  %v1332_v18 = vadd.s32 4294967240, %v7043_v15  ;;  %v7075_v20 = vsub.s32 %v1304_v10, %v6480_v3  ;;  %v7091_v10 = vsub.s32 %v1339_v8, %v6480_v3  ;;  %v1481_v8 = vrot.slane %v6867_v55, %v7064_v17 }
 0x309   :  { %v7122_v55 = vsub.s32 %v1367_v19, %v6480_v3  ;;  %9929 = vst [vmem:[#allocation92_spill] sm:$0xff] %v7129_v39  ;;  %v1296_v19 = vsel %vm1295_vm3, %v1294_v7, %v1289_v12 }
 0x30a   :  { %v7102_v45 = vsub.s32 %v1332_v18, %v6480_v3  ;;  %v1308_v61 = vrot.slane %v6766_v35, %v7075_v20  ;;  %v7119_v18 = vsub.s32 %v1346_v13, %v6480_v3  ;;  %v1412_v13 = vrot.slane %v6819_v29, %v7075_v20 }
 0x30b   :  { %v7081_v9 = vpop.permute.xlu1 %1180  ;;  %v7088_v11 = vpop.permute.xlu0 %1189  ;;  %9927 = vst [vmem:[#allocation90_spill] sm:$0xff] %v7122_v55  ;;  %v1560_v29 = vrot.slane %v6921_v40, %v7064_v17  ;;  %v1422_v40 = vrot.slane %v6825_v32, %v7084_v49  ;;  %v1496_v32 = vrot.slane %v6870_v28, %v7072_v6  ;;  %v1570_v41 = vrot.slane %v6927_v43, %v7075_v20 }
 0x30c   :  { %9924 = vst [vmem:[#allocation87_spill] sm:$0xff] %v7081_v9  ;;  %9925 = vst [vmem:[#allocation88_spill] sm:$0xff] %v7088_v11  ;;  %v1402_v9 = vrot.slane %v6813_v60, %v7064_v17  ;;  %v1301_v11 = vrot.slane %v6760_v31, %v7068_v23  ;;  %v1374_v60 = vadd.s32 4294967192, %v7043_v15  ;;  %v1477_v31 = vrot.slane %v6858_v53, %v7061_v24 }
 0x30d   :  { %v1329_v28 = vrot.slane %v6769_v52, %v7078_v25 }
 0x30e   :  { %v1403_v35 = vsel %vm1295_vm3, %v1402_v9, %v1398_v34  ;;  %v1482_v53 = vsel %vm1295_vm3, %v1481_v8, %v1477_v31  ;;  %v1303_v21 = vsel %vm1302_vm4, %v1301_v11, %v1296_v19  ;;  %v1486_v9 = vrot.slane %v6864_v36, %v7068_v23 }
 0x30f   :  { %v7114_v2 = vpop.permute.xlu1 %1186  ;;  %v7126_v14 = vpop.permute.xlu0 %1195  ;;  %v1310_v12 = vsel %vm1309_vm5, %v1308_v61, %v1303_v21  ;;  %v1408_v11 = vsel %vm1302_vm4, %v1407_v1, %v1403_v35  ;;  %v7168_v34 = vadd.s32 4294967176, %v7043_v15  ;;  %v1501_v61 = vrot.slane %v6879_v48, %v7084_v49 }
 0x310   :  { %9926 = vst [vmem:[#allocation89_spill] sm:$0xff] %v7114_v2  ;;  %9928 = vst [vmem:[#allocation91_spill] sm:$0xff] %v7126_v14  ;;  %v7132_v2 = vsub.s32 %v1381_v4, %v6480_v3  ;;  %v1491_v14 = vrot.slane %v6873_v51, %v7075_v20  ;;  %v7145_v4 = vsub.s32 %v1374_v60, %v6480_v3 }
 0x311   :  { %v1322_v51 = vrot.slane %v6772_v26, %v7084_v49  ;;  %v1413_v36 = vsel %vm1309_vm5, %v1412_v13, %v1408_v11  ;;  %v1487_v60 = vsel %vm1302_vm4, %v1486_v9, %v1482_v53  ;;  %v1417_v26 = vrot.slane %v6816_v44, %v7072_v6 }
 0x312   :  { %9930 = vst [vmem:[#allocation93_spill] sm:$0xff] %v7132_v2  ;;  %9931 = vst [vmem:[#allocation94_spill] sm:$0xff] %v7145_v4  ;;  %v1492_v1 = vsel %vm1309_vm5, %v1491_v14, %v1487_v60  ;;  %v1317_v31 = vsel %vm1316_vm6, %v1315_v54, %v1310_v12  ;;  %v1561_v35 = vsel %vm1295_vm3, %v1560_v29, %v1556_v47  ;;  %v9932_v60 = vld [vmem:[#allocation36_spill] sm:$0xff] }
 0x313   :  { %v7151_v7 = vpop.permute.xlu1 %1192  ;;  %v7159_v8 = vpop.permute.xlu0 %1201  ;;  %v1324_v13 = vsel %vm9846_vm7, %v1322_v51, %v1317_v31  ;;  %v1336_v44 = vrot.slane %v6778_v57, %v7102_v45  ;;  %v1418_v48 = vsel %vm1316_vm6, %v1417_v26, %v1413_v36  ;;  %v1565_v14 = vrot.slane %v6918_v33, %v7068_v23 }
 0x314   :  { %v1423_v43 = vsel %vm9846_vm7, %v1422_v40, %v1418_v48  ;;  %v1432_v53 = vrot.slane %v6831_v62, %v7102_v45  ;;  %v1497_v21 = vsel %vm1316_vm6, %v1496_v32, %v1492_v1  ;;  %v1427_v57 = vrot.slane %v6822_v46, %v7078_v25 }
 0x315   :  { %v1502_v9 = vsel %vm9846_vm7, %v1501_v61, %v1497_v21  ;;  %v1511_v33 = vrot.slane %v6885_v22, %v7102_v45  ;;  %v1566_v29 = vsel %vm1302_vm4, %v1565_v14, %v1561_v35  ;;  %v1331_v52 = vsel %vm9830_vm8, %v1329_v28, %v1324_v13  ;;  %v9935_v35 = vld [vmem:[#allocation43_spill] sm:$0xff]  ;;  %v9936_v28 = vld [vmem:[#allocation30_spill] sm:$0xff] }
 0x316   :  { %v1506_v54 = vrot.slane %v6876_v37, %v7078_v25  ;;  %v1571_v12 = vsel %vm1309_vm5, %v1570_v41, %v1566_v29  ;;  %v1580_v62 = vrot.slane %v6933_v63, %v7084_v49  ;;  %v1338_v46 = vsel %vm9829_vm9, %v1336_v44, %v1331_v52 }
 0x317   :  { %v7181_v15 = vpop.permute.xlu1 %1198  ;;  %v7189_v19 = vpop.permute.xlu0 %1207  ;;  %v1350_v11 = vrot.slane %v6784_v58, %v7119_v18  ;;  %v1428_v22 = vsel %vm9830_vm8, %v1427_v57, %v1423_v43  ;;  %v1575_v36 = vrot.slane %v6924_v0, %v7072_v6  ;;  %v1343_v37 = vrot.slane %v6775_v38, %v7091_v10  ;;  %v9933_v58 = vld [vmem:[#allocation34_spill] sm:$0xff]  ;;  %v9934_v0 = vld [vmem:[#allocation45_spill] sm:$0xff] }
 0x318   :  { %v1433_v63 = vsel %vm9829_vm9, %v1432_v53, %v1428_v22  ;;  %v1442_v47 = vrot.slane %v9932_v60, %v7119_v18  ;;  %v1507_v26 = vsel %vm9830_vm8, %v1506_v54, %v1502_v9  ;;  %v1437_v1 = vrot.slane %v9933_v58, %v7091_v10  ;;  %v9937_v9 = vld [vmem:[#allocation27_spill] sm:$0xff] }
 0x319   :  { %v1512_v61 = vsel %vm9829_vm9, %v1511_v33, %v1507_v26  ;;  %v1521_v31 = vrot.slane %v9934_v0, %v7119_v18  ;;  %v1576_v32 = vsel %vm1316_vm6, %v1575_v36, %v1571_v12  ;;  %v1345_v38 = vsel %vm1344_vm10, %v1343_v37, %v1338_v46  ;;  %v9939_v12 = vld [vmem:[#allocation35_spill] sm:$0xff]  ;;  %v9940_v36 = vld [vmem:[#allocation44_spill] sm:$0xff] }
 0x31a   :  { %v1516_v41 = vrot.slane %v9935_v35, %v7091_v10  ;;  %v1581_v13 = vsel %vm9846_vm7, %v1580_v62, %v1576_v32  ;;  %v1590_v44 = vrot.slane %v6939_v50, %v7102_v45  ;;  %v1352_v14 = vsel %vm1351_vm11, %v1350_v11, %v1345_v38  ;;  %v9938_v50 = vld [vmem:[#allocation39_spill] sm:$0xff]  ;;  %v9941_v26 = vld [vmem:[#allocation28_spill] sm:$0xff] }
 0x31b   :  { %v7209_v51 = vpop.permute.xlu1 %1204  ;;  %v7217_v40 = vpop.permute.xlu0 %1213  ;;  %v1364_v43 = vrot.slane %v9936_v28, %v7129_v39  ;;  %v1438_v53 = vsel %vm1344_vm10, %v1437_v1, %v1433_v63  ;;  %v1585_v21 = vrot.slane %v6930_v42, %v7078_v25  ;;  %v1357_v33 = vrot.slane %v9937_v9, %v7109_v16  ;;  %v9945_v28 = vld [vmem:[#allocation49_spill] sm:$0xff] }
 0x31c   :  { %v1443_v29 = vsel %vm1351_vm11, %v1442_v47, %v1438_v53  ;;  %v1452_v52 = vrot.slane %v9938_v50, %v7129_v39  ;;  %v1517_v54 = vsel %vm1344_vm10, %v1516_v41, %v1512_v61  ;;  %v1447_v62 = vrot.slane %v9939_v12, %v7109_v16 }
 0x31d   :  { %v1522_v46 = vsel %vm1351_vm11, %v1521_v31, %v1517_v54  ;;  %v1531_v42 = vrot.slane %v6901_v59, %v7129_v39  ;;  %v1586_v11 = vsel %vm9830_vm8, %v1585_v21, %v1581_v13  ;;  %v1359_v22 = vsel %vm9826_vm12, %v1357_v33, %v1352_v14  ;;  %v9942_v31 = vld [vmem:[#allocation32_spill] sm:$0xff]  ;;  %v9944_v13 = vld [vmem:[#allocation37_spill] sm:$0xff]  ;;  %v9947_v21 = vld [vmem:[#allocation46_spill] sm:$0xff] }
 0x31e   :  { %v1526_v37 = vrot.slane %v9940_v36, %v7109_v16  ;;  %v1591_v63 = vsel %vm9829_vm9, %v1590_v44, %v1586_v11  ;;  %v1600_v60 = vrot.slane %v6945_v27, %v7119_v18  ;;  %v1371_v58 = vrot.slane %v9941_v26, %v7122_v55  ;;  %v9943_v27 = vld [vmem:[#allocation41_spill] sm:$0xff] }
 0x31f   :  { %v7237_v48 = vpop.permute.xlu1 %1210  ;;  %v7245_v57 = vpop.permute.xlu0 %1219  ;;  %v1366_v59 = vsel %vm1365_vm13, %v1364_v43, %v1359_v22  ;;  %v1448_v1 = vsel %vm9826_vm12, %v1447_v62, %v1443_v29  ;;  %v1595_v61 = vrot.slane %v6936_v56, %v7091_v10  ;;  %v1378_v32 = vrot.slane %v9942_v31, %v7145_v4  ;;  %v9949_v22 = vld [vmem:[#allocation40_spill] sm:$0xff]  ;;  %v9951_v26 = vld [vmem:[#allocation33_spill] sm:$0xff] }
 0x320   :  { %v1453_v38 = vsel %vm1365_vm13, %v1452_v52, %v1448_v1  ;;  %v1462_v35 = vrot.slane %v9943_v27, %v7145_v4  ;;  %v1527_v41 = vsel %vm9826_vm12, %v1526_v37, %v1522_v46  ;;  %v1457_v44 = vrot.slane %v9944_v13, %v7122_v55  ;;  %v9953_v31 = vld [vmem:[#allocation53_spill] sm:$0xff]  ;;  %v9954_v27 = vld [vmem:[#allocation31_spill] sm:$0xff] }
 0x321   :  { %v1532_v14 = vsel %vm1365_vm13, %v1531_v42, %v1527_v41  ;;  %v1541_v56 = vrot.slane %v9945_v28, %v7145_v4  ;;  %v1596_v43 = vsel %vm1344_vm10, %v1595_v61, %v1591_v63  ;;  %v7289_v53 = vsub.s32 %v7168_v34, %v6480_v3  ;;  %v9948_v42 = vld [vmem:[#allocation42_spill] sm:$0xff]  ;;  %v9955_v13 = vld [vmem:[#allocation51_spill] sm:$0xff] }
 0x322   :  { %v1536_v9 = vrot.slane %v9947_v21, %v7122_v55  ;;  %v1601_v33 = vsel %vm1351_vm11, %v1600_v60, %v1596_v43  ;;  %v1610_v29 = vrot.slane %v6951_v30, %v7129_v39  ;;  %v1373_v52 = vsel %vm1372_vm14, %v1371_v58, %v1366_v59  ;;  %v9950_v63 = vld [vmem:[#allocation50_spill] sm:$0xff]  ;;  %v9952_v59 = vld [vmem:[#allocation48_spill] sm:$0xff]  ;;  %v9956_v43 = vld [vmem:[#allocation57_spill] sm:$0xff] }
 0x323   :  { %v7265_v47 = vpop.permute.xlu1 %1216  ;;  %v7273_v0 = vpop.permute.xlu0 %1225  ;;  %9946 = vst [vmem:[#allocation36_spill] sm:$0xff] %v7289_v53  ;;  %v1458_v54 = vsel %vm1372_vm14, %v1457_v44, %v1453_v38  ;;  %v1605_v12 = vrot.slane %v6942_v5, %v7109_v16  ;;  %v1380_v62 = vsel %vm9831_vm15, %v1378_v32, %v1373_v52  ;;  %v1472_v11 = vrot.slane %v9948_v42, %v7289_v53  ;;  %v9957_v52 = vld [vmem:[#allocation75_spill] sm:$0xff]  ;;  %v9958_v42 = vld [vmem:[#allocation54_spill] sm:$0xff] }
 0x324   :  { %v1463_v46 = vsel %vm9831_vm15, %v1462_v35, %v1458_v54  ;;  %v1537_v30 = vsel %vm1372_vm14, %v1536_v9, %v1532_v14  ;;  %v1467_v36 = vrot.slane %v9949_v22, %v7132_v2  ;;  %v1551_v60 = vrot.slane %v9950_v63, %v7289_v53  ;;  %v9960_v63 = vld [vmem:[#allocation72_spill] sm:$0xff] }
 0x325   :  { %v1542_v37 = vsel %vm9831_vm15, %v1541_v56, %v1537_v30  ;;  %v1606_v5 = vsel %vm9826_vm12, %v1605_v12, %v1601_v33  ;;  %v1392_v58 = vrot.slane %v9951_v26, %v7289_v53  ;;  %v1546_v1 = vrot.slane %v9952_v59, %v7132_v2  ;;  %v9961_v59 = vld [vmem:[#allocation60_spill] sm:$0xff] }
 0x326   :  { %v1611_v61 = vsel %vm1365_vm13, %v1610_v29, %v1606_v5  ;;  %v1620_v32 = vrot.slane %v9953_v31, %v7145_v4  ;;  %v1385_v35 = vrot.slane %v9954_v27, %v7132_v2  ;;  %v1468_v41 = vsel %vm1386_vm0, %v1467_v36, %v1463_v46  ;;  %v9959_v36 = vld [vmem:[#allocation52_spill] sm:$0xff] }
 0x327   :  { %v7296_v50 = vpop.permute.xlu1 %1222  ;;  %v7302_v34 = vpop.permute.xlu0 %1231  ;;  %v1615_v44 = vrot.slane %v9955_v13, %v7122_v55  ;;  %v1473_v28 = vsel %vm1393_vm1, %v1472_v11, %v1468_v41  ;;  %vm9827_vm12 = vcmask 1042434   ;;  %v1547_v56 = vsel %vm1386_vm0, %v1546_v1, %v1542_v37  ;;  %v9964_v41 = vld [vmem:[#allocation77_spill] sm:$0xff] }
 0x328   :  { %v1639_v21 = vrot.slane %v9956_v43, %v7064_v17  ;;  %v1387_v9 = vsel %vm1386_vm0, %v1385_v35, %v1380_v62  ;;  %v1552_v33 = vsel %vm1393_vm1, %v1551_v60, %v1547_v56  ;;  %v1718_v54 = vrot.slane %v9957_v52, %v7064_v17  ;;  %v9966_v56 = vld [vmem:[#allocation74_spill] sm:$0xff]  ;;  %v9967_v52 = vld [vmem:[#allocation91_spill] sm:$0xff] }
 0x329   :  { %v1616_v29 = vsel %vm1372_vm14, %v1615_v44, %v1611_v61  ;;  %v1394_v12 = vsel %vm1393_vm1, %v1392_v58, %v1387_v9  ;;  %v1635_v11 = vrot.slane %v9958_v42, %v7061_v24  ;;  %v1797_v30 = vrot.slane %v7151_v7, %v7064_v17  ;;  %v9962_v7 = vld [vmem:[#allocation88_spill] sm:$0xff]  ;;  %v9965_v44 = vld [vmem:[#allocation55_spill] sm:$0xff] }
 0x32a   :  { %v1621_v46 = vsel %vm9831_vm15, %v1620_v32, %v1616_v29  ;;  %v1949_v62 = vsel %vm9828_vm2, %v1473_v28, %v1394_v12  ;;  %v1625_v37 = vrot.slane %v9959_v36, %v7132_v2  ;;  %v1714_v60 = vrot.slane %v9960_v63, %v7061_v24  ;;  %v9963_v32 = vld [vmem:[#allocation56_spill] sm:$0xff] }
 0x32b   :  { %v7322_v38 = vpop.permute.xlu1 %1228  ;;  %v1238_v14 = vpop.permute.xlu0 %1237  ;;  %v7352_v26 = vsel %vm9827_vm12, %v1552_v33, %v1949_v62  ;;  %v1640_v58 = vsel %vm1295_vm3, %v1639_v21, %v1635_v11  ;;  %v1649_v1 = vrot.slane %v9961_v59, %v7075_v20  ;;  %v1793_v61 = vrot.slane %v9962_v7, %v7061_v24  ;;  %v9968_v11 = vld [vmem:[#allocation58_spill] sm:$0xff]  ;;  %v9971_v7 = vld [vmem:[#allocation76_spill] sm:$0xff] }
 0x32c   :  { %v7360_v31 = vsel %vm1386_vm0, %v1625_v37, %v1621_v46  ;;  %v1644_v27 = vrot.slane %v9963_v32, %v7068_v23  ;;  %v1719_v35 = vsel %vm1295_vm3, %v1718_v54, %v1714_v60  ;;  %v1728_v13 = vrot.slane %v9964_v41, %v7075_v20  ;;  %v9970_v60 = vld [vmem:[#allocation79_spill] sm:$0xff]  ;;  %v9972_v41 = vld [vmem:[#allocation61_spill] sm:$0xff] }
 0x32d   :  { %v1630_v28 = vrot.slane %v9965_v44, %v7289_v53  ;;  %v1723_v43 = vrot.slane %v9966_v56, %v7068_v23  ;;  %v1798_v21 = vsel %vm1295_vm3, %v1797_v30, %v1793_v61  ;;  %v1807_v9 = vrot.slane %v7181_v15, %v7075_v20  ;;  %v9969_v30 = vld [vmem:[#allocation62_spill] sm:$0xff] }
 0x32e   :  { %v1645_v29 = vsel %vm1302_vm4, %v1644_v27, %v1640_v58  ;;  %v1802_v54 = vrot.slane %v9967_v52, %v7068_v23  ;;  %v1872_v12 = vrot.slane %v1238_v14, %v7061_v24  ;;  %v1654_v62 = vrot.slane %v9968_v11, %v7072_v6 }
 0x32f   :  { %v7344_v22 = vpop.permute.xlu1 %1234  ;;  %v1244_v5 = vpop.permute.xlu0 %1243  ;;  %v1650_v36 = vsel %vm1309_vm5, %v1649_v1, %v1645_v29  ;;  %v1659_v37 = vrot.slane %v9969_v30, %v7084_v49  ;;  %v1724_v15 = vsel %vm1302_vm4, %v1723_v43, %v1719_v35  ;;  %v1738_v58 = vrot.slane %v9970_v60, %v7084_v49  ;;  %v9976_v60 = vld [vmem:[#allocation63_spill] sm:$0xff] }
 0x330   :  { %v1729_v63 = vsel %vm1309_vm5, %v1728_v13, %v1724_v15  ;;  %v1803_v14 = vsel %vm1302_vm4, %v1802_v54, %v1798_v21  ;;  %v1733_v61 = vrot.slane %v9971_v7, %v7072_v6  ;;  %v1817_v1 = vrot.slane %v7209_v51, %v7084_v49 }
 0x331   :  { %v1808_v32 = vsel %vm1309_vm5, %v1807_v9, %v1803_v14  ;;  %v1881_v27 = vrot.slane %v1244_v5, %v7068_v23  ;;  %v1664_v13 = vrot.slane %v9972_v41, %v7078_v25  ;;  %v1655_v56 = vsel %vm1316_vm6, %v1654_v62, %v1650_v36  ;;  %v9973_v9 = vld [vmem:[#allocation64_spill] sm:$0xff]  ;;  %v9975_v62 = vld [vmem:[#allocation78_spill] sm:$0xff]  ;;  %v9978_v41 = vld [vmem:[#allocation83_spill] sm:$0xff] }
 0x332   :  { %v1812_v43 = vrot.slane %v7159_v8, %v7072_v6  ;;  %v1660_v29 = vsel %vm9846_vm7, %v1659_v37, %v1655_v56  ;;  %v1669_v52 = vrot.slane %v9973_v9, %v7102_v45  ;;  %v1734_v51 = vsel %vm1316_vm6, %v1733_v61, %v1729_v63 }
 0x333   :  { %v1241_v33 = vpop.permute.xlu1 %1240  ;;  %v1250_v42 = vpop.permute.xlu0 %1249  ;;  %v1739_v54 = vsel %vm9846_vm7, %v1738_v58, %v1734_v51  ;;  %v1743_v36 = vrot.slane %v9975_v62, %v7078_v25  ;;  %v1827_v37 = vrot.slane %v7237_v48, %v7102_v45  ;;  %v1674_v58 = vrot.slane %v9976_v60, %v7091_v10 }
 0x334   :  { %v1876_v46 = vrot.slane %v1241_v33, %v7064_v17  ;;  %v1813_v11 = vsel %vm1316_vm6, %v1812_v43, %v1808_v32  ;;  %v1891_v15 = vrot.slane %v1250_v42, %v7072_v6  ;;  %v1665_v14 = vsel %vm9830_vm8, %v1664_v13, %v1660_v29  ;;  %v9979_v43 = vld [vmem:[#allocation80_spill] sm:$0xff] }
 0x335   :  { %v1818_v30 = vsel %vm9846_vm7, %v1817_v1, %v1813_v11  ;;  %v1670_v32 = vsel %vm9829_vm9, %v1669_v52, %v1665_v14  ;;  %v9977_v1 = vld [vmem:[#allocation67_spill] sm:$0xff]  ;;  %v1744_v48 = vsel %vm9830_vm8, %v1743_v36, %v1739_v54  ;;  %v1758_v13 = vrot.slane %v9978_v41, %v7119_v18  ;;  %v9981_v36 = vld [vmem:[#allocation69_spill] sm:$0xff] }
 0x336   :  { %v1877_v59 = vsel %vm1295_vm3, %v1876_v46, %v1872_v12  ;;  %v9974_v12 = vld [vmem:[#allocation81_spill] sm:$0xff]  ;;  %v1837_v9 = vrot.slane %v7265_v47, %v7119_v18  ;;  %vm1952_vm12 = vcmask 1043459   ;;  %vm9985_vm2 = vcmask 720512  }
 0x337   :  { %v1247_v35 = vpop.permute.xlu1 %1246  ;;  %v1256_v33 = vpop.permute.xlu0 %1255  ;;  %v1882_v5 = vsel %vm1302_vm4, %v1881_v27, %v1877_v59  ;;  %v1748_v46 = vrot.slane %v9974_v12, %v7102_v45  ;;  %v1822_v59 = vrot.slane %v7189_v19, %v7078_v25  ;;  %v1679_v27 = vrot.slane %v9977_v1, %v7119_v18 }
 0x338   :  { %v1886_v21 = vrot.slane %v1247_v35, %v7075_v20  ;;  %v1901_v52 = vrot.slane %v1256_v33, %v7078_v25  ;;  %v1675_v12 = vsel %vm1344_vm10, %v1674_v58, %v1670_v32  ;;  %v9983_v58 = vld [vmem:[#allocation82_spill] sm:$0xff] }
 0x339   :  { %v1749_v35 = vsel %vm9829_vm9, %v1748_v46, %v1744_v48  ;;  %v1823_v56 = vsel %vm9830_vm8, %v1822_v59, %v1818_v30  ;;  %v1832_v46 = vrot.slane %v7217_v40, %v7091_v10  ;;  %v1680_v62 = vsel %vm1351_vm11, %v1679_v27, %v1675_v12  ;;  %v9984_v27 = vld [vmem:[#allocation68_spill] sm:$0xff] }
 0x33a   :  { %v1887_v8 = vsel %vm1309_vm5, %v1886_v21, %v1882_v5  ;;  %v1753_v21 = vrot.slane %v9979_v43, %v7091_v10  ;;  %v1828_v29 = vsel %vm9829_vm9, %v1827_v37, %v1823_v56  ;;  %v9980_v5 = vld [vmem:[#allocation65_spill] sm:$0xff]  ;;  %v1689_v30 = vrot.slane %v9981_v36, %v7129_v39 }
 0x33b   :  { %v1253_v63 = vpop.permute.xlu1 %1252  ;;  %v1262_v61 = vpop.permute.xlu0 %1261  ;;  %v1892_v42 = vsel %vm1316_vm6, %v1891_v15, %v1887_v8  ;;  %v1684_v54 = vrot.slane %v9980_v5, %v7109_v16  ;;  %v9982_v15 = vld [vmem:[#allocation85_spill] sm:$0xff]  ;;  %v1833_v60 = vsel %vm1344_vm10, %v1832_v46, %v1828_v29  ;;  %v1763_v14 = vrot.slane %v9983_v58, %v7109_v16  ;;  %v9988_v29 = vld [vmem:[#allocation87_spill] sm:$0xff] }
 0x33c   :  { %v1896_v7 = vrot.slane %v1253_v63, %v7084_v49  ;;  %v1754_v47 = vsel %vm1344_vm10, %v1753_v21, %v1749_v35  ;;  %v1768_v63 = vrot.slane %v9982_v15, %v7129_v39  ;;  %v1838_v59 = vsel %vm1351_vm11, %v1837_v9, %v1833_v60  ;;  %v9993_v58 = vld [vmem:[#allocation89_spill] sm:$0xff] }
 0x33d   :  { %v1759_v37 = vsel %vm1351_vm11, %v1758_v13, %v1754_v47  ;;  %v1911_v32 = vrot.slane %v1262_v61, %v7091_v10  ;;  %v1694_v48 = vrot.slane %v9984_v27, %v7122_v55  ;;  %v1842_v35 = vrot.slane %v7245_v57, %v7109_v16 }
 0x33e   :  { %v1897_v19 = vsel %vm9846_vm7, %v1896_v7, %v1892_v42  ;;  %v1847_v7 = vrot.slane %v7296_v50, %v7129_v39  ;;  %v1685_v42 = vsel %vm9985_vm2, %v1684_v54, %v1680_v62  ;;  %v1778_v9 = vrot.slane %v9988_v29, %v7145_v4  ;;  %v9990_v62 = vld [vmem:[#allocation70_spill] sm:$0xff] }
 0x33f   :  { %v1259_v51 = vpop.permute.xlu1 %1258  ;;  %v1268_v8 = vpop.permute.xlu0 %1267  ;;  %v1902_v33 = vsel %vm9830_vm8, %v1901_v52, %v1897_v19  ;;  %v1690_v56 = vsel %vm1365_vm13, %v1689_v30, %v1685_v42  ;;  %v9986_v19 = vld [vmem:[#allocation71_spill] sm:$0xff]  ;;  %vm9987_vm8 = vmmov %vm9985_vm2  ;;  %v1843_v57 = vsel %vm9985_vm2, %v1842_v35, %v1838_v59  ;;  %v1857_v12 = vrot.slane %v7322_v38, %v7145_v4 }
 0x340   :  { %v1906_v11 = vrot.slane %v1259_v51, %v7102_v45  ;;  %v1699_v50 = vrot.slane %v9986_v19, %v7145_v4  ;;  %v1764_v61 = vsel %vm9987_vm8, %v1763_v14, %v1759_v37  ;;  %v9989_v51 = vld [vmem:[#allocation84_spill] sm:$0xff]  ;;  %v1848_v54 = vsel %vm1365_vm13, %v1847_v7, %v1843_v57  ;;  %vm9992_vm8 = vmmov %vm9985_vm2  ;;  %v9994_v7 = vld [vmem:[#allocation86_spill] sm:$0xff] }
 0x341   :  { %v1769_v21 = vsel %vm1365_vm13, %v1768_v63, %v1764_v61  ;;  %v1773_v5 = vrot.slane %v9989_v51, %v7122_v55  ;;  %v1921_v46 = vrot.slane %v1268_v8, %v7109_v16  ;;  %v1704_v36 = vrot.slane %v9990_v62, %v7132_v2  ;;  %v9991_v63 = vld [vmem:[#allocation73_spill] sm:$0xff] }
 0x342   :  { %v1907_v40 = vsel %vm9829_vm9, %v1906_v11, %v1902_v33  ;;  %vm1954_vm9 = vcmask 1044484   ;;  %v1695_v30 = vsel %vm1372_vm14, %v1694_v48, %v1690_v56  ;;  %v1852_v47 = vrot.slane %v7273_v0, %v7122_v55 }
 0x343   :  { %v1265_v1 = vpop.permute.xlu1 %1264  ;;  %v1274_v13 = vpop.permute.xlu0 %1273  ;;  %v1912_v43 = vsel %vm1344_vm10, %v1911_v32, %v1907_v40  ;;  %v1700_v15 = vsel %vm9831_vm15, %v1699_v50, %v1695_v30  ;;  %v1709_v60 = vrot.slane %v9991_v63, %v7289_v53  ;;  %v1774_v38 = vsel %vm1372_vm14, %v1773_v5, %v1769_v21 }
 0x344   :  { %v1916_v41 = vrot.slane %v1265_v1, %v7119_v18  ;;  %v1779_v40 = vsel %vm9831_vm15, %v1778_v9, %v1774_v38  ;;  %v1788_v14 = vrot.slane %v9993_v58, %v7289_v53  ;;  %v1853_v59 = vsel %vm1372_vm14, %v1852_v47, %v1848_v54 }
 0x345   :  { %v1783_v32 = vrot.slane %v9994_v7, %v7132_v2  ;;  %v1858_v1 = vsel %vm9831_vm15, %v1857_v12, %v1853_v59  ;;  %v1867_v27 = vrot.slane %v7344_v22, %v7289_v53  ;;  %v1931_v48 = vrot.slane %v1274_v13, %v7122_v55  ;;  %v9996_v12 = vld [vmem:[#allocation59_spill] sm:$0xff] }
 0x346   :  { %v1917_v52 = vsel %vm1351_vm11, %v1916_v41, %v1912_v43  ;;  %v1631_v35 = vsel %vm1393_vm1, %v1630_v28, %v7360_v31  ;;  %v1705_v41 = vsel %vm1386_vm0, %v1704_v36, %v1700_v15  ;;  %v1862_v56 = vrot.slane %v7302_v34, %v7132_v2  ;;  %v9995_v43 = vld [vmem:[#allocation66_spill] sm:$0xff]  ;;  %v6177_v31 = vld [vmem:[%s9794_s8] ss:$0 sm:$0xff] }
 0x347   :  { %v1271_v11 = vpop.permute.xlu1 %1270  ;;  %v1280_v37 = vpop.permute.xlu0 %1279  ;;  %v1922_v8 = vsel %vm9992_vm8, %v1921_v46, %v1917_v52  ;;  %v1710_v22 = vsel %vm1393_vm1, %v1709_v60, %v1705_v41  ;;  %v1784_v13 = vsel %vm1386_vm0, %v1783_v32, %v1779_v40  ;;  %vm9845_vm2 = vcmask 1045509  }
 0x348   :  { %v1926_v33 = vrot.slane %v1271_v11, %v7129_v39  ;;  %v1789_v28 = vsel %vm1393_vm1, %v1788_v14, %v1784_v13  ;;  %v1863_v34 = vsel %vm1386_vm0, %v1862_v56, %v1858_v1  ;;  %v1953_v29 = vsel %vm1952_vm12, %v1631_v35, %v7352_v26 }
 0x349   :  { %v1868_v9 = vsel %vm1393_vm1, %v1867_v27, %v1863_v34  ;;  %v1941_v57 = vrot.slane %v1280_v37, %v7132_v2  ;;  %vm9844_vm8 = vcmask 1046534   ;;  %v1955_v51 = vsel %vm1954_vm9, %v1710_v22, %v1953_v29  ;;  %v10000_v22 = vld [vmem:[#allocation19_spill] sm:$0xff]  ;;  %v10002_v34 = vld [vmem:[#allocation18_spill] sm:$0xff] }
 0x34a   :  { %v1927_v0 = vsel %vm1365_vm13, %v1926_v33, %v1922_v8  ;;  %v524_v46 = vadd.f32 %v6177_v31, %v9996_v12  ;;  %v1957_v26 = vsel %vm9845_vm2, %v1789_v28, %v1955_v51  ;;  %v10001_v31 = vld [vmem:[#allocation21_spill] sm:$0xff]  ;;  %vm10097_vm2 = vcmask 720512  }
 0x34b   :  { %v1277_v42 = vpop.permute.xlu1 %1276  ;;  %v7515_v50 = vpop.permute.xlu0 %2018  ;;  %v1932_v61 = vsel %vm1372_vm14, %v1931_v48, %v1927_v0  ;;  %v1959_v30 = vsel %vm9844_vm8, %v1868_v9, %v1957_v26  ;;  %v9998_v48 = vld [vmem:[#allocation17_spill] sm:$0xff]  ;;  %v10003_v9 = vld [vmem:[#allocation20_spill] sm:$0xff]  ;;  %vm10075_vm8 = vcmask 523712  }
 0x34c   :  { %v1936_v19 = vrot.slane %v1277_v42, %v7145_v4  ;;  %v2084_v44 = vmul.f32 %v7515_v50, %v9995_v43  ;;  %v9999_v42 = vld [vmem:[#allocation23_spill] sm:$0xff] }
 0x34d   :  { %v1971_v35 = vrot.slane %v9999_v42, %v9998_v48 }
 0x34e   :  { %v1937_v21 = vsel %vm9831_vm15, %v1936_v19, %v1932_v61  ;;  %2349 = vperm.xlu0 %6266, %v2084_v44   ;;  %vm9843_vm15 = vcmask 1047559  }
 0x34f   :  { %v1283_v52 = vpop.permute.xlu1 %1282  ;;  %v7534_v54 = vpop.permute.xlu0 %2026  ;;  %v1942_v11 = vsel %vm1386_vm0, %v1941_v57, %v1937_v21  ;;  %v2096_v13 = vmul.f32 %v10000_v22, %v1971_v35  ;;  %v2098_v28 = vmul.f32 %v10001_v31, %v1971_v35  ;;  %v2097_v21 = vmul.f32 %v10002_v34, %v1971_v35 }
 0x350   :  { %v1946_v5 = vrot.slane %v1283_v52, %v7289_v53  ;;  %v2086_v62 = vmul.f32 %v7534_v54, %v9995_v43  ;;  %v2100_v29 = vmul.f32 %v7515_v50, %v1971_v35  ;;  %v2099_v57 = vmul.f32 %v10003_v9, %v1971_v35 }
 0x351   :  { %v2102_v52 = vmul.f32 %v7534_v54, %v1971_v35 }
 0x352   :  { %v1947_v36 = vsel %vm1393_vm1, %v1946_v5, %v1942_v11  ;;  %2355 = vperm.xlu0 %6266, %v2086_v62   ;;  %v10004_v62 = vld [vmem:[#allocation24_spill] sm:$0xff] }
 0x353   :  { %v1961_v47 = vsel %vm9843_vm15, %v1947_v36, %v1959_v30  ;;  %v7544_v33 = vpop.permute.xlu1 %2022  ;;  %v7548_v15 = vpop.permute.xlu0 %2034  ;;  %v1975_v36 = vrot.slane %v10004_v62, %v9998_v48  ;;  %vm10074_vm15 = vcmask 458112  }
 0x354   :  { %v7546_v37 = vadd.f32 %v1961_v47, %v524_v46  ;;  %v2085_v63 = vmul.f32 %v7544_v33, %v9995_v43  ;;  %v2088_v60 = vmul.f32 %v7548_v15, %v9995_v43  ;;  %v2101_v51 = vmul.f32 %v7544_v33, %v1971_v35 }
 0x356   :  { %9997 = vst [vmem:[#allocation34_spill] sm:$0xff] %v7546_v37  ;;  %2352 = vperm.xlu1 %6265, %v2085_v63   ;;  %2361 = vperm.xlu0 %6266, %v2088_v60   ;;  %v2112_v63 = vmul.f32 %v10000_v22, %v1975_v36 }
 0x357   :  { %v7554_v38 = vpop.permute.xlu1 %2030  ;;  %v7556_v8 = vpop.permute.xlu0 %2042 }
 0x358   :  { %v2087_v40 = vmul.f32 %v7554_v38, %v9995_v43  ;;  %v2090_v58 = vmul.f32 %v7556_v8, %v9995_v43  ;;  %v2103_v5 = vmul.f32 %v7554_v38, %v1971_v35  ;;  %v2106_v12 = vmul.f32 %v7556_v8, %v1971_v35 }
 0x35a   :  { %2358 = vperm.xlu1 %6265, %v2087_v40   ;;  %2367 = vperm.xlu0 %6266, %v2090_v58   ;;  %v2114_v40 = vmul.f32 %v10001_v31, %v1975_v36  ;;  %v2113_v58 = vmul.f32 %v10002_v34, %v1975_v36 }
 0x35b   :  { %v7562_v14 = vpop.permute.xlu1 %2038  ;;  %v7564_v59 = vpop.permute.xlu0 %2050 }
 0x35c   :  { %v2089_v0 = vmul.f32 %v7562_v14, %v9995_v43  ;;  %v2092_v7 = vmul.f32 %v7564_v59, %v9995_v43  ;;  %v2105_v46 = vmul.f32 %v7562_v14, %v1971_v35  ;;  %v2108_v11 = vmul.f32 %v7564_v59, %v1971_v35 }
 0x35e   :  { %2364 = vperm.xlu1 %6265, %v2089_v0   ;;  %2373 = vperm.xlu0 %6266, %v2092_v7   ;;  %v2116_v0 = vmul.f32 %v7515_v50, %v1975_v36  ;;  %v2115_v7 = vmul.f32 %v10003_v9, %v1975_v36 }
 0x35f   :  { %v7570_v32 = vpop.permute.xlu1 %2046  ;;  %v7572_v1 = vpop.permute.xlu0 %2058 }
 0x360   :  { %v2091_v27 = vmul.f32 %v7570_v32, %v9995_v43  ;;  %v2094_v41 = vmul.f32 %v7572_v1, %v9995_v43  ;;  %v2107_v26 = vmul.f32 %v7570_v32, %v1971_v35  ;;  %v2110_v30 = vmul.f32 %v7572_v1, %v1971_v35 }
 0x362   :  { %2370 = vperm.xlu1 %6265, %v2091_v27   ;;  %2379 = vperm.xlu0 %6266, %v2094_v41   ;;  %v2118_v27 = vmul.f32 %v7534_v54, %v1975_v36  ;;  %v2117_v41 = vmul.f32 %v7544_v33, %v1975_v36 }
 0x363   :  { %v7580_v56 = vpop.permute.xlu1 %2054 }
 0x364   :  { %v2093_v19 = vmul.f32 %v7580_v56, %v9995_v43  ;;  %v2109_v47 = vmul.f32 %v7580_v56, %v1971_v35 }
 0x366   :  { %2376 = vperm.xlu1 %6265, %v2093_v19   ;;  %2385 = vperm.xlu0 %6266, %v2096_v13   ;;  %v2119_v19 = vmul.f32 %v7554_v38, %v1975_v36  ;;  %v2122_v13 = vmul.f32 %v7556_v8, %v1975_v36 }
 0x367   :  { %v7585_v61 = vpop.permute.xlu1 %2062 }
 0x368   :  { %v2095_v44 = vmul.f32 %v7585_v61, %v9995_v43  ;;  %v2104_v43 = vmul.f32 %v7548_v15, %v1971_v35  ;;  %v2111_v60 = vmul.f32 %v7585_v61, %v1971_v35  ;;  %v2120_v35 = vmul.f32 %v7548_v15, %v1975_v36 }
 0x36a   :  { %2382 = vperm.xlu1 %6265, %v2095_v44   ;;  %2391 = vperm.xlu0 %6266, %v2098_v28   ;;  %v2121_v44 = vmul.f32 %v7562_v14, %v1975_v36  ;;  %v2124_v28 = vmul.f32 %v7564_v59, %v1975_v36 }
 0x36e   :  { %2388 = vperm.xlu1 %6265, %v2097_v21   ;;  %2397 = vperm.xlu0 %6266, %v2100_v29   ;;  %v2123_v21 = vmul.f32 %v7570_v32, %v1975_v36  ;;  %v10005_v29 = vld [vmem:[#allocation25_spill] sm:$0xff] }
 0x372   :  { %2394 = vperm.xlu1 %6265, %v2099_v57   ;;  %2403 = vperm.xlu0 %6266, %v2102_v52   ;;  %v1979_v57 = vrot.slane %v10005_v29, %v9998_v48  ;;  %v2126_v52 = vmul.f32 %v7572_v1, %v1975_v36 }
 0x376   :  { %2400 = vperm.xlu1 %6265, %v2101_v51   ;;  %2409 = vperm.xlu0 %6266, %v2104_v43   ;;  %v2125_v51 = vmul.f32 %v7580_v56, %v1975_v36  ;;  %v2128_v43 = vmul.f32 %v10000_v22, %v1979_v57 }
 0x37a   :  { %2406 = vperm.xlu1 %6265, %v2103_v5   ;;  %2415 = vperm.xlu0 %6266, %v2106_v12   ;;  %v2127_v5 = vmul.f32 %v7585_v61, %v1975_v36  ;;  %v2130_v12 = vmul.f32 %v10001_v31, %v1979_v57  ;;  %v2136_v36 = vmul.f32 %v7548_v15, %v1979_v57 }
 0x37e   :  { %2412 = vperm.xlu1 %6265, %v2105_v46   ;;  %2421 = vperm.xlu0 %6266, %v2108_v11   ;;  %v2129_v46 = vmul.f32 %v10002_v34, %v1979_v57  ;;  %v2132_v11 = vmul.f32 %v7515_v50, %v1979_v57 }
 0x382   :  { %2418 = vperm.xlu1 %6265, %v2107_v26   ;;  %2427 = vperm.xlu0 %6266, %v2110_v30   ;;  %v2131_v26 = vmul.f32 %v10003_v9, %v1979_v57  ;;  %v2134_v30 = vmul.f32 %v7534_v54, %v1979_v57 }
 0x386   :  { %2424 = vperm.xlu1 %6265, %v2109_v47   ;;  %2433 = vperm.xlu0 %6266, %v2112_v63   ;;  %v2133_v47 = vmul.f32 %v7544_v33, %v1979_v57  ;;  %v2135_v63 = vmul.f32 %v7554_v38, %v1979_v57 }
 0x38a   :  { %2430 = vperm.xlu1 %6265, %v2111_v60   ;;  %2439 = vperm.xlu0 %6266, %v2114_v40   ;;  %v2138_v60 = vmul.f32 %v7556_v8, %v1979_v57  ;;  %v2137_v40 = vmul.f32 %v7562_v14, %v1979_v57 }
 0x38e   :  { %2436 = vperm.xlu1 %6265, %v2113_v58   ;;  %2445 = vperm.xlu0 %6266, %v2116_v0   ;;  %v2140_v58 = vmul.f32 %v7564_v59, %v1979_v57  ;;  %v7636_v0 = vpop.permute.xlu0 %2337 }
 0x392   :  { %2442 = vperm.xlu1 %6265, %v2115_v7   ;;  %2451 = vperm.xlu0 %6266, %v2118_v27   ;;  %v2139_v7 = vmul.f32 %v7570_v32, %v1979_v57  ;;  %v10006_v27 = vld [vmem:[#allocation26_spill] sm:$0xff] }
 0x396   :  { %2448 = vperm.xlu1 %6265, %v2117_v41   ;;  %2457 = vperm.xlu0 %6266, %v2120_v35   ;;  %v1983_v41 = vrot.slane %v10006_v27, %v9998_v48  ;;  %v2142_v35 = vmul.f32 %v7572_v1, %v1979_v57 }
 0x39a   :  { %2454 = vperm.xlu1 %6265, %v2119_v19   ;;  %2463 = vperm.xlu0 %6266, %v2122_v13   ;;  %v2141_v19 = vmul.f32 %v7580_v56, %v1979_v57  ;;  %v2144_v13 = vmul.f32 %v10000_v22, %v1983_v41 }
 0x39e   :  { %2460 = vperm.xlu1 %6265, %v2121_v44   ;;  %2469 = vperm.xlu0 %6266, %v2124_v28   ;;  %v7644_v44 = vpop.permute.xlu0 %2343  ;;  %v7646_v28 = vpop.permute.xlu1 %2340 }
 0x3a2   :  { %2466 = vperm.xlu1 %6265, %v2123_v21   ;;  %2475 = vperm.xlu0 %6266, %v2126_v52   ;;  %v2143_v21 = vmul.f32 %v7585_v61, %v1979_v57  ;;  %v2146_v52 = vmul.f32 %v10001_v31, %v1983_v41  ;;  %v2150_v57 = vmul.f32 %v7534_v54, %v1983_v41 }
 0x3a6   :  { %2472 = vperm.xlu1 %6265, %v2125_v51   ;;  %2481 = vperm.xlu0 %6266, %v2128_v43   ;;  %v2145_v43 = vmul.f32 %v10002_v34, %v1983_v41 }
 0x3aa   :  { %2478 = vperm.xlu1 %6265, %v2127_v5   ;;  %2487 = vperm.xlu0 %6266, %v2130_v12   ;;  %v7653_v5 = vpop.permute.xlu1 %2346  ;;  %v2148_v12 = vmul.f32 %v7515_v50, %v1983_v41 }
 0x3ae   :  { %2484 = vperm.xlu1 %6265, %v2129_v46   ;;  %2493 = vperm.xlu0 %6266, %v2132_v11   ;;  %v2147_v11 = vmul.f32 %v10003_v9, %v1983_v41 }
 0x3b2   :  { %2490 = vperm.xlu1 %6265, %v2131_v26   ;;  %2499 = vperm.xlu0 %6266, %v2134_v30  }
 0x3b6   :  { %2496 = vperm.xlu1 %6265, %v2133_v47   ;;  %2505 = vperm.xlu0 %6266, %v2136_v36   ;;  %v2149_v47 = vmul.f32 %v7544_v33, %v1983_v41 }
 0x3ba   :  { %2502 = vperm.xlu1 %6265, %v2135_v63   ;;  %2511 = vperm.xlu0 %6266, %v2138_v60   ;;  %v2152_v63 = vmul.f32 %v7548_v15, %v1983_v41 }
 0x3be   :  { %2508 = vperm.xlu1 %6265, %v2137_v40   ;;  %2517 = vperm.xlu0 %6266, %v2140_v58   ;;  %v2151_v40 = vmul.f32 %v7554_v38, %v1983_v41 }
 0x3c2   :  { %2514 = vperm.xlu1 %6265, %v2139_v7   ;;  %2523 = vperm.xlu0 %6266, %v2142_v35   ;;  %v2154_v7 = vmul.f32 %v7556_v8, %v1983_v41 }
 0x3c6   :  { %2520 = vperm.xlu1 %6265, %v2141_v19   ;;  %2529 = vperm.xlu0 %6266, %v2144_v13   ;;  %v2153_v19 = vmul.f32 %v7562_v14, %v1983_v41 }
 0x3c9   :  { %v7650_v51 = vpop.permute.xlu0 %2349 }
 0x3ca   :  { %2526 = vperm.xlu1 %6265, %v2143_v21   ;;  %2535 = vperm.xlu0 %6266, %v2146_v52   ;;  %v2156_v21 = vmul.f32 %v7564_v59, %v1983_v41 }
 0x3cd   :  { %v7656_v46 = vpop.permute.xlu0 %2355 }
 0x3ce   :  { %2532 = vperm.xlu1 %6265, %v2145_v43   ;;  %2541 = vperm.xlu0 %6266, %v2148_v12   ;;  %v2155_v43 = vmul.f32 %v7570_v32, %v1983_v41  ;;  %v10010_v12 = vld [vmem:[#allocation29_spill] sm:$0xff] }
 0x3d1   :  { %v7659_v26 = vpop.permute.xlu1 %2352  ;;  %v7662_v30 = vpop.permute.xlu0 %2361 }
 0x3d2   :  { %2538 = vperm.xlu1 %6265, %v2147_v11   ;;  %2547 = vperm.xlu0 %6266, %v2150_v57   ;;  %v1987_v11 = vrot.slane %v10010_v12, %v9998_v48  ;;  %v2159_v12 = vmul.f32 %v7585_v61, %v1983_v41 }
 0x3d4   :  { %v2162_v29 = vmul.f32 %v10001_v31, %v1987_v11  ;;  %v2164_v37 = vmul.f32 %v7515_v50, %v1987_v11  ;;  %v2168_v53 = vmul.f32 %v7548_v15, %v1987_v11  ;;  %v2170_v4 = vmul.f32 %v7556_v8, %v1987_v11 }
 0x3d5   :  { %v7665_v36 = vpop.permute.xlu1 %2358  ;;  %v7668_v60 = vpop.permute.xlu0 %2367  ;;  %v2172_v2 = vmul.f32 %v7564_v59, %v1987_v11 }
 0x3d6   :  { %2544 = vperm.xlu1 %6265, %v2149_v47   ;;  %2553 = vperm.xlu0 %6266, %v2152_v63   ;;  %v2158_v47 = vmul.f32 %v7572_v1, %v1983_v41 }
 0x3d9   :  { %v7671_v58 = vpop.permute.xlu1 %2364  ;;  %v7674_v35 = vpop.permute.xlu0 %2373 }
 0x3da   :  { %10007 = vst [vmem:[#allocation45_spill] sm:$0xff] %v7674_v35  ;;  %2550 = vperm.xlu1 %6265, %v2151_v40   ;;  %2559 = vperm.xlu0 %6266, %v2154_v7   ;;  %v2157_v40 = vmul.f32 %v7580_v56, %v1983_v41  ;;  %v2163_v41 = vmul.f32 %v10003_v9, %v1987_v11 }
 0x3dd   :  { %v7677_v13 = vpop.permute.xlu1 %2370  ;;  %v7680_v52 = vpop.permute.xlu0 %2379 }
 0x3de   :  { %10008 = vst [vmem:[#allocation43_spill] sm:$0xff] %v7677_v13  ;;  %10009 = vst [vmem:[#allocation30_spill] sm:$0xff] %v7680_v52  ;;  %2556 = vperm.xlu1 %6265, %v2153_v19   ;;  %2565 = vperm.xlu0 %6266, %v2156_v21   ;;  %v2160_v19 = vmul.f32 %v10000_v22, %v1987_v11 }
 0x3e1   :  { %v7685_v57 = vpop.permute.xlu1 %2376  ;;  %v7688_v63 = vpop.permute.xlu0 %2385 }
 0x3e2   :  { %10011 = vst [vmem:[#allocation27_spill] sm:$0xff] %v7685_v57  ;;  %2562 = vperm.xlu1 %6265, %v2155_v43   ;;  %2571 = vperm.xlu0 %6266, %v2158_v47   ;;  %v2161_v43 = vmul.f32 %v10002_v34, %v1987_v11 }
 0x3e5   :  { %v7691_v7 = vpop.permute.xlu1 %2382  ;;  %v7694_v21 = vpop.permute.xlu0 %2391 }
 0x3e6   :  { %10012 = vst [vmem:[#allocation39_spill] sm:$0xff] %v7691_v7  ;;  %2568 = vperm.xlu1 %6265, %v2157_v40   ;;  %2577 = vperm.xlu0 %6266, %v2160_v19   ;;  %v2166_v19 = vmul.f32 %v7534_v54, %v1987_v11 }
 0x3e9   :  { %v7697_v27 = vpop.permute.xlu1 %2388  ;;  %v7700_v62 = vpop.permute.xlu0 %2397 }
 0x3ea   :  { %2574 = vperm.xlu1 %6265, %v2159_v12   ;;  %2583 = vperm.xlu0 %6266, %v2162_v29   ;;  %v2165_v29 = vmul.f32 %v7544_v33, %v1987_v11 }
 0x3ed   :  { %v7703_v47 = vpop.permute.xlu1 %2394  ;;  %v7706_v42 = vpop.permute.xlu0 %2403 }
 0x3ee   :  { %2580 = vperm.xlu1 %6265, %v2161_v43   ;;  %2589 = vperm.xlu0 %6266, %v2164_v37   ;;  %v2167_v37 = vmul.f32 %v7554_v38, %v1987_v11 }
 0x3f1   :  { %v7709_v40 = vpop.permute.xlu1 %2400  ;;  %v7712_v7 = vpop.permute.xlu0 %2409 }
 0x3f2   :  { %10013 = vst [vmem:[#allocation35_spill] sm:$0xff] %v7712_v7  ;;  %2586 = vperm.xlu1 %6265, %v2163_v41   ;;  %2595 = vperm.xlu0 %6266, %v2166_v19   ;;  %v2169_v41 = vmul.f32 %v7562_v14, %v1987_v11 }
 0x3f5   :  { %v7715_v12 = vpop.permute.xlu1 %2406  ;;  %v7718_v57 = vpop.permute.xlu0 %2415 }
 0x3f6   :  { %10014 = vst [vmem:[#allocation44_spill] sm:$0xff] %v7718_v57  ;;  %2592 = vperm.xlu1 %6265, %v2165_v29   ;;  %2601 = vperm.xlu0 %6266, %v2168_v53   ;;  %v2171_v53 = vmul.f32 %v7570_v32, %v1987_v11  ;;  %v10019_v29 = vld [vmem:[#allocation38_spill] sm:$0xff] }
 0x3f7   :  { %v1991_v57 = vrot.slane %v10019_v29, %v9998_v48  ;;  %v2175_v29 = vmul.f32 %v7585_v61, %v1987_v11 }
 0x3f9   :  { %v7721_v43 = vpop.permute.xlu1 %2412  ;;  %v7724_v52 = vpop.permute.xlu0 %2421 }
 0x3fa   :  { %10015 = vst [vmem:[#allocation28_spill] sm:$0xff] %v7721_v43  ;;  %10016 = vst [vmem:[#allocation32_spill] sm:$0xff] %v7724_v52  ;;  %2598 = vperm.xlu1 %6265, %v2167_v37   ;;  %2607 = vperm.xlu0 %6266, %v2170_v4   ;;  %v2174_v37 = vmul.f32 %v7572_v1, %v1987_v11  ;;  %v2173_v52 = vmul.f32 %v7580_v56, %v1987_v11 }
 0x3fb   :  { %v2184_v43 = vmul.f32 %v7548_v15, %v1991_v57 }
 0x3fd   :  { %v7727_v19 = vpop.permute.xlu1 %2418  ;;  %v7730_v35 = vpop.permute.xlu0 %2427 }
 0x3fe   :  { %10017 = vst [vmem:[#allocation41_spill] sm:$0xff] %v7727_v19  ;;  %10018 = vst [vmem:[#allocation37_spill] sm:$0xff] %v7730_v35  ;;  %2604 = vperm.xlu1 %6265, %v2169_v41   ;;  %2613 = vperm.xlu0 %6266, %v2172_v2   ;;  %v2176_v41 = vmul.f32 %v10000_v22, %v1991_v57 }
 0x401   :  { %v7735_v55 = vpop.permute.xlu1 %2424  ;;  %v7738_v4 = vpop.permute.xlu0 %2433 }
 0x402   :  { %10020 = vst [vmem:[#allocation49_spill] sm:$0xff] %v7735_v55  ;;  %2610 = vperm.xlu1 %6265, %v2171_v53   ;;  %2619 = vperm.xlu0 %6266, %v2174_v37   ;;  %v2178_v55 = vmul.f32 %v10001_v31, %v1991_v57  ;;  %v2177_v53 = vmul.f32 %v10002_v34, %v1991_v57 }
 0x405   :  { %v7741_v19 = vpop.permute.xlu1 %2430  ;;  %v7744_v2 = vpop.permute.xlu0 %2439 }
 0x406   :  { %10021 = vst [vmem:[#allocation46_spill] sm:$0xff] %v7741_v19  ;;  %2616 = vperm.xlu1 %6265, %v2173_v52   ;;  %2625 = vperm.xlu0 %6266, %v2176_v41   ;;  %v2180_v19 = vmul.f32 %v7515_v50, %v1991_v57  ;;  %v2179_v52 = vmul.f32 %v10003_v9, %v1991_v57 }
 0x407   :  { %v2182_v41 = vmul.f32 %v7534_v54, %v1991_v57 }
 0x409   :  { %v7747_v35 = vpop.permute.xlu1 %2436  ;;  %v7750_v7 = vpop.permute.xlu0 %2445 }
 0x40a   :  { %10022 = vst [vmem:[#allocation42_spill] sm:$0xff] %v7750_v7  ;;  %2622 = vperm.xlu1 %6265, %v2175_v29   ;;  %2631 = vperm.xlu0 %6266, %v2178_v55   ;;  %v2181_v55 = vmul.f32 %v7544_v33, %v1991_v57 }
 0x40d   :  { %v7753_v37 = vpop.permute.xlu1 %2442  ;;  %v7756_v13 = vpop.permute.xlu0 %2451 }
 0x40e   :  { %10023 = vst [vmem:[#allocation40_spill] sm:$0xff] %v7756_v13  ;;  %2628 = vperm.xlu1 %6265, %v2177_v53   ;;  %2637 = vperm.xlu0 %6266, %v2180_v19   ;;  %v2183_v19 = vmul.f32 %v7554_v38, %v1991_v57  ;;  %v2186_v13 = vmul.f32 %v7556_v8, %v1991_v57 }
 0x411   :  { %v7759_v11 = vpop.permute.xlu1 %2448  ;;  %v7762_v39 = vpop.permute.xlu0 %2457 }
 0x412   :  { %10024 = vst [vmem:[#allocation50_spill] sm:$0xff] %v7759_v11  ;;  %10025 = vst [vmem:[#allocation33_spill] sm:$0xff] %v7762_v39  ;;  %2634 = vperm.xlu1 %6265, %v2179_v52   ;;  %2643 = vperm.xlu0 %6266, %v2182_v41   ;;  %v2185_v52 = vmul.f32 %v7562_v14, %v1991_v57  ;;  %v2188_v39 = vmul.f32 %v7564_v59, %v1991_v57 }
 0x415   :  { %v7765_v29 = vpop.permute.xlu1 %2454  ;;  %v7768_v7 = vpop.permute.xlu0 %2463 }
 0x416   :  { %10026 = vst [vmem:[#allocation48_spill] sm:$0xff] %v7765_v29  ;;  %10027 = vst [vmem:[#allocation53_spill] sm:$0xff] %v7768_v7  ;;  %2640 = vperm.xlu1 %6265, %v2181_v55   ;;  %2649 = vperm.xlu0 %6266, %v2184_v43   ;;  %v2187_v43 = vmul.f32 %v7570_v32, %v1991_v57  ;;  %v10032_v55 = vld [vmem:[#allocation47_spill] sm:$0xff] }
 0x417   :  { %v1995_v7 = vrot.slane %v10032_v55, %v9998_v48  ;;  %v2191_v48 = vmul.f32 %v7585_v61, %v1991_v57 }
 0x419   :  { %v7771_v53 = vpop.permute.xlu1 %2460  ;;  %v7774_v11 = vpop.permute.xlu0 %2469 }
 0x41a   :  { %10028 = vst [vmem:[#allocation31_spill] sm:$0xff] %v7771_v53  ;;  %10029 = vst [vmem:[#allocation51_spill] sm:$0xff] %v7774_v11  ;;  %2646 = vperm.xlu1 %6265, %v2183_v19   ;;  %2655 = vperm.xlu0 %6266, %v2186_v13   ;;  %v2190_v19 = vmul.f32 %v7572_v1, %v1991_v57  ;;  %v2189_v11 = vmul.f32 %v7580_v56, %v1991_v57 }
 0x41b   :  { %v2195_v57 = vmul.f32 %v10003_v9, %v1995_v7  ;;  %v2199_v9 = vmul.f32 %v7554_v38, %v1995_v7  ;;  %v2203_v38 = vmul.f32 %v7570_v32, %v1995_v7 }
 0x41d   :  { %v7777_v41 = vpop.permute.xlu1 %2466  ;;  %v7780_v29 = vpop.permute.xlu0 %2475 }
 0x41e   :  { %10030 = vst [vmem:[#allocation57_spill] sm:$0xff] %v7777_v41  ;;  %10031 = vst [vmem:[#allocation75_spill] sm:$0xff] %v7780_v29  ;;  %2652 = vperm.xlu1 %6265, %v2185_v52   ;;  %2661 = vperm.xlu0 %6266, %v2188_v39   ;;  %v2192_v52 = vmul.f32 %v10000_v22, %v1995_v7  ;;  %v2194_v29 = vmul.f32 %v10001_v31, %v1995_v7 }
 0x41f   :  { %v2196_v22 = vmul.f32 %v7515_v50, %v1995_v7  ;;  %v2198_v31 = vmul.f32 %v7534_v54, %v1995_v7  ;;  %v2200_v50 = vmul.f32 %v7548_v15, %v1995_v7  ;;  %v2202_v54 = vmul.f32 %v7556_v8, %v1995_v7 }
 0x420   :  { %v2204_v15 = vmul.f32 %v7564_v59, %v1995_v7 }
 0x421   :  { %v7785_v53 = vpop.permute.xlu1 %2472  ;;  %v7788_v13 = vpop.permute.xlu0 %2481 }
 0x422   :  { %10033 = vst [vmem:[#allocation54_spill] sm:$0xff] %v7785_v53  ;;  %2658 = vperm.xlu1 %6265, %v2187_v43   ;;  %2667 = vperm.xlu0 %6266, %v2190_v19   ;;  %v2193_v43 = vmul.f32 %v10002_v34, %v1995_v7  ;;  %v2197_v34 = vmul.f32 %v7544_v33, %v1995_v7 }
 0x423   :  { %v2201_v33 = vmul.f32 %v7562_v14, %v1995_v7  ;;  %v6268_v14 = vld [vmem:[%s9793_s7] sm:$0xf] }
 0x425   :  { %v7791_v41 = vpop.permute.xlu1 %2478  ;;  %v7794_v39 = vpop.permute.xlu0 %2487 }
 0x426   :  { %10034 = vst [vmem:[#allocation52_spill] sm:$0xff] %v7791_v41  ;;  %2664 = vperm.xlu1 %6265, %v2189_v11   ;;  %2673 = vperm.xlu0 %6266, %v2192_v52  }
 0x429   :  { %v7797_v55 = vpop.permute.xlu1 %2484  ;;  %v7800_v53 = vpop.permute.xlu0 %2493 }
 0x42a   :  { %2670 = vperm.xlu1 %6265, %v2191_v48   ;;  %2679 = vperm.xlu0 %6266, %v2194_v29  }
 0x42d   :  { %v7803_v19 = vpop.permute.xlu1 %2490  ;;  %v7806_v41 = vpop.permute.xlu0 %2499 }
 0x42e   :  { %2676 = vperm.xlu1 %6265, %v2193_v43   ;;  %2685 = vperm.xlu0 %6266, %v2196_v22  }
 0x431   :  { %v7809_v11 = vpop.permute.xlu1 %2496  ;;  %v7812_v52 = vpop.permute.xlu0 %2505 }
 0x432   :  { %2682 = vperm.xlu1 %6265, %v2195_v57   ;;  %2691 = vperm.xlu0 %6266, %v2198_v31  }
 0x435   :  { %v7815_v29 = vpop.permute.xlu1 %2502  ;;  %v7818_v48 = vpop.permute.xlu0 %2511 }
 0x436   :  { %2688 = vperm.xlu1 %6265, %v2197_v34   ;;  %2697 = vperm.xlu0 %6266, %v2200_v50   ;;  %v7834_v34 = vsub.s32 2, %v6480_v3  ;;  %v2206_v50 = vmul.f32 %v7572_v1, %v1995_v7  ;;  %v2207_v1 = vmul.f32 %v7585_v61, %v1995_v7 }
 0x438   :  { %v3396_v59 = vrot.slane %v6268_v14, %v7834_v34 }
 0x439   :  { %v7821_v43 = vpop.permute.xlu1 %2508  ;;  %v7824_v22 = vpop.permute.xlu0 %2517 }
 0x43a   :  { %10035 = vst [vmem:[#allocation72_spill] sm:$0xff] %v7824_v22  ;;  %2694 = vperm.xlu1 %6265, %v2199_v9   ;;  %2703 = vperm.xlu0 %6266, %v2202_v54   ;;  %v2205_v54 = vmul.f32 %v7580_v56, %v1995_v7 }
 0x43d   :  { %v7827_v57 = vpop.permute.xlu1 %2514  ;;  %v7830_v31 = vpop.permute.xlu0 %2523 }
 0x43e   :  { %10036 = vst [vmem:[#allocation60_spill] sm:$0xff] %v7830_v31  ;;  %2700 = vperm.xlu1 %6265, %v2201_v33   ;;  %2709 = vperm.xlu0 %6266, %v2204_v15  }
 0x441   :  { %v7836_v8 = vpop.permute.xlu1 %2520  ;;  %v7839_v9 = vpop.permute.xlu0 %2529 }
 0x442   :  { %2706 = vperm.xlu1 %6265, %v2203_v38   ;;  %2715 = vperm.xlu0 %6266, %v2206_v50  }
 0x445   :  { %v7846_v32 = vpop.permute.xlu1 %2526  ;;  %v7848_v33 = vpop.permute.xlu0 %2535 }
 0x446   :  { %10037 = vst [vmem:[#allocation88_spill] sm:$0xff] %v7846_v32  ;;  %2712 = vperm.xlu1 %6265, %v2205_v54   ;;  %3399 = vbcast.lane.b32.xlu0 %v3396_v59, 256 }
 0x449   :  { %v7851_v15 = vpop.permute.xlu1 %2532  ;;  %v7853_v38 = vpop.permute.xlu0 %2541 }
 0x44a   :  { %10038 = vst [vmem:[#allocation56_spill] sm:$0xff] %v7853_v38  ;;  %2718 = vperm.xlu1 %6265, %v2207_v1   ;;  %3407 = vbcast.lane.b32.xlu0 %v3396_v59, 272 }
 0x44d   :  { %v7855_v3 = vpop.permute.xlu1 %2538  ;;  %v7857_v14 = vpop.permute.xlu0 %2547 }
 0x44e   :  { %10039 = vst [vmem:[#allocation77_spill] sm:$0xff] %v7857_v14  ;;  %3403 = vbcast.lane.b32.xlu1 %v3396_v59, 264  ;;  %3415 = vbcast.lane.b32.xlu0 %v3396_v59, 288 }
 0x451   :  { %v7859_v56 = vpop.permute.xlu1 %2544  ;;  %v7861_v50 = vpop.permute.xlu0 %2553 }
 0x452   :  { %10040 = vst [vmem:[#allocation55_spill] sm:$0xff] %v7861_v50  ;;  %3411 = vbcast.lane.b32.xlu1 %v3396_v59, 280  ;;  %3423 = vbcast.lane.b32.xlu0 %v3396_v59, 304 }
 0x455   :  { %v7863_v54 = vpop.permute.xlu1 %2550  ;;  %v7865_v61 = vpop.permute.xlu0 %2559 }
 0x456   :  { %10041 = vst [vmem:[#allocation74_spill] sm:$0xff] %v7863_v54  ;;  %10042 = vst [vmem:[#allocation91_spill] sm:$0xff] %v7865_v61  ;;  %3419 = vbcast.lane.b32.xlu1 %v3396_v59, 296  ;;  %3431 = vbcast.lane.b32.xlu0 %v3396_v59, 320 }
 0x459   :  { %v7867_v7 = vpop.permute.xlu1 %2556  ;;  %v7869_v1 = vpop.permute.xlu0 %2565 }
 0x45a   :  { %10043 = vst [vmem:[#allocation58_spill] sm:$0xff] %v7867_v7  ;;  %10044 = vst [vmem:[#allocation62_spill] sm:$0xff] %v7869_v1  ;;  %3427 = vbcast.lane.b32.xlu1 %v3396_v59, 312  ;;  %3439 = vbcast.lane.b32.xlu0 %v3396_v59, 336 }
 0x45d   :  { %v7871_v32 = vpop.permute.xlu1 %2562  ;;  %v7873_v31 = vpop.permute.xlu0 %2571 }
 0x45e   :  { %10045 = vst [vmem:[#allocation79_spill] sm:$0xff] %v7871_v32  ;;  %10046 = vst [vmem:[#allocation76_spill] sm:$0xff] %v7873_v31  ;;  %3435 = vbcast.lane.b32.xlu1 %v3396_v59, 328  ;;  %3447 = vbcast.lane.b32.xlu0 %v3396_v59, 352 }
 0x461   :  { %v7875_v50 = vpop.permute.xlu1 %2568  ;;  %v7877_v14 = vpop.permute.xlu0 %2577 }
 0x462   :  { %10047 = vst [vmem:[#allocation61_spill] sm:$0xff] %v7875_v50  ;;  %10048 = vst [vmem:[#allocation64_spill] sm:$0xff] %v7877_v14  ;;  %3443 = vbcast.lane.b32.xlu1 %v3396_v59, 344  ;;  %3455 = vbcast.lane.b32.xlu0 %v3396_v59, 368 }
 0x465   :  { %v7879_v61 = vpop.permute.xlu1 %2574  ;;  %v7881_v54 = vpop.permute.xlu0 %2583 }
 0x466   :  { %10049 = vst [vmem:[#allocation81_spill] sm:$0xff] %v7879_v61  ;;  %10050 = vst [vmem:[#allocation78_spill] sm:$0xff] %v7881_v54  ;;  %3451 = vbcast.lane.b32.xlu1 %v3396_v59, 360 }
 0x469   :  { %v7883_v1 = vpop.permute.xlu1 %2580  ;;  %v7885_v7 = vpop.permute.xlu0 %2589 }
 0x46a   :  { %10051 = vst [vmem:[#allocation63_spill] sm:$0xff] %v7883_v1  ;;  %10052 = vst [vmem:[#allocation67_spill] sm:$0xff] %v7885_v7  ;;  %3459 = vbcast.lane.b32.xlu1 %v3396_v59, 376 }
 0x46d   :  { %v7887_v32 = vpop.permute.xlu1 %2586  ;;  %v7889_v31 = vpop.permute.xlu0 %2595 }
 0x46e   :  { %10053 = vst [vmem:[#allocation83_spill] sm:$0xff] %v7887_v32  ;;  %10054 = vst [vmem:[#allocation80_spill] sm:$0xff] %v7889_v31 }
 0x471   :  { %v7891_v22 = vpop.permute.xlu1 %2592  ;;  %v7893_v50 = vpop.permute.xlu0 %2601 }
 0x472   :  { %10055 = vst [vmem:[#allocation65_spill] sm:$0xff] %v7891_v22  ;;  %10056 = vst [vmem:[#allocation69_spill] sm:$0xff] %v7893_v50 }
 0x475   :  { %v7895_v14 = vpop.permute.xlu1 %2598  ;;  %v7897_v38 = vpop.permute.xlu0 %2607 }
 0x476   :  { %10057 = vst [vmem:[#allocation85_spill] sm:$0xff] %v7895_v14  ;;  %10058 = vst [vmem:[#allocation82_spill] sm:$0xff] %v7897_v38 }
 0x479   :  { %v7899_v61 = vpop.permute.xlu1 %2604  ;;  %v7901_v54 = vpop.permute.xlu0 %2613 }
 0x47a   :  { %10059 = vst [vmem:[#allocation68_spill] sm:$0xff] %v7899_v61  ;;  %10060 = vst [vmem:[#allocation71_spill] sm:$0xff] %v7901_v54 }
 0x47d   :  { %v7903_v1 = vpop.permute.xlu1 %2610  ;;  %v7905_v7 = vpop.permute.xlu0 %2619 }
 0x47e   :  { %10061 = vst [vmem:[#allocation87_spill] sm:$0xff] %v7903_v1  ;;  %10062 = vst [vmem:[#allocation84_spill] sm:$0xff] %v7905_v7  ;;  %v2727_v7 = vrot.slane %v7646_v28, %v7064_v17  ;;  %v2732_v28 = vrot.slane %v7644_v44, %v7068_v23 }
 0x481   :  { %v7907_v59 = vpop.permute.xlu1 %2616  ;;  %v7909_v32 = vpop.permute.xlu0 %2625 }
 0x482   :  { %10063 = vst [vmem:[#allocation70_spill] sm:$0xff] %v7907_v59 }
 0x485   :  { %v7911_v31 = vpop.permute.xlu1 %2622  ;;  %v7913_v22 = vpop.permute.xlu0 %2631 }
 0x486   :  { %10064 = vst [vmem:[#allocation73_spill] sm:$0xff] %v7911_v31  ;;  %10065 = vst [vmem:[#allocation89_spill] sm:$0xff] %v7913_v22  ;;  %v2723_v22 = vrot.slane %v7636_v0, %v7061_v24 }
 0x489   :  { %v7915_v50 = vpop.permute.xlu1 %2628  ;;  %v7917_v14 = vpop.permute.xlu0 %2637 }
 0x48a   :  { %10066 = vst [vmem:[#allocation86_spill] sm:$0xff] %v7917_v14  ;;  %v2806_v14 = vrot.slane %v7697_v27, %v7064_v17  ;;  %v2747_v27 = vrot.slane %v7659_v26, %v7084_v49 }
 0x48d   :  { %v7919_v38 = vpop.permute.xlu1 %2634  ;;  %v7921_v61 = vpop.permute.xlu0 %2643 }
 0x48e   :  { %10067 = vst [vmem:[#allocation66_spill] sm:$0xff] %v7919_v38  ;;  %10068 = vst [vmem:[#allocation59_spill] sm:$0xff] %v7921_v61  ;;  %v2728_v38 = vsel %vm1295_vm3, %v2727_v7, %v2723_v22  ;;  %v2737_v61 = vrot.slane %v7653_v5, %v7075_v20  ;;  %v2816_v7 = vrot.slane %v7703_v47, %v7075_v20 }
 0x48f   :  { %v2733_v22 = vsel %vm1302_vm4, %v2732_v28, %v2728_v38  ;;  %v2757_v47 = vrot.slane %v7665_v36, %v7102_v45  ;;  %v2821_v28 = vrot.slane %v7700_v62, %v7072_v6 }
 0x490   :  { %v2738_v44 = vsel %vm1309_vm5, %v2737_v61, %v2733_v22  ;;  %v2826_v61 = vrot.slane %v7709_v40, %v7084_v49  ;;  %v2895_v40 = vrot.slane %v7753_v37, %v7075_v20  ;;  %v2836_v37 = vrot.slane %v7715_v12, %v7102_v45 }
 0x491   :  { %v7923_v54 = vpop.permute.xlu1 %2640  ;;  %v7925_v1 = vpop.permute.xlu0 %2649 }
 0x492   :  { %10069 = vst [vmem:[#allocation17_spill] sm:$0xff] %v7923_v54  ;;  %10070 = vst [vmem:[#allocation19_spill] sm:$0xff] %v7925_v1  ;;  %v2742_v1 = vrot.slane %v7650_v51, %v7072_v6  ;;  %v2811_v51 = vrot.slane %v7694_v21, %v7068_v23 }
 0x495   :  { %v7929_v59 = vpop.permute.xlu1 %2646  ;;  %v7931_v31 = vpop.permute.xlu0 %2655 }
 0x496   :  { %10071 = vst [vmem:[#allocation21_spill] sm:$0xff] %v7931_v31  ;;  %v2802_v31 = vrot.slane %v7688_v63, %v7061_v24  ;;  %v2743_v63 = vsel %vm1316_vm6, %v2742_v1, %v2738_v44  ;;  %v2964_v1 = vrot.slane %v7797_v55, %v7064_v17 }
 0x497   :  { %v2748_v38 = vsel %vm9846_vm7, %v2747_v27, %v2743_v63  ;;  %v2969_v63 = vrot.slane %v7794_v39, %v7068_v23  ;;  %v10077_v39 = vld [vmem:[#allocation42_spill] sm:$0xff] }
 0x498   :  { %v2807_v5 = vsel %vm1295_vm3, %v2806_v14, %v2802_v31  ;;  %v2752_v31 = vrot.slane %v7656_v46, %v7078_v25  ;;  %v2762_v46 = vrot.slane %v7662_v30, %v7091_v10  ;;  %v2767_v30 = vrot.slane %v7671_v58, %v7119_v18 }
 0x499   :  { %v7940_v54 = vpop.permute.xlu1 %2652  ;;  %v7948_v0 = vpop.permute.xlu0 %2661  ;;  %v2812_v14 = vsel %vm1302_vm4, %v2811_v51, %v2807_v5  ;;  %v2831_v51 = vrot.slane %v7706_v42, %v7078_v25 }
 0x49a   :  { %10072 = vst [vmem:[#allocation18_spill] sm:$0xff] %v7940_v54  ;;  %10073 = vst [vmem:[#allocation20_spill] sm:$0xff] %v7948_v0  ;;  %v2885_v0 = vrot.slane %v7747_v35, %v7064_v17  ;;  %v2817_v21 = vsel %vm1309_vm5, %v2816_v7, %v2812_v14  ;;  %v2881_v35 = vrot.slane %v7738_v4, %v7061_v24 }
 0x49b   :  { %v2753_v27 = vsel %vm10074_vm15, %v2752_v31, %v2748_v38  ;;  %v2960_v4 = vrot.slane %v7788_v13, %v7061_v24  ;;  %v2822_v62 = vsel %vm1316_vm6, %v2821_v28, %v2817_v21  ;;  %v2890_v7 = vrot.slane %v7744_v2, %v7068_v23 }
 0x49c   :  { %v2886_v22 = vsel %vm1295_vm3, %v2885_v0, %v2881_v35  ;;  %v2758_v55 = vsel %vm10075_vm8, %v2757_v47, %v2753_v27  ;;  %v2827_v0 = vsel %vm9846_vm7, %v2826_v61, %v2822_v62  ;;  %v2974_v13 = vrot.slane %v7803_v19, %v7075_v20  ;;  %v10076_v47 = vld [vmem:[#allocation50_spill] sm:$0xff] }
 0x49d   :  { %v7959_v54 = vpop.permute.xlu1 %2658  ;;  %v7964_v26 = vpop.permute.xlu0 %2667  ;;  %v2965_v44 = vsel %vm1295_vm3, %v2964_v1, %v2960_v4  ;;  %v2891_v58 = vsel %vm1302_vm4, %v2890_v7, %v2886_v22  ;;  %v2772_v2 = vrot.slane %v7668_v60, %v7109_v16  ;;  %v2763_v12 = vsel %vm1344_vm10, %v2762_v46, %v2758_v55  ;;  %v10078_v1 = vld [vmem:[#allocation28_spill] sm:$0xff]  ;;  %v10081_v55 = vld [vmem:[#allocation35_spill] sm:$0xff] }
 0x49e   :  { %v2896_v38 = vsel %vm1309_vm5, %v2895_v40, %v2891_v58  ;;  %v2905_v19 = vrot.slane %v10076_v47, %v7084_v49  ;;  %v2768_v42 = vsel %vm1351_vm11, %v2767_v30, %v2763_v12  ;;  %v2832_v21 = vsel %vm10074_vm15, %v2831_v51, %v2827_v0  ;;  %v10079_v22 = vld [vmem:[#allocation92_spill] sm:$0xff]  ;;  %v10080_v40 = vld [vmem:[#allocation43_spill] sm:$0xff]  ;;  %v10084_v51 = vld [vmem:[#allocation45_spill] sm:$0xff] }
 0x49f   :  { %v2900_v61 = vrot.slane %v10077_v39, %v7072_v6  ;;  %v2970_v35 = vsel %vm1302_vm4, %v2969_v63, %v2965_v44  ;;  %v2837_v60 = vsel %vm10075_vm8, %v2836_v37, %v2832_v21  ;;  %v2846_v46 = vrot.slane %v10078_v1, %v7119_v18  ;;  %v10082_v37 = vld [vmem:[#allocation22_spill] sm:$0xff]  ;;  %v10085_v63 = vld [vmem:[#allocation48_spill] sm:$0xff]  ;;  %v10088_v1 = vld [vmem:[#allocation41_spill] sm:$0xff] }
 0x4a0   :  { %v2975_v28 = vsel %vm1309_vm5, %v2974_v13, %v2970_v35  ;;  %v2984_v27 = vrot.slane %v7809_v11, %v7084_v49  ;;  %v2777_v4 = vrot.slane %v10080_v40, %v10079_v22  ;;  %v2841_v30 = vrot.slane %v10081_v55, %v7091_v10  ;;  %v10083_v13 = vld [vmem:[#allocation90_spill] sm:$0xff]  ;;  %v10087_v21 = vld [vmem:[#allocation40_spill] sm:$0xff] }
 0x4a1   :  { %v7983_v36 = vpop.permute.xlu1 %2664  ;;  %v7991_v5 = vpop.permute.xlu0 %2673  ;;  %v2901_v62 = vsel %vm1316_vm6, %v2900_v61, %v2896_v38  ;;  %v2979_v7 = vrot.slane %v7800_v53, %v7072_v6  ;;  %v8042_v44 = vrot.slane %v10082_v37, %v7834_v34  ;;  %v2782_v11 = vrot.slane %v10084_v51, %v10083_v13 }
 0x4a2   :  { %v2906_v58 = vsel %vm9846_vm7, %v2905_v19, %v2901_v62  ;;  %v2915_v12 = vrot.slane %v10085_v63, %v7102_v45  ;;  %vm10086_vm15 = vcmask 720512   ;;  %v2842_v53 = vsel %vm1344_vm10, %v2841_v30, %v2837_v60  ;;  %v10093_v63 = vld [vmem:[#allocation94_spill] sm:$0xff] }
 0x4a3   :  { %v2773_v38 = vsel %vm10086_vm15, %v2772_v2, %v2768_v42  ;;  %v2910_v39 = vrot.slane %v10087_v21, %v7078_v25  ;;  %v2980_v61 = vsel %vm1316_vm6, %v2979_v7, %v2975_v28  ;;  %v2847_v35 = vsel %vm1351_vm11, %v2846_v46, %v2842_v53  ;;  %v10089_v2 = vld [vmem:[#allocation44_spill] sm:$0xff]  ;;  %v10091_v46 = vld [vmem:[#allocation93_spill] sm:$0xff]  ;;  %v10092_v7 = vld [vmem:[#allocation30_spill] sm:$0xff] }
 0x4a4   :  { %v2856_v40 = vrot.slane %v10088_v1, %v10079_v22  ;;  %v2985_v19 = vsel %vm9846_vm7, %v2984_v27, %v2980_v61  ;;  %v2994_v55 = vrot.slane %v7815_v29, %v7102_v45  ;;  %v2778_v62 = vsel %vm1365_vm13, %v2777_v4, %v2773_v38  ;;  %v10094_v27 = vld [vmem:[#allocation27_spill] sm:$0xff] }
 0x4a5   :  { %v8010_v31 = vpop.permute.xlu1 %2670  ;;  %v8018_v14 = vpop.permute.xlu0 %2679  ;;  %v2851_v42 = vrot.slane %v10089_v2, %v7109_v16  ;;  %vm10090_vm8 = vcmask 458112   ;;  %v2989_v28 = vrot.slane %v7806_v41, %v7078_v25  ;;  %v2792_v51 = vrot.slane %v10092_v7, %v10091_v46  ;;  %v10096_v4 = vld [vmem:[#allocation31_spill] sm:$0xff] }
 0x4a6   :  { %v2911_v60 = vsel %vm10090_vm8, %v2910_v39, %v2906_v58  ;;  %v2787_v53 = vrot.slane %v10094_v27, %v10093_v63  ;;  %vm10095_vm15 = vcmask 523712   ;;  %v2925_v38 = vrot.slane %v10096_v4, %v7119_v18  ;;  %v10098_v39 = vld [vmem:[#allocation33_spill] sm:$0xff] }
 0x4a7   :  { %v2916_v29 = vsel %vm10095_vm15, %v2915_v12, %v2911_v60  ;;  %v2852_v58 = vsel %vm10097_vm2, %v2851_v42, %v2847_v35  ;;  %v2920_v41 = vrot.slane %v10098_v39, %v7091_v10  ;;  %v2990_v61 = vsel %vm10090_vm8, %v2989_v28, %v2985_v19  ;;  %v10099_v27 = vld [vmem:[#allocation49_spill] sm:$0xff] }
 0x4a8   :  { %v3043_v1 = vrot.slane %v7851_v15, %v7064_v17  ;;  %v2783_v2 = vsel %vm1372_vm14, %v2782_v11, %v2778_v62  ;;  %v2857_v7 = vsel %vm1365_vm13, %v2856_v40, %v2852_v58  ;;  %v2995_v12 = vsel %vm10095_vm15, %v2994_v55, %v2990_v61  ;;  %v10101_v40 = vld [vmem:[#allocation32_spill] sm:$0xff]  ;;  %v10102_v62 = vld [vmem:[#allocation57_spill] sm:$0xff] }
 0x4a9   :  { %v8038_v0 = vpop.permute.xlu1 %2676  ;;  %v8049_v47 = vpop.permute.xlu0 %2685  ;;  %v3004_v60 = vrot.slane %v7821_v43, %v7119_v18  ;;  %v2866_v35 = vrot.slane %v10099_v27, %v10093_v63  ;;  %v2921_v42 = vsel %vm1344_vm10, %v2920_v41, %v2916_v29  ;;  %v2999_v19 = vrot.slane %v7812_v52, %v7091_v10  ;;  %v10103_v29 = vld [vmem:[#allocation53_spill] sm:$0xff] }
 0x4aa   :  { %v3039_v15 = vrot.slane %v7839_v9, %v7061_v24  ;;  %vm10100_vm2 = vcmask 917312   ;;  %v2861_v55 = vrot.slane %v10101_v40, %v10083_v13  ;;  %v2926_v43 = vsel %vm1351_vm11, %v2925_v38, %v2921_v42  ;;  %v10104_v27 = vld [vmem:[#allocation37_spill] sm:$0xff]  ;;  %v10109_v40 = vld [vmem:[#allocation54_spill] sm:$0xff] }
 0x4ab   :  { %v2788_v11 = vsel %vm10100_vm2, %v2787_v53, %v2783_v2  ;;  %v2935_v4 = vrot.slane %v10102_v62, %v10079_v22  ;;  %v2930_v52 = vrot.slane %v10103_v29, %v7109_v16  ;;  %v3000_v39 = vsel %vm1344_vm10, %v2999_v19, %v2995_v12  ;;  %vm10105_vm8 = vmmov %vm10100_vm2 }
 0x4ac   :  { %v3044_v9 = vsel %vm1295_vm3, %v3043_v1, %v3039_v15  ;;  %v3053_v53 = vrot.slane %v7855_v3, %v7075_v20  ;;  %v2862_v41 = vsel %vm1372_vm14, %v2861_v55, %v2857_v7  ;;  %v3005_v61 = vsel %vm1351_vm11, %v3004_v60, %v3000_v39  ;;  %v10107_v7 = vld [vmem:[#allocation36_spill] sm:$0xff]  ;;  %v10108_v60 = vld [vmem:[#allocation46_spill] sm:$0xff]  ;;  %v10112_v39 = vld [vmem:[#allocation39_spill] sm:$0xff] }
 0x4ad   :  { %v8068_v30 = vpop.permute.xlu1 %2682  ;;  %v8077_v21 = vpop.permute.xlu0 %2691  ;;  %v3014_v38 = vrot.slane %v7827_v57, %v10079_v22  ;;  %v3048_v2 = vrot.slane %v7848_v33, %v7068_v23  ;;  %v2871_v42 = vrot.slane %v10104_v27, %v10091_v46  ;;  %v2867_v12 = vsel %vm10105_vm8, %v2866_v35, %v2862_v41  ;;  %v10110_v35 = vld [vmem:[#allocation51_spill] sm:$0xff] }
 0x4ae   :  { %vm10106_vm15 = vcmask 720512   ;;  %v3009_v3 = vrot.slane %v7818_v48, %v7109_v16  ;;  %v2876_v15 = vrot.slane %v10108_v60, %v10107_v7  ;;  %v2945_v33 = vrot.slane %v10109_v40, %v10093_v63 }
 0x4af   :  { %v2931_v1 = vsel %vm10106_vm15, %v2930_v52, %v2926_v43  ;;  %v3049_v55 = vsel %vm1302_vm4, %v3048_v2, %v3044_v9  ;;  %v2940_v43 = vrot.slane %v10110_v35, %v10083_v13  ;;  %vm10111_vm2 = vmmov %vm10106_vm15  ;;  %v3063_v52 = vrot.slane %v7859_v56, %v7084_v49  ;;  %v10113_v2 = vld [vmem:[#allocation56_spill] sm:$0xff] }
 0x4b0   :  { %v2936_v57 = vsel %vm1365_vm13, %v2935_v4, %v2931_v1  ;;  %v3010_v29 = vsel %vm10111_vm2, %v3009_v3, %v3005_v61  ;;  %v3054_v48 = vsel %vm1309_vm5, %v3053_v53, %v3049_v55  ;;  %v2797_v4 = vrot.slane %v10112_v39, %v10107_v7  ;;  %v10114_v3 = vld [vmem:[#allocation72_spill] sm:$0xff]  ;;  %vm10118_vm15 = vmmov %vm10105_vm8 }
 0x4b1   :  { %v8097_v28 = vpop.permute.xlu1 %2688  ;;  %v8105_v58 = vpop.permute.xlu0 %2697  ;;  %v3015_v41 = vsel %vm1365_vm13, %v3014_v38, %v3010_v29  ;;  %v3024_v9 = vrot.slane %v7836_v8, %v10093_v63  ;;  %v3058_v27 = vrot.slane %v10113_v2, %v7072_v6  ;;  %v2793_v1 = vsel %vm1386_vm0, %v2792_v51, %v2788_v11  ;;  %v10115_v38 = vld [vmem:[#allocation75_spill] sm:$0xff]  ;;  %v10116_v51 = vld [vmem:[#allocation52_spill] sm:$0xff] }
 0x4b2   :  { %v2872_v61 = vsel %vm1386_vm0, %v2871_v42, %v2867_v12  ;;  %v2941_v53 = vsel %vm1372_vm14, %v2940_v43, %v2936_v57  ;;  %v3019_v56 = vrot.slane %v10114_v3, %v10083_v13  ;;  %v2950_v55 = vrot.slane %v10115_v38, %v10091_v46  ;;  %v10117_v57 = vld [vmem:[#allocation74_spill] sm:$0xff]  ;;  %v10125_v38 = vld [vmem:[#allocation64_spill] sm:$0xff] }
 0x4b3   :  { %v2877_v40 = vsel %vm1393_vm1, %v2876_v15, %v2872_v61  ;;  %v2946_v8 = vsel %vm10105_vm8, %v2945_v33, %v2941_v53  ;;  %v3059_v35 = vsel %vm1316_vm6, %v3058_v27, %v3054_v48  ;;  %v2955_v11 = vrot.slane %v10116_v51, %v10107_v7  ;;  %v10119_v33 = vld [vmem:[#allocation77_spill] sm:$0xff]  ;;  %v10120_v48 = vld [vmem:[#allocation63_spill] sm:$0xff] }
 0x4b4   :  { %v3020_v42 = vsel %vm1372_vm14, %v3019_v56, %v3015_v41  ;;  %v3064_v12 = vsel %vm9846_vm7, %v3063_v52, %v3059_v35  ;;  %v3073_v43 = vrot.slane %v10117_v57, %v7102_v45  ;;  %v2798_v15 = vsel %vm1393_vm1, %v2797_v4, %v2793_v1  ;;  %v10122_v52 = vld [vmem:[#allocation60_spill] sm:$0xff] }
 0x4b5   :  { %v8125_v19 = vpop.permute.xlu1 %2694  ;;  %v8133_v62 = vpop.permute.xlu0 %2703  ;;  %v3025_v39 = vsel %vm10118_vm15, %v3024_v9, %v3020_v42  ;;  %v3068_v2 = vrot.slane %v10119_v33, %v7078_v25  ;;  %v3122_v27 = vrot.slane %v10120_v48, %v7064_v17  ;;  %vm10121_vm2 = vcmask 1041409   ;;  %v10123_v9 = vld [vmem:[#allocation88_spill] sm:$0xff]  ;;  %v10128_v33 = vld [vmem:[#allocation83_spill] sm:$0xff] }
 0x4b6   :  { %v8175_v61 = vsel %vm10121_vm2, %v2877_v40, %v2798_v15  ;;  %v2951_v41 = vsel %vm1386_vm0, %v2950_v55, %v2946_v8  ;;  %v3029_v53 = vrot.slane %v10122_v52, %v10091_v46  ;;  %v3201_v3 = vrot.slane %v7915_v50, %v7064_v17 }
 0x4b7   :  { %v3034_v1 = vrot.slane %v10123_v9, %v10107_v7  ;;  %vm10124_vm8 = vcmask 458112   ;;  %v3118_v35 = vrot.slane %v10125_v38, %v7061_v24  ;;  %v3280_v40 = vrot.slane %v8038_v0, %v7064_v17  ;;  %v10132_v9 = vld [vmem:[#allocation89_spill] sm:$0xff] }
 0x4b8   :  { %v3069_v56 = vsel %vm10124_vm8, %v3068_v2, %v3064_v12  ;;  %v8194_v8 = vsel %vm1393_vm1, %v2955_v11, %v2951_v41  ;;  %v3030_v50 = vsel %vm1386_vm0, %v3029_v53, %v3025_v39  ;;  %vm10126_vm15 = vcmask 523712   ;;  %v10127_v12 = vld [vmem:[#allocation58_spill] sm:$0xff]  ;;  %v10129_v11 = vld [vmem:[#allocation55_spill] sm:$0xff] }
 0x4b9   :  { %v8153_v60 = vpop.permute.xlu1 %2700  ;;  %v8160_v29 = vpop.permute.xlu0 %2709  ;;  %v3074_v51 = vsel %vm10126_vm15, %v3073_v43, %v3069_v56  ;;  %v3197_v42 = vrot.slane %v7909_v32, %v7061_v24  ;;  %v3083_v57 = vrot.slane %v10127_v12, %v7119_v18  ;;  %v3123_v15 = vsel %vm1295_vm3, %v3122_v27, %v3118_v35  ;;  %v10130_v39 = vld [vmem:[#allocation78_spill] sm:$0xff] }
 0x4ba   :  { %v3132_v0 = vrot.slane %v10128_v33, %v7075_v20  ;;  %v3276_v2 = vrot.slane %v7991_v5, %v7061_v24  ;;  %v3078_v48 = vrot.slane %v10129_v11, %v7091_v10  ;;  %v3127_v43 = vrot.slane %v10130_v39, %v7068_v23  ;;  %v10131_v32 = vld [vmem:[#allocation66_spill] sm:$0xff]  ;;  %v10134_v11 = vld [vmem:[#allocation67_spill] sm:$0xff] }
 0x4bb   :  { %v3202_v41 = vsel %vm1295_vm3, %v3201_v3, %v3197_v42  ;;  %v3211_v52 = vrot.slane %v10131_v32, %v7075_v20  ;;  %v8217_v27 = vsel %vm1393_vm1, %v3034_v1, %v3030_v50  ;;  %v3206_v56 = vrot.slane %v10132_v9, %v7068_v23  ;;  %v10137_v32 = vld [vmem:[#allocation86_spill] sm:$0xff] }
 0x4bc   :  { %v3281_v5 = vsel %vm1295_vm3, %v3280_v40, %v3276_v2  ;;  %v3290_v38 = vrot.slane %v8068_v30, %v7075_v20  ;;  %v3079_v3 = vsel %vm1344_vm10, %v3078_v48, %v3074_v51  ;;  %v3128_v42 = vsel %vm1302_vm4, %v3127_v43, %v3123_v15  ;;  %v10133_v40 = vld [vmem:[#allocation65_spill] sm:$0xff] }
 0x4bd   :  { %v8182_v4 = vpop.permute.xlu1 %2706  ;;  %v8191_v55 = vpop.permute.xlu0 %2715  ;;  %v3285_v12 = vrot.slane %v8018_v14, %v7068_v23  ;;  %v3084_v50 = vsel %vm1351_vm11, %v3083_v57, %v3079_v3  ;;  %v3133_v33 = vsel %vm1309_vm5, %v3132_v0, %v3128_v42  ;;  %v3142_v2 = vrot.slane %v10133_v40, %v7084_v49  ;;  %v10135_v48 = vld [vmem:[#allocation17_spill] sm:$0xff]  ;;  %v10136_v57 = vld [vmem:[#allocation91_spill] sm:$0xff]  ;;  %v10138_v3 = vld [vmem:[#allocation62_spill] sm:$0xff] }
 0x4be   :  { %v3207_v30 = vsel %vm1302_vm4, %v3206_v56, %v3202_v41  ;;  %v3137_v51 = vrot.slane %v10134_v11, %v7072_v6  ;;  %v3221_v14 = vrot.slane %v10135_v48, %v7084_v49  ;;  %v3088_v0 = vrot.slane %v10136_v57, %v7109_v16  ;;  %v10141_v48 = vld [vmem:[#allocation80_spill] sm:$0xff] }
 0x4bf   :  { %v3212_v15 = vsel %vm1309_vm5, %v3211_v52, %v3207_v30  ;;  %v3286_v39 = vsel %vm1302_vm4, %v3285_v12, %v3281_v5  ;;  %v3216_v9 = vrot.slane %v10137_v32, %v7072_v6  ;;  %v3300_v56 = vrot.slane %v8097_v28, %v7084_v49  ;;  %v10140_v30 = vld [vmem:[#allocation85_spill] sm:$0xff] }
 0x4c0   :  { %v3291_v41 = vsel %vm1309_vm5, %v3290_v38, %v3286_v39  ;;  %v3098_v42 = vrot.slane %v10138_v3, %v10083_v13  ;;  %v3138_v5 = vsel %vm1316_vm6, %v3137_v51, %v3133_v33  ;;  %v3295_v12 = vrot.slane %v8049_v47, %v7072_v6 }
 0x4c1   :  { %v8214_v53 = vpop.permute.xlu1 %2712  ;;  %v8224_v35 = vpop.permute.xlu0 %3399  ;;  %vm10139_vm2 = vcmask 720512   ;;  %v3143_v38 = vsel %vm9846_vm7, %v3142_v2, %v3138_v5  ;;  %v3152_v28 = vrot.slane %v10140_v30, %v7102_v45  ;;  %v3217_v11 = vsel %vm1316_vm6, %v3216_v9, %v3212_v15 }
 0x4c2   :  { %v3477_v1 = vmul.f32 %v8224_v35, %v8042_v44  ;;  %v3089_v40 = vsel %vm10139_vm2, %v3088_v0, %v3084_v50  ;;  %v3147_v39 = vrot.slane %v10141_v48, %v7078_v25  ;;  %v3222_v33 = vsel %vm9846_vm7, %v3221_v14, %v3217_v11  ;;  %v10142_v50 = vld [vmem:[#allocation59_spill] sm:$0xff]  ;;  %vm10146_vm2 = vmmov %vm10124_vm8  ;;  %v10147_v48 = vld [vmem:[#allocation69_spill] sm:$0xff] }
 0x4c3   :  { %v3231_v47 = vrot.slane %v7929_v59, %v7102_v45  ;;  %v3296_v51 = vsel %vm1316_vm6, %v3295_v12, %v3291_v41  ;;  %v3226_v2 = vrot.slane %v10142_v50, %v7078_v25  ;;  %v3310_v15 = vrot.slane %v8125_v19, %v7102_v45  ;;  %v10143_v59 = vld [vmem:[#allocation79_spill] sm:$0xff] }
 0x4c4   :  { %3734 = vperm.xlu0 %6266, %v3477_v1   ;;  %v3301_v0 = vsel %vm9846_vm7, %v3300_v56, %v3296_v51  ;;  %v3093_v9 = vrot.slane %v10143_v59, %v10079_v22  ;;  %v3148_v41 = vsel %vm10124_vm8, %v3147_v39, %v3143_v38  ;;  %v3305_v3 = vrot.slane %v8077_v21, %v7078_v25  ;;  %v10144_v56 = vld [vmem:[#allocation76_spill] sm:$0xff]  ;;  %vm10148_vm8 = vmmov %vm10126_vm15  ;;  %v10149_v21 = vld [vmem:[#allocation18_spill] sm:$0xff] }
 0x4c5   :  { %v8243_v43 = vpop.permute.xlu1 %2718  ;;  %v8252_v52 = vpop.permute.xlu0 %3407  ;;  %v3108_v12 = vrot.slane %v10144_v56, %v10091_v46  ;;  %v3153_v19 = vsel %vm10126_vm15, %v3152_v28, %v3148_v41  ;;  %v3227_v11 = vsel %vm10146_vm2, %v3226_v2, %v3222_v33  ;;  %v3157_v38 = vrot.slane %v10147_v48, %v7091_v10  ;;  %vm10150_vm7 = vmmov %vm10146_vm2  ;;  %v10151_v28 = vld [vmem:[#allocation19_spill] sm:$0xff] }
 0x4c6   :  { %v3479_v1 = vmul.f32 %v8252_v52, %v8042_v44  ;;  %v3232_v39 = vsel %vm10148_vm8, %v3231_v47, %v3227_v11  ;;  %v3241_v51 = vrot.slane %v10149_v21, %v7119_v18  ;;  %v3306_v50 = vsel %vm10150_vm7, %v3305_v3, %v3301_v0  ;;  %vm10152_vm15 = vmmov %vm10148_vm8  ;;  %v10154_v11 = vld [vmem:[#allocation87_spill] sm:$0xff] }
 0x4c7   :  { %v3236_v41 = vrot.slane %v10151_v28, %v7091_v10  ;;  %v3311_v56 = vsel %vm10152_vm15, %v3310_v15, %v3306_v50  ;;  %v3320_v33 = vrot.slane %v8153_v60, %v7119_v18  ;;  %v3158_v0 = vsel %vm1344_vm10, %v3157_v38, %v3153_v19  ;;  %v10153_v15 = vld [vmem:[#allocation61_spill] sm:$0xff] }
 0x4c8   :  { %3740 = vperm.xlu0 %6266, %v3479_v1   ;;  %v10145_v1 = vld [vmem:[#allocation68_spill] sm:$0xff]  ;;  %v3315_v3 = vrot.slane %v8105_v58, %v7091_v10  ;;  %v3172_v48 = vrot.slane %v10154_v11, %v10079_v22  ;;  %v3251_v58 = vrot.slane %v7959_v54, %v10079_v22  ;;  %vm10157_vm7 = vcmask 720512  }
 0x4c9   :  { %v8272_v57 = vpop.permute.xlu1 %3403  ;;  %v8279_v32 = vpop.permute.xlu0 %3415  ;;  %v3162_v30 = vrot.slane %v10145_v1, %v7119_v18  ;;  %v3103_v1 = vrot.slane %v10153_v15, %v10093_v63  ;;  %v3237_v21 = vsel %vm1344_vm10, %v3236_v41, %v3232_v39  ;;  %v3330_v39 = vrot.slane %v8182_v4, %v10079_v22  ;;  %v10159_v4 = vld [vmem:[#allocation70_spill] sm:$0xff]  ;;  %vm10160_vm8 = vmmov %vm10157_vm7 }
 0x4ca   :  { %v3478_v14 = vmul.f32 %v8272_v57, %v8042_v44  ;;  %v3481_v5 = vmul.f32 %v8279_v32, %v8042_v44  ;;  %v3242_v19 = vsel %vm1351_vm11, %v3241_v51, %v3237_v21  ;;  %v3316_v38 = vsel %vm1344_vm10, %v3315_v3, %v3311_v56  ;;  %vm10162_vm15 = vmmov %vm10157_vm7 }
 0x4cb   :  { %v3163_v60 = vsel %vm1351_vm11, %v3162_v30, %v3158_v0  ;;  %v10156_v30 = vld [vmem:[#allocation21_spill] sm:$0xff]  ;;  %v3321_v0 = vsel %vm1351_vm11, %v3320_v33, %v3316_v38  ;;  %vm10158_vm2 = vcmask 917312   ;;  %v3182_v15 = vrot.slane %v10159_v4, %v10093_v63 }
 0x4cc   :  { %3737 = vperm.xlu1 %6265, %v3478_v14   ;;  %3746 = vperm.xlu0 %6266, %v3481_v5   ;;  %v3094_v14 = vsel %vm1365_vm13, %v3093_v9, %v3089_v40  ;;  %v10155_v40 = vld [vmem:[#allocation82_spill] sm:$0xff]  ;;  %v3246_v28 = vrot.slane %v10156_v30, %v7109_v16 }
 0x4cd   :  { %v8302_v59 = vpop.permute.xlu1 %3411  ;;  %v8309_v2 = vpop.permute.xlu0 %3423  ;;  %v3167_v9 = vrot.slane %v10155_v40, %v7109_v16  ;;  %v3099_v54 = vsel %vm1372_vm14, %v3098_v42, %v3094_v14  ;;  %v10161_v42 = vld [vmem:[#allocation71_spill] sm:$0xff] }
 0x4ce   :  { %v3480_v47 = vmul.f32 %v8302_v59, %v8042_v44  ;;  %v3483_v5 = vmul.f32 %v8309_v2, %v8042_v44  ;;  %v3104_v33 = vsel %vm10158_vm2, %v3103_v1, %v3099_v54  ;;  %v3247_v11 = vsel %vm10160_vm8, %v3246_v28, %v3242_v19  ;;  %v10166_v54 = vld [vmem:[#allocation73_spill] sm:$0xff]  ;;  %vm10168_vm8 = vmmov %vm10158_vm2 }
 0x4cf   :  { %v3168_v56 = vsel %vm10157_vm7, %v3167_v9, %v3163_v60  ;;  %v3177_v14 = vrot.slane %v10161_v42, %v10083_v13  ;;  %v3252_v60 = vsel %vm1365_vm13, %v3251_v58, %v3247_v11  ;;  %v3340_v19 = vrot.slane %v8214_v53, %v10093_v63  ;;  %vm10165_vm7 = vmmov %vm10158_vm2 }
 0x4d0   :  { %3743 = vperm.xlu1 %6265, %v3480_v47   ;;  %3752 = vperm.xlu0 %6266, %v3483_v5   ;;  %v3325_v47 = vrot.slane %v8133_v62, %v7109_v16  ;;  %v3173_v5 = vsel %vm1365_vm13, %v3172_v48, %v3168_v56  ;;  %v3261_v62 = vrot.slane %v7983_v36, %v10093_v63  ;;  %v10163_v48 = vld [vmem:[#allocation20_spill] sm:$0xff]  ;;  %v10164_v36 = vld [vmem:[#allocation81_spill] sm:$0xff] }
 0x4d1   :  { %v8331_v50 = vpop.permute.xlu1 %3419  ;;  %v8338_v41 = vpop.permute.xlu0 %3431  ;;  %v3256_v40 = vrot.slane %v10163_v48, %v10083_v13  ;;  %v3113_v30 = vrot.slane %v10164_v36, %v10107_v7  ;;  %v3178_v28 = vsel %vm1372_vm14, %v3177_v14, %v3173_v5  ;;  %v3192_v56 = vrot.slane %v10166_v54, %v10107_v7 }
 0x4d2   :  { %v3482_v51 = vmul.f32 %v8331_v50, %v8042_v44  ;;  %v3485_v3 = vmul.f32 %v8338_v41, %v8042_v44  ;;  %v3326_v21 = vsel %vm10162_vm15, %v3325_v47, %v3321_v0  ;;  %v3335_v0 = vrot.slane %v8160_v29, %v10083_v13 }
 0x4d3   :  { %v3331_v9 = vsel %vm1365_vm13, %v3330_v39, %v3326_v21  ;;  %v3109_v39 = vsel %vm1386_vm0, %v3108_v12, %v3104_v33  ;;  %v3183_v53 = vsel %vm10165_vm7, %v3182_v15, %v3178_v28  ;;  %v3257_v47 = vsel %vm1372_vm14, %v3256_v40, %v3252_v60 }
 0x4d4   :  { %3749 = vperm.xlu1 %6265, %v3482_v51   ;;  %3758 = vperm.xlu0 %6266, %v3485_v3   ;;  %v10167_v3 = vld [vmem:[#allocation84_spill] sm:$0xff]  ;;  %v3262_v5 = vsel %vm10158_vm2, %v3261_v62, %v3257_v47  ;;  %v3271_v29 = vrot.slane %v8010_v31, %v10107_v7  ;;  %v3336_v11 = vsel %vm1372_vm14, %v3335_v0, %v3331_v9  ;;  %vm10169_vm15 = vcmask 1042434  }
 0x4d5   :  { %v8359_v1 = vpop.permute.xlu1 %3427  ;;  %v8366_v38 = vpop.permute.xlu0 %3439  ;;  %v3187_v4 = vrot.slane %v10167_v3, %v10091_v46  ;;  %v3266_v33 = vrot.slane %v7964_v26, %v10091_v46  ;;  %v3341_v15 = vsel %vm10168_vm8, %v3340_v19, %v3336_v11  ;;  %v3350_v42 = vrot.slane %v8243_v43, %v10107_v7  ;;  %v10174_v3 = vld [vmem:[#allocation34_spill] sm:$0xff] }
 0x4d6   :  { %v3484_v58 = vmul.f32 %v8359_v1, %v8042_v44  ;;  %v3487_v51 = vmul.f32 %v8366_v38, %v8042_v44  ;;  %v3114_v31 = vsel %vm1393_vm1, %v3113_v30, %v3109_v39  ;;  %v3345_v21 = vrot.slane %v8191_v55, %v10091_v46 }
 0x4d7   :  { %v3188_v62 = vsel %vm1386_vm0, %v3187_v4, %v3183_v53  ;;  %v3353_v48 = vsel %vm10169_vm15, %v8194_v8, %v8175_v61  ;;  %v3267_v40 = vsel %vm1386_vm0, %v3266_v33, %v3262_v5  ;;  %vm10170_vm7 = vcmask 1045509  }
 0x4d8   :  { %3755 = vperm.xlu1 %6265, %v3484_v58   ;;  %3764 = vperm.xlu0 %6266, %v3487_v51   ;;  %v3193_v43 = vsel %vm1393_vm1, %v3192_v56, %v3188_v62  ;;  %v3354_v9 = vsel %vm1952_vm12, %v8217_v27, %v3353_v48  ;;  %v3272_v19 = vsel %vm1393_vm1, %v3271_v29, %v3267_v40  ;;  %vm10171_vm2 = vcmask 1046534   ;;  %v10172_v51 = vld [vmem:[#allocation23_spill] sm:$0xff] }
 0x4d9   :  { %v8388_v12 = vpop.permute.xlu1 %3435  ;;  %v8395_v14 = vpop.permute.xlu0 %3447  ;;  %v3346_v58 = vsel %vm1386_vm0, %v3345_v21, %v3341_v15  ;;  %v3355_v36 = vsel %vm1954_vm9, %v3114_v31, %v3354_v9  ;;  %v3368_v39 = vrot.slane %v10172_v51, %v7834_v34  ;;  %vm10173_vm8 = vcmask 1047559   ;;  %v10176_v9 = vld [vmem:[#allocation24_spill] sm:$0xff] }
 0x4da   :  { %v3486_v60 = vmul.f32 %v8388_v12, %v8042_v44  ;;  %v3489_v26 = vmul.f32 %v8395_v14, %v8042_v44  ;;  %v3351_v30 = vsel %vm1393_vm1, %v3350_v42, %v3346_v58  ;;  %v3356_v28 = vsel %vm10170_vm7, %v3193_v43, %v3355_v36 }
 0x4db   :  { %v3357_v0 = vsel %vm10171_vm2, %v3272_v19, %v3356_v28  ;;  %v3493_v47 = vmul.f32 %v8224_v35, %v3368_v39  ;;  %v3495_v11 = vmul.f32 %v8252_v52, %v3368_v39  ;;  %v3494_v33 = vmul.f32 %v8272_v57, %v3368_v39 }
 0x4dc   :  { %3761 = vperm.xlu1 %6265, %v3486_v60   ;;  %3770 = vperm.xlu0 %6266, %v3489_v26   ;;  %v3358_v53 = vsel %vm10173_vm8, %v3351_v30, %v3357_v0  ;;  %v3497_v15 = vmul.f32 %v8279_v32, %v3368_v39  ;;  %v3496_v42 = vmul.f32 %v8302_v59, %v3368_v39  ;;  %vm10245_vm15 = vcmask 392512  }
 0x4dd   :  { %v8414_v55 = vpop.permute.xlu1 %3443  ;;  %v8418_v61 = vpop.permute.xlu0 %3455  ;;  %v8435_v4 = vadd.f32 %v3358_v53, %v10174_v3  ;;  %v3499_v60 = vmul.f32 %v8309_v2, %v3368_v39  ;;  %v3498_v31 = vmul.f32 %v8331_v50, %v3368_v39  ;;  %v3500_v62 = vmul.f32 %v8359_v1, %v3368_v39  ;;  %vm10248_vm8 = vmmov %vm10245_vm15 }
 0x4de   :  { %v3488_v8 = vmul.f32 %v8414_v55, %v8042_v44  ;;  %v3491_v27 = vmul.f32 %v8418_v61, %v8042_v44  ;;  %v3503_v21 = vmul.f32 %v8366_v38, %v3368_v39  ;;  %v3502_v26 = vmul.f32 %v8388_v12, %v3368_v39 }
 0x4df   :  { %10175 = vst [vmem:[#allocation50_spill] sm:$0xff] %v8435_v4  ;;  %v3505_v48 = vmul.f32 %v8395_v14, %v3368_v39  ;;  %v3504_v43 = vmul.f32 %v8414_v55, %v3368_v39  ;;  %v3507_v40 = vmul.f32 %v8418_v61, %v3368_v39  ;;  %v3372_v19 = vrot.slane %v10176_v9, %v7834_v34 }
 0x4e0   :  { %3767 = vperm.xlu1 %6265, %v3488_v8   ;;  %3776 = vperm.xlu0 %6266, %v3491_v27   ;;  %vm10246_vm7 = vcmask 458112   ;;  %vm10247_vm2 = vcmask 523712  }
 0x4e1   :  { %v8429_v54 = vpop.permute.xlu1 %3451  ;;  %v3509_v36 = vmul.f32 %v8224_v35, %v3372_v19  ;;  %v3511_v8 = vmul.f32 %v8252_v52, %v3372_v19  ;;  %v3510_v28 = vmul.f32 %v8272_v57, %v3372_v19  ;;  %v3513_v27 = vmul.f32 %v8279_v32, %v3372_v19 }
 0x4e2   :  { %v3490_v56 = vmul.f32 %v8429_v54, %v8042_v44  ;;  %v3506_v58 = vmul.f32 %v8429_v54, %v3368_v39  ;;  %v3512_v0 = vmul.f32 %v8302_v59, %v3372_v19  ;;  %v3515_v53 = vmul.f32 %v8309_v2, %v3372_v19 }
 0x4e3   :  { %v3519_v3 = vmul.f32 %v8366_v38, %v3372_v19 }
 0x4e4   :  { %3773 = vperm.xlu1 %6265, %v3490_v56   ;;  %3782 = vperm.xlu0 %6266, %v3493_v47   ;;  %v3514_v56 = vmul.f32 %v8331_v50, %v3372_v19  ;;  %v3516_v47 = vmul.f32 %v8359_v1, %v3372_v19 }
 0x4e5   :  { %v8437_v5 = vpop.permute.xlu1 %3459 }
 0x4e6   :  { %v3492_v29 = vmul.f32 %v8437_v5, %v8042_v44  ;;  %v3501_v44 = vmul.f32 %v8338_v41, %v3368_v39  ;;  %v3508_v30 = vmul.f32 %v8437_v5, %v3368_v39  ;;  %v3517_v39 = vmul.f32 %v8338_v41, %v3372_v19 }
 0x4e8   :  { %3779 = vperm.xlu1 %6265, %v3492_v29   ;;  %3788 = vperm.xlu0 %6266, %v3495_v11   ;;  %v3518_v29 = vmul.f32 %v8388_v12, %v3372_v19  ;;  %v3521_v11 = vmul.f32 %v8395_v14, %v3372_v19 }
 0x4ec   :  { %3785 = vperm.xlu1 %6265, %v3494_v33   ;;  %3794 = vperm.xlu0 %6266, %v3497_v15   ;;  %v3520_v33 = vmul.f32 %v8414_v55, %v3372_v19  ;;  %v3523_v15 = vmul.f32 %v8418_v61, %v3372_v19 }
 0x4f0   :  { %3791 = vperm.xlu1 %6265, %v3496_v42   ;;  %3800 = vperm.xlu0 %6266, %v3499_v60   ;;  %v10177_v42 = vld [vmem:[#allocation25_spill] sm:$0xff] }
 0x4f1   :  { %v3376_v60 = vrot.slane %v10177_v42, %v7834_v34 }
 0x4f4   :  { %3797 = vperm.xlu1 %6265, %v3498_v31   ;;  %3806 = vperm.xlu0 %6266, %v3501_v44   ;;  %v3522_v31 = vmul.f32 %v8429_v54, %v3372_v19  ;;  %v3525_v44 = vmul.f32 %v8224_v35, %v3376_v60 }
 0x4f8   :  { %3803 = vperm.xlu1 %6265, %v3500_v62   ;;  %3812 = vperm.xlu0 %6266, %v3503_v21   ;;  %v3524_v62 = vmul.f32 %v8437_v5, %v3372_v19  ;;  %v3527_v21 = vmul.f32 %v8252_v52, %v3376_v60  ;;  %v3533_v19 = vmul.f32 %v8338_v41, %v3376_v60 }
 0x4fc   :  { %3809 = vperm.xlu1 %6265, %v3502_v26   ;;  %3818 = vperm.xlu0 %6266, %v3505_v48   ;;  %v3526_v26 = vmul.f32 %v8272_v57, %v3376_v60  ;;  %v3529_v48 = vmul.f32 %v8279_v32, %v3376_v60 }
 0x500   :  { %3815 = vperm.xlu1 %6265, %v3504_v43   ;;  %3824 = vperm.xlu0 %6266, %v3507_v40   ;;  %v3528_v43 = vmul.f32 %v8302_v59, %v3376_v60  ;;  %v3531_v40 = vmul.f32 %v8309_v2, %v3376_v60 }
 0x504   :  { %3821 = vperm.xlu1 %6265, %v3506_v58   ;;  %3830 = vperm.xlu0 %6266, %v3509_v36   ;;  %v3530_v58 = vmul.f32 %v8331_v50, %v3376_v60  ;;  %v3532_v36 = vmul.f32 %v8359_v1, %v3376_v60 }
 0x508   :  { %3827 = vperm.xlu1 %6265, %v3508_v30   ;;  %3836 = vperm.xlu0 %6266, %v3511_v8   ;;  %v3535_v30 = vmul.f32 %v8366_v38, %v3376_v60  ;;  %v3534_v8 = vmul.f32 %v8388_v12, %v3376_v60 }
 0x50c   :  { %3833 = vperm.xlu1 %6265, %v3510_v28   ;;  %3842 = vperm.xlu0 %6266, %v3513_v27   ;;  %v3537_v28 = vmul.f32 %v8395_v14, %v3376_v60  ;;  %v3536_v27 = vmul.f32 %v8414_v55, %v3376_v60 }
 0x510   :  { %3839 = vperm.xlu1 %6265, %v3512_v0   ;;  %3848 = vperm.xlu0 %6266, %v3515_v53   ;;  %v3539_v0 = vmul.f32 %v8418_v61, %v3376_v60 }
 0x514   :  { %3845 = vperm.xlu1 %6265, %v3514_v56   ;;  %3854 = vperm.xlu0 %6266, %v3517_v39   ;;  %v10178_v56 = vld [vmem:[#allocation26_spill] sm:$0xff] }
 0x515   :  { %v3380_v39 = vrot.slane %v10178_v56, %v7834_v34 }
 0x517   :  { %v3556_v56 = vmul.f32 %v8437_v5, %v3380_v39 }
 0x518   :  { %3851 = vperm.xlu1 %6265, %v3516_v47   ;;  %3860 = vperm.xlu0 %6266, %v3519_v3   ;;  %v3538_v47 = vmul.f32 %v8429_v54, %v3376_v60  ;;  %v3541_v3 = vmul.f32 %v8224_v35, %v3380_v39 }
 0x51c   :  { %3857 = vperm.xlu1 %6265, %v3518_v29   ;;  %3866 = vperm.xlu0 %6266, %v3521_v11   ;;  %v3540_v11 = vmul.f32 %v8437_v5, %v3376_v60  ;;  %v3544_v60 = vmul.f32 %v8302_v59, %v3380_v39 }
 0x520   :  { %3863 = vperm.xlu1 %6265, %v3520_v33   ;;  %3872 = vperm.xlu0 %6266, %v3523_v15   ;;  %v3543_v15 = vmul.f32 %v8252_v52, %v3380_v39 }
 0x524   :  { %3869 = vperm.xlu1 %6265, %v3522_v31   ;;  %3878 = vperm.xlu0 %6266, %v3525_v44   ;;  %v3542_v44 = vmul.f32 %v8272_v57, %v3380_v39 }
 0x528   :  { %3875 = vperm.xlu1 %6265, %v3524_v62   ;;  %3884 = vperm.xlu0 %6266, %v3527_v21   ;;  %v3545_v21 = vmul.f32 %v8279_v32, %v3380_v39 }
 0x52c   :  { %3881 = vperm.xlu1 %6265, %v3526_v26   ;;  %3890 = vperm.xlu0 %6266, %v3529_v48  }
 0x530   :  { %3887 = vperm.xlu1 %6265, %v3528_v43   ;;  %3896 = vperm.xlu0 %6266, %v3531_v40   ;;  %v3547_v43 = vmul.f32 %v8309_v2, %v3380_v39 }
 0x534   :  { %3893 = vperm.xlu1 %6265, %v3530_v58   ;;  %3902 = vperm.xlu0 %6266, %v3533_v19   ;;  %v3546_v58 = vmul.f32 %v8331_v50, %v3380_v39 }
 0x538   :  { %3899 = vperm.xlu1 %6265, %v3532_v36   ;;  %3908 = vperm.xlu0 %6266, %v3535_v30   ;;  %v3549_v36 = vmul.f32 %v8338_v41, %v3380_v39 }
 0x53c   :  { %3905 = vperm.xlu1 %6265, %v3534_v8   ;;  %3914 = vperm.xlu0 %6266, %v3537_v28   ;;  %v3548_v8 = vmul.f32 %v8359_v1, %v3380_v39 }
 0x53f   :  { %v8490_v53 = vpop.permute.xlu0 %3734 }
 0x540   :  { %3911 = vperm.xlu1 %6265, %v3536_v27   ;;  %3920 = vperm.xlu0 %6266, %v3539_v0   ;;  %v3551_v27 = vmul.f32 %v8366_v38, %v3380_v39 }
 0x543   :  { %v8496_v29 = vpop.permute.xlu0 %3740 }
 0x544   :  { %3917 = vperm.xlu1 %6265, %v3538_v47   ;;  %3926 = vperm.xlu0 %6266, %v3541_v3   ;;  %v3550_v47 = vmul.f32 %v8388_v12, %v3380_v39 }
 0x547   :  { %v8499_v33 = vpop.permute.xlu1 %3737  ;;  %v8502_v31 = vpop.permute.xlu0 %3746 }
 0x548   :  { %3923 = vperm.xlu1 %6265, %v3540_v11   ;;  %3932 = vperm.xlu0 %6266, %v3543_v15   ;;  %v3553_v11 = vmul.f32 %v8395_v14, %v3380_v39 }
 0x54b   :  { %v8505_v62 = vpop.permute.xlu1 %3743  ;;  %v8508_v26 = vpop.permute.xlu0 %3752 }
 0x54c   :  { %3929 = vperm.xlu1 %6265, %v3542_v44   ;;  %3938 = vperm.xlu0 %6266, %v3545_v21   ;;  %v3552_v44 = vmul.f32 %v8414_v55, %v3380_v39 }
 0x54f   :  { %v8511_v48 = vpop.permute.xlu1 %3749  ;;  %v8514_v40 = vpop.permute.xlu0 %3758 }
 0x550   :  { %3935 = vperm.xlu1 %6265, %v3544_v60   ;;  %3944 = vperm.xlu0 %6266, %v3547_v43   ;;  %v3555_v60 = vmul.f32 %v8418_v61, %v3380_v39 }
 0x553   :  { %v8517_v19 = vpop.permute.xlu1 %3755  ;;  %v8520_v30 = vpop.permute.xlu0 %3764 }
 0x554   :  { %3941 = vperm.xlu1 %6265, %v3546_v58   ;;  %3950 = vperm.xlu0 %6266, %v3549_v36   ;;  %v10183_v58 = vld [vmem:[#allocation29_spill] sm:$0xff] }
 0x555   :  { %v3384_v36 = vrot.slane %v10183_v58, %v7834_v34 }
 0x557   :  { %v8523_v28 = vpop.permute.xlu1 %3761  ;;  %v8526_v0 = vpop.permute.xlu0 %3770  ;;  %v3561_v4 = vmul.f32 %v8279_v32, %v3384_v36  ;;  %v3565_v7 = vmul.f32 %v8338_v41, %v3384_v36  ;;  %v3567_v63 = vmul.f32 %v8366_v38, %v3384_v36  ;;  %v3569_v46 = vmul.f32 %v8395_v14, %v3384_v36 }
 0x558   :  { %10179 = vst [vmem:[#allocation42_spill] sm:$0xff] %v8526_v0  ;;  %3947 = vperm.xlu1 %6265, %v3548_v8   ;;  %3956 = vperm.xlu0 %6266, %v3551_v27   ;;  %v3554_v8 = vmul.f32 %v8429_v54, %v3380_v39  ;;  %v3560_v39 = vmul.f32 %v8302_v59, %v3384_v36 }
 0x55b   :  { %v8529_v3 = vpop.permute.xlu1 %3767  ;;  %v8532_v15 = vpop.permute.xlu0 %3776 }
 0x55c   :  { %10180 = vst [vmem:[#allocation28_spill] sm:$0xff] %v8529_v3  ;;  %10181 = vst [vmem:[#allocation43_spill] sm:$0xff] %v8532_v15  ;;  %3953 = vperm.xlu1 %6265, %v3550_v47   ;;  %3962 = vperm.xlu0 %6266, %v3553_v11   ;;  %v3557_v47 = vmul.f32 %v8224_v35, %v3384_v36 }
 0x55f   :  { %v8535_v21 = vpop.permute.xlu1 %3773  ;;  %v8538_v43 = vpop.permute.xlu0 %3782 }
 0x560   :  { %10182 = vst [vmem:[#allocation35_spill] sm:$0xff] %v8535_v21  ;;  %3959 = vperm.xlu1 %6265, %v3552_v44   ;;  %3968 = vperm.xlu0 %6266, %v3555_v60   ;;  %v3559_v44 = vmul.f32 %v8252_v52, %v3384_v36  ;;  %v3558_v60 = vmul.f32 %v8272_v57, %v3384_v36 }
 0x563   :  { %v8543_v27 = vpop.permute.xlu1 %3779  ;;  %v8546_v11 = vpop.permute.xlu0 %3788 }
 0x564   :  { %10184 = vst [vmem:[#allocation45_spill] sm:$0xff] %v8543_v27  ;;  %3965 = vperm.xlu1 %6265, %v3554_v8   ;;  %3974 = vperm.xlu0 %6266, %v3557_v47   ;;  %v3563_v47 = vmul.f32 %v8309_v2, %v3384_v36 }
 0x567   :  { %v8549_v42 = vpop.permute.xlu1 %3785  ;;  %v8552_v9 = vpop.permute.xlu0 %3794 }
 0x568   :  { %3971 = vperm.xlu1 %6265, %v3556_v56   ;;  %3980 = vperm.xlu0 %6266, %v3559_v44   ;;  %v3562_v56 = vmul.f32 %v8331_v50, %v3384_v36 }
 0x56b   :  { %v8555_v58 = vpop.permute.xlu1 %3791  ;;  %v8558_v51 = vpop.permute.xlu0 %3800 }
 0x56c   :  { %3977 = vperm.xlu1 %6265, %v3558_v60   ;;  %3986 = vperm.xlu0 %6266, %v3561_v4   ;;  %v3564_v4 = vmul.f32 %v8359_v1, %v3384_v36 }
 0x56f   :  { %v8561_v8 = vpop.permute.xlu1 %3797  ;;  %v8564_v27 = vpop.permute.xlu0 %3806 }
 0x570   :  { %10185 = vst [vmem:[#allocation48_spill] sm:$0xff] %v8564_v27  ;;  %3983 = vperm.xlu1 %6265, %v3560_v39   ;;  %3992 = vperm.xlu0 %6266, %v3563_v47   ;;  %v3566_v39 = vmul.f32 %v8388_v12, %v3384_v36 }
 0x573   :  { %v8567_v44 = vpop.permute.xlu1 %3803  ;;  %v8570_v21 = vpop.permute.xlu0 %3812 }
 0x574   :  { %10186 = vst [vmem:[#allocation40_spill] sm:$0xff] %v8570_v21  ;;  %3989 = vperm.xlu1 %6265, %v3562_v56   ;;  %3998 = vperm.xlu0 %6266, %v3565_v7   ;;  %v3568_v7 = vmul.f32 %v8414_v55, %v3384_v36  ;;  %v3571_v21 = vmul.f32 %v8418_v61, %v3384_v36 }
 0x577   :  { %v8573_v60 = vpop.permute.xlu1 %3809  ;;  %v8576_v15 = vpop.permute.xlu0 %3818 }
 0x578   :  { %10187 = vst [vmem:[#allocation41_spill] sm:$0xff] %v8573_v60  ;;  %10188 = vst [vmem:[#allocation44_spill] sm:$0xff] %v8576_v15  ;;  %3995 = vperm.xlu1 %6265, %v3564_v4   ;;  %4004 = vperm.xlu0 %6266, %v3567_v63   ;;  %v10192_v63 = vld [vmem:[#allocation38_spill] sm:$0xff]  ;;  %v3570_v15 = vmul.f32 %v8429_v54, %v3384_v36 }
 0x579   :  { %v3388_v4 = vrot.slane %v10192_v63, %v7834_v34 }
 0x57b   :  { %v8579_v47 = vpop.permute.xlu1 %3815  ;;  %v8582_v0 = vpop.permute.xlu0 %3824  ;;  %v3581_v22 = vmul.f32 %v8338_v41, %v3388_v4 }
 0x57c   :  { %10189 = vst [vmem:[#allocation30_spill] sm:$0xff] %v8579_v47  ;;  %10190 = vst [vmem:[#allocation27_spill] sm:$0xff] %v8582_v0  ;;  %4001 = vperm.xlu1 %6265, %v3566_v39   ;;  %4010 = vperm.xlu0 %6266, %v3569_v46   ;;  %v3573_v39 = vmul.f32 %v8224_v35, %v3388_v4  ;;  %v3572_v0 = vmul.f32 %v8437_v5, %v3384_v36 }
 0x57f   :  { %v8585_v56 = vpop.permute.xlu1 %3821  ;;  %v8588_v13 = vpop.permute.xlu0 %3830 }
 0x580   :  { %10191 = vst [vmem:[#allocation31_spill] sm:$0xff] %v8585_v56  ;;  %4007 = vperm.xlu1 %6265, %v3568_v7   ;;  %4016 = vperm.xlu0 %6266, %v3571_v21   ;;  %v3575_v7 = vmul.f32 %v8252_v52, %v3388_v4  ;;  %v3574_v21 = vmul.f32 %v8272_v57, %v3388_v4 }
 0x583   :  { %v8593_v47 = vpop.permute.xlu1 %3827  ;;  %v8596_v46 = vpop.permute.xlu0 %3836 }
 0x584   :  { %10193 = vst [vmem:[#allocation33_spill] sm:$0xff] %v8593_v47  ;;  %4013 = vperm.xlu1 %6265, %v3570_v15   ;;  %4022 = vperm.xlu0 %6266, %v3573_v39   ;;  %v3577_v47 = vmul.f32 %v8279_v32, %v3388_v4  ;;  %v3576_v15 = vmul.f32 %v8302_v59, %v3388_v4 }
 0x585   :  { %v3579_v39 = vmul.f32 %v8309_v2, %v3388_v4 }
 0x587   :  { %v8599_v56 = vpop.permute.xlu1 %3833  ;;  %v8602_v37 = vpop.permute.xlu0 %3842 }
 0x588   :  { %10194 = vst [vmem:[#allocation49_spill] sm:$0xff] %v8602_v37  ;;  %4019 = vperm.xlu1 %6265, %v3572_v0   ;;  %4028 = vperm.xlu0 %6266, %v3575_v7   ;;  %v3578_v0 = vmul.f32 %v8331_v50, %v3388_v4 }
 0x58b   :  { %v8605_v63 = vpop.permute.xlu1 %3839  ;;  %v8608_v27 = vpop.permute.xlu0 %3848 }
 0x58c   :  { %10195 = vst [vmem:[#allocation32_spill] sm:$0xff] %v8608_v27  ;;  %4025 = vperm.xlu1 %6265, %v3574_v21   ;;  %4034 = vperm.xlu0 %6266, %v3577_v47   ;;  %v3580_v47 = vmul.f32 %v8359_v1, %v3388_v4  ;;  %v3583_v27 = vmul.f32 %v8366_v38, %v3388_v4 }
 0x58f   :  { %v8611_v36 = vpop.permute.xlu1 %3845  ;;  %v8614_v3 = vpop.permute.xlu0 %3854 }
 0x590   :  { %10196 = vst [vmem:[#allocation57_spill] sm:$0xff] %v8611_v36  ;;  %10197 = vst [vmem:[#allocation53_spill] sm:$0xff] %v8614_v3  ;;  %4031 = vperm.xlu1 %6265, %v3576_v15   ;;  %4040 = vperm.xlu0 %6266, %v3579_v39   ;;  %v3582_v15 = vmul.f32 %v8388_v12, %v3388_v4  ;;  %v3585_v3 = vmul.f32 %v8395_v14, %v3388_v4 }
 0x593   :  { %v8617_v7 = vpop.permute.xlu1 %3851  ;;  %v8620_v60 = vpop.permute.xlu0 %3860 }
 0x594   :  { %10198 = vst [vmem:[#allocation37_spill] sm:$0xff] %v8617_v7  ;;  %10199 = vst [vmem:[#allocation46_spill] sm:$0xff] %v8620_v60  ;;  %4037 = vperm.xlu1 %6265, %v3578_v0   ;;  %4046 = vperm.xlu0 %6266, %v3581_v22   ;;  %v3584_v22 = vmul.f32 %v8414_v55, %v3388_v4  ;;  %v3587_v60 = vmul.f32 %v8418_v61, %v3388_v4 }
 0x597   :  { %v8623_v21 = vpop.permute.xlu1 %3857  ;;  %v8626_v37 = vpop.permute.xlu0 %3866 }
 0x598   :  { %10200 = vst [vmem:[#allocation54_spill] sm:$0xff] %v8623_v21  ;;  %10201 = vst [vmem:[#allocation51_spill] sm:$0xff] %v8626_v37  ;;  %4043 = vperm.xlu1 %6265, %v3580_v47   ;;  %4052 = vperm.xlu0 %6266, %v3583_v27   ;;  %v10205_v27 = vld [vmem:[#allocation47_spill] sm:$0xff]  ;;  %v3586_v37 = vmul.f32 %v8429_v54, %v3388_v4 }
 0x599   :  { %v3392_v47 = vrot.slane %v10205_v27, %v7834_v34 }
 0x59b   :  { %v8629_v39 = vpop.permute.xlu1 %3863  ;;  %v8632_v7 = vpop.permute.xlu0 %3872  ;;  %v3590_v34 = vmul.f32 %v8272_v57, %v3392_v47  ;;  %v3594_v57 = vmul.f32 %v8331_v50, %v3392_v47  ;;  %v3598_v50 = vmul.f32 %v8388_v12, %v3392_v47  ;;  %v6269_v12 = vld [vmem:[%s9793_s7] sm:$0xf]  ;;  %s6413_s7 = smov [#allocation11]  }
 0x59c   :  { %10202 = vst [vmem:[#allocation39_spill] sm:$0xff] %v8629_v39  ;;  %10203 = vst [vmem:[#allocation56_spill] sm:$0xff] %v8632_v7  ;;  %4049 = vperm.xlu1 %6265, %v3582_v15   ;;  %4058 = vperm.xlu0 %6266, %v3585_v3   ;;  %v3589_v15 = vmul.f32 %v8224_v35, %v3392_v47  ;;  %v3588_v7 = vmul.f32 %v8437_v5, %v3388_v4  ;;  %s6163_s22 = sshll.u32 %s6413_s7, 4  ;;  %s6164_s22 = int_to_ptr.vmem [resolvable:$true] %s6163_s22 }
 0x59d   :  { %v3593_v35 = vmul.f32 %v8279_v32, %v3392_v47  ;;  %v3597_v32 = vmul.f32 %v8338_v41, %v3392_v47  ;;  %v3601_v41 = vmul.f32 %v8395_v14, %v3392_v47  ;;  %s6370_s23 = scalar_lea.vmem %s6164_s22, 128  ;;  %p6375_p12 = scmp.lt.s32.totalorder %s6164_s22, %s6164_s22 }
 0x59e   :  { %p6371_p11 = scmp.ne.s32.totalorder %s6164_s22, %s6370_s23  ;;  %p6376_p13 = scmp.lt.s32.totalorder %s6370_s23, %s6370_s23 }
 0x59f   :  { %v8635_v0 = vpop.permute.xlu1 %3869  ;;  %v8638_v21 = vpop.permute.xlu0 %3878 }
 0x5a0   :  { %10204 = vst [vmem:[#allocation72_spill] sm:$0xff] %v8635_v0  ;;  %4055 = vperm.xlu1 %6265, %v3584_v22   ;;  %4064 = vperm.xlu0 %6266, %v3587_v60   ;;  %v3591_v22 = vmul.f32 %v8252_v52, %v3392_v47  ;;  %v3595_v52 = vmul.f32 %v8309_v2, %v3392_v47  ;;  %p6377_p0 = por %p6376_p13, %p6375_p12 }
 0x5a1   :  { %v3599_v2 = vmul.f32 %v8366_v38, %v3392_v47 }
 0x5a2   :  { %p6378_p1 = pnand %p6377_p0, %p6371_p11 }
 0x5a3   :  { %v8643_v39 = vpop.permute.xlu1 %3875  ;;  %v8646_v3 = vpop.permute.xlu0 %3884 }
 0x5a4   :  { %10206 = vst [vmem:[#allocation75_spill] sm:$0xff] %v8643_v39  ;;  %4061 = vperm.xlu1 %6265, %v3586_v37   ;;  %4070 = vperm.xlu0 %6266, %v3589_v15   ;;  %v3592_v37 = vmul.f32 %v8302_v59, %v3392_v47  ;;  %v3596_v59 = vmul.f32 %v8359_v1, %v3392_v47 }
 0x5a5   :  { %v3600_v1 = vmul.f32 %v8414_v55, %v3392_v47 }
 0x5a7   :  { %v8649_v0 = vpop.permute.xlu1 %3881  ;;  %v8652_v36 = vpop.permute.xlu0 %3890 }
 0x5a8   :  { %4067 = vperm.xlu1 %6265, %v3588_v7   ;;  %4076 = vperm.xlu0 %6266, %v3591_v22  }
 0x5ab   :  { %v8655_v60 = vpop.permute.xlu1 %3887  ;;  %v8658_v27 = vpop.permute.xlu0 %3896 }
 0x5ac   :  { %4073 = vperm.xlu1 %6265, %v3590_v34   ;;  %4082 = vperm.xlu0 %6266, %v3593_v35  }
 0x5af   :  { %v8661_v4 = vpop.permute.xlu1 %3893  ;;  %v8664_v15 = vpop.permute.xlu0 %3902 }
 0x5b0   :  { %4079 = vperm.xlu1 %6265, %v3592_v37   ;;  %4088 = vperm.xlu0 %6266, %v3595_v52  }
 0x5b3   :  { %v8667_v7 = vpop.permute.xlu1 %3899  ;;  %v8670_v22 = vpop.permute.xlu0 %3908 }
 0x5b4   :  { %4085 = vperm.xlu1 %6265, %v3594_v57   ;;  %4094 = vperm.xlu0 %6266, %v3597_v32   ;;  %v10209_v57 = vld [vmem:[#allocation16_spill] sm:$0xff] }
 0x5b5   :  { %v8686_v32 = vsub.s32 3, %v10209_v57 }
 0x5b7   :  { %v8673_v34 = vpop.permute.xlu1 %3905  ;;  %v8676_v35 = vpop.permute.xlu0 %3914  ;;  %v4793_v14 = vrot.slane %v6269_v12, %v8686_v32 }
 0x5b8   :  { %10207 = vst [vmem:[#allocation52_spill] sm:$0xff] %v8676_v35  ;;  %4091 = vperm.xlu1 %6265, %v3596_v59   ;;  %4100 = vperm.xlu0 %6266, %v3599_v2   ;;  %v3603_v59 = vmul.f32 %v8418_v61, %v3392_v47  ;;  %v3604_v61 = vmul.f32 %v8437_v5, %v3392_v47 }
 0x5bb   :  { %v8679_v37 = vpop.permute.xlu1 %3911  ;;  %v8682_v52 = vpop.permute.xlu0 %3920 }
 0x5bc   :  { %10208 = vst [vmem:[#allocation74_spill] sm:$0xff] %v8682_v52  ;;  %4097 = vperm.xlu1 %6265, %v3598_v50   ;;  %4106 = vperm.xlu0 %6266, %v3601_v41   ;;  %v3602_v50 = vmul.f32 %v8429_v54, %v3392_v47 }
 0x5bf   :  { %v8688_v38 = vpop.permute.xlu1 %3917  ;;  %v8691_v2 = vpop.permute.xlu0 %3926 }
 0x5c0   :  { %4103 = vperm.xlu1 %6265, %v3600_v1   ;;  %4112 = vperm.xlu0 %6266, %v3603_v59  }
 0x5c3   :  { %v8698_v55 = vpop.permute.xlu1 %3923  ;;  %v8700_v41 = vpop.permute.xlu0 %3932 }
 0x5c4   :  { %10210 = vst [vmem:[#allocation77_spill] sm:$0xff] %v8698_v55  ;;  %4109 = vperm.xlu1 %6265, %v3602_v50   ;;  %4796 = vbcast.lane.b32.xlu0 %v4793_v14, 256 }
 0x5c7   :  { %v8703_v57 = vpop.permute.xlu1 %3929  ;;  %v8705_v1 = vpop.permute.xlu0 %3938 }
 0x5c8   :  { %10211 = vst [vmem:[#allocation63_spill] sm:$0xff] %v8705_v1  ;;  %4115 = vperm.xlu1 %6265, %v3604_v61   ;;  %4804 = vbcast.lane.b32.xlu0 %v4793_v14, 272 }
 0x5cb   :  { %v8707_v52 = vpop.permute.xlu1 %3935  ;;  %v8709_v12 = vpop.permute.xlu0 %3944 }
 0x5cc   :  { %10212 = vst [vmem:[#allocation60_spill] sm:$0xff] %v8709_v12  ;;  %4800 = vbcast.lane.b32.xlu1 %v4793_v14, 264  ;;  %4812 = vbcast.lane.b32.xlu0 %v4793_v14, 288 }
 0x5cf   :  { %v8711_v54 = vpop.permute.xlu1 %3941  ;;  %v8713_v59 = vpop.permute.xlu0 %3950 }
 0x5d0   :  { %10213 = vst [vmem:[#allocation88_spill] sm:$0xff] %v8713_v59  ;;  %4808 = vbcast.lane.b32.xlu1 %v4793_v14, 280  ;;  %4820 = vbcast.lane.b32.xlu0 %v4793_v14, 304 }
 0x5d3   :  { %v8715_v50 = vpop.permute.xlu1 %3947  ;;  %v8717_v5 = vpop.permute.xlu0 %3956 }
 0x5d4   :  { %10214 = vst [vmem:[#allocation64_spill] sm:$0xff] %v8715_v50  ;;  %10215 = vst [vmem:[#allocation58_spill] sm:$0xff] %v8717_v5  ;;  %4816 = vbcast.lane.b32.xlu1 %v4793_v14, 296  ;;  %4828 = vbcast.lane.b32.xlu0 %v4793_v14, 320 }
 0x5d7   :  { %v8719_v47 = vpop.permute.xlu1 %3953  ;;  %v8721_v61 = vpop.permute.xlu0 %3962 }
 0x5d8   :  { %10216 = vst [vmem:[#allocation83_spill] sm:$0xff] %v8719_v47  ;;  %10217 = vst [vmem:[#allocation55_spill] sm:$0xff] %v8721_v61  ;;  %4824 = vbcast.lane.b32.xlu1 %v4793_v14, 312  ;;  %4836 = vbcast.lane.b32.xlu0 %v4793_v14, 336 }
 0x5db   :  { %v8723_v55 = vpop.permute.xlu1 %3959  ;;  %v8725_v12 = vpop.permute.xlu0 %3968 }
 0x5dc   :  { %10218 = vst [vmem:[#allocation78_spill] sm:$0xff] %v8723_v55  ;;  %10219 = vst [vmem:[#allocation66_spill] sm:$0xff] %v8725_v12  ;;  %4832 = vbcast.lane.b32.xlu1 %v4793_v14, 328  ;;  %4844 = vbcast.lane.b32.xlu0 %v4793_v14, 352 }
 0x5df   :  { %v8727_v59 = vpop.permute.xlu1 %3965  ;;  %v8729_v39 = vpop.permute.xlu0 %3974 }
 0x5e0   :  { %10220 = vst [vmem:[#allocation89_spill] sm:$0xff] %v8727_v59  ;;  %10221 = vst [vmem:[#allocation65_spill] sm:$0xff] %v8729_v39  ;;  %4840 = vbcast.lane.b32.xlu1 %v4793_v14, 344  ;;  %4852 = vbcast.lane.b32.xlu0 %v4793_v14, 368 }
 0x5e3   :  { %v8731_v5 = vpop.permute.xlu1 %3971  ;;  %v8733_v50 = vpop.permute.xlu0 %3980 }
 0x5e4   :  { %10222 = vst [vmem:[#allocation67_spill] sm:$0xff] %v8731_v5  ;;  %10223 = vst [vmem:[#allocation17_spill] sm:$0xff] %v8733_v50  ;;  %4848 = vbcast.lane.b32.xlu1 %v4793_v14, 360 }
 0x5e7   :  { %v8735_v61 = vpop.permute.xlu1 %3977  ;;  %v8737_v47 = vpop.permute.xlu0 %3986 }
 0x5e8   :  { %10224 = vst [vmem:[#allocation91_spill] sm:$0xff] %v8735_v61  ;;  %10225 = vst [vmem:[#allocation86_spill] sm:$0xff] %v8737_v47  ;;  %4856 = vbcast.lane.b32.xlu1 %v4793_v14, 376 }
 0x5eb   :  { %v8739_v55 = vpop.permute.xlu1 %3983  ;;  %v8741_v12 = vpop.permute.xlu0 %3992 }
 0x5ec   :  { %10226 = vst [vmem:[#allocation62_spill] sm:$0xff] %v8739_v55  ;;  %10227 = vst [vmem:[#allocation85_spill] sm:$0xff] %v8741_v12 }
 0x5ef   :  { %v8743_v35 = vpop.permute.xlu1 %3989  ;;  %v8745_v59 = vpop.permute.xlu0 %3998 }
 0x5f0   :  { %10228 = vst [vmem:[#allocation80_spill] sm:$0xff] %v8743_v35  ;;  %10229 = vst [vmem:[#allocation59_spill] sm:$0xff] %v8745_v59 }
 0x5f3   :  { %v8747_v39 = vpop.permute.xlu1 %3995  ;;  %v8749_v1 = vpop.permute.xlu0 %4004 }
 0x5f4   :  { %10230 = vst [vmem:[#allocation79_spill] sm:$0xff] %v8747_v39  ;;  %10231 = vst [vmem:[#allocation76_spill] sm:$0xff] %v8749_v1 }
 0x5f7   :  { %v8751_v5 = vpop.permute.xlu1 %4001  ;;  %v8753_v50 = vpop.permute.xlu0 %4010 }
 0x5f8   :  { %10232 = vst [vmem:[#allocation68_spill] sm:$0xff] %v8751_v5  ;;  %10233 = vst [vmem:[#allocation69_spill] sm:$0xff] %v8753_v50 }
 0x5fb   :  { %v8755_v61 = vpop.permute.xlu1 %4007  ;;  %v8757_v47 = vpop.permute.xlu0 %4016 }
 0x5fc   :  { %10234 = vst [vmem:[#allocation18_spill] sm:$0xff] %v8755_v61  ;;  %10235 = vst [vmem:[#allocation19_spill] sm:$0xff] %v8757_v47  ;;  %v4124_v47 = vrot.slane %v8499_v33, %v7064_v17 }
 0x5ff   :  { %v8759_v14 = vpop.permute.xlu1 %4013  ;;  %v8761_v55 = vpop.permute.xlu0 %4022 }
 0x600   :  { %10236 = vst [vmem:[#allocation61_spill] sm:$0xff] %v8759_v14 }
 0x603   :  { %v8763_v12 = vpop.permute.xlu1 %4019  ;;  %v8765_v35 = vpop.permute.xlu0 %4028 }
 0x604   :  { %10237 = vst [vmem:[#allocation87_spill] sm:$0xff] %v8763_v12  ;;  %10238 = vst [vmem:[#allocation82_spill] sm:$0xff] %v8765_v35  ;;  %v4120_v12 = vrot.slane %v8490_v53, %v7061_v24  ;;  %v4199_v53 = vrot.slane %v8538_v43, %v7061_v24 }
 0x607   :  { %v8767_v59 = vpop.permute.xlu1 %4025  ;;  %v8769_v39 = vpop.permute.xlu0 %4034 }
 0x608   :  { %10239 = vst [vmem:[#allocation21_spill] sm:$0xff] %v8769_v39  ;;  %v4125_v39 = vsel %vm1295_vm3, %v4124_v47, %v4120_v12 }
 0x60b   :  { %v8771_v1 = vpop.permute.xlu1 %4031  ;;  %v8773_v5 = vpop.permute.xlu0 %4040 }
 0x60c   :  { %10240 = vst [vmem:[#allocation70_spill] sm:$0xff] %v8771_v1  ;;  %10241 = vst [vmem:[#allocation71_spill] sm:$0xff] %v8773_v5  ;;  %v4134_v1 = vrot.slane %v8505_v62, %v7075_v20  ;;  %v4129_v5 = vrot.slane %v8496_v29, %v7068_v23  ;;  %v4144_v62 = vrot.slane %v8511_v48, %v7084_v49 }
 0x60d   :  { %v4139_v29 = vrot.slane %v8502_v31, %v7072_v6  ;;  %v4149_v31 = vrot.slane %v8508_v26, %v7078_v25  ;;  %v4159_v26 = vrot.slane %v8514_v40, %v7091_v10  ;;  %v4164_v40 = vrot.slane %v8523_v28, %v7119_v18 }
 0x60e   :  { %v4130_v33 = vsel %vm1302_vm4, %v4129_v5, %v4125_v39  ;;  %v4208_v39 = vrot.slane %v8546_v11, %v7068_v23 }
 0x60f   :  { %v8775_v50 = vpop.permute.xlu1 %4037  ;;  %v8777_v61 = vpop.permute.xlu0 %4046  ;;  %v4135_v12 = vsel %vm1309_vm5, %v4134_v1, %v4130_v33  ;;  %v4282_v1 = vrot.slane %v8599_v56, %v7064_v17  ;;  %v4278_v56 = vrot.slane %v8588_v13, %v7061_v24  ;;  %v4357_v13 = vrot.slane %v8638_v21, %v7061_v24 }
 0x610   :  { %10242 = vst [vmem:[#allocation20_spill] sm:$0xff] %v8775_v50  ;;  %10243 = vst [vmem:[#allocation81_spill] sm:$0xff] %v8777_v61  ;;  %v4203_v61 = vrot.slane %v8549_v42, %v7064_v17  ;;  %v4213_v42 = vrot.slane %v8555_v58, %v7075_v20  ;;  %v4140_v43 = vsel %vm1316_vm6, %v4139_v29, %v4135_v12 }
 0x611   :  { %v4145_v48 = vsel %vm10245_vm15, %v4144_v62, %v4140_v43  ;;  %v4154_v58 = vrot.slane %v8517_v19, %v7102_v45  ;;  %v4361_v12 = vrot.slane %v8649_v0, %v7064_v17  ;;  %v4218_v62 = vrot.slane %v8552_v9, %v7072_v6  ;;  %vm10250_vm15 = vmmov %vm10246_vm7 }
 0x612   :  { %v4204_v47 = vsel %vm1295_vm3, %v4203_v61, %v4199_v53  ;;  %v4223_v53 = vrot.slane %v8561_v8, %v7084_v49  ;;  %v4150_v29 = vsel %vm10246_vm7, %v4149_v31, %v4145_v48  ;;  %v4292_v8 = vrot.slane %v8605_v63, %v7075_v20  ;;  %vm10252_vm7 = vmmov %vm10247_vm2 }
 0x613   :  { %v8783_v14 = vpop.permute.xlu1 %4043  ;;  %v8785_v35 = vpop.permute.xlu0 %4052  ;;  %v4209_v61 = vsel %vm1302_vm4, %v4208_v39, %v4204_v47  ;;  %v4283_v47 = vsel %vm1295_vm3, %v4282_v1, %v4278_v56  ;;  %v4155_v0 = vsel %vm10247_vm2, %v4154_v58, %v4150_v29  ;;  %v4287_v39 = vrot.slane %v8596_v46, %v7068_v23  ;;  %vm10260_vm2 = vmmov %vm10248_vm8 }
 0x614   :  { %10244 = vst [vmem:[#allocation73_spill] sm:$0xff] %v8783_v14  ;;  %v4214_v11 = vsel %vm1309_vm5, %v4213_v42, %v4209_v61  ;;  %v4233_v63 = vrot.slane %v8567_v44, %v7102_v45  ;;  %v4362_v1 = vsel %vm1295_vm3, %v4361_v12, %v4357_v13  ;;  %v4371_v21 = vrot.slane %v8655_v60, %v7075_v20  ;;  %v10254_v13 = vld [vmem:[#allocation92_spill] sm:$0xff] }
 0x615   :  { %v4219_v9 = vsel %vm1316_vm6, %v4218_v62, %v4214_v11  ;;  %v4228_v31 = vrot.slane %v8558_v51, %v7078_v25  ;;  %v4288_v28 = vsel %vm1302_vm4, %v4287_v39, %v4283_v47  ;;  %v4366_v48 = vrot.slane %v8646_v3, %v7068_v23  ;;  %v10249_v11 = vld [vmem:[#allocation57_spill] sm:$0xff] }
 0x616   :  { %v4224_v43 = vsel %vm10248_vm8, %v4223_v53, %v4219_v9  ;;  %v4169_v46 = vrot.slane %v8520_v30, %v7109_v16  ;;  %v4160_v44 = vsel %vm1344_vm10, %v4159_v26, %v4155_v0  ;;  %v4293_v61 = vsel %vm1309_vm5, %v4292_v8, %v4288_v28  ;;  %v10251_v3 = vld [vmem:[#allocation49_spill] sm:$0xff]  ;;  %v10255_v0 = vld [vmem:[#allocation28_spill] sm:$0xff] }
 0x617   :  { %v8794_v50 = vpop.permute.xlu1 %4049  ;;  %v8799_v14 = vpop.permute.xlu0 %4058  ;;  %v4302_v60 = vrot.slane %v10249_v11, %v7084_v49  ;;  %v4165_v51 = vsel %vm1351_vm11, %v4164_v40, %v4160_v44  ;;  %v4229_v56 = vsel %vm10250_vm15, %v4228_v31, %v4224_v43  ;;  %v4297_v12 = vrot.slane %v10251_v3, %v7072_v6  ;;  %v10253_v26 = vld [vmem:[#allocation41_spill] sm:$0xff]  ;;  %v10256_v9 = vld [vmem:[#allocation48_spill] sm:$0xff]  ;;  %v10257_v31 = vld [vmem:[#allocation22_spill] sm:$0xff] }
 0x618   :  { %v4367_v62 = vsel %vm1302_vm4, %v4366_v48, %v4362_v1  ;;  %v4234_v30 = vsel %vm10252_vm7, %v4233_v63, %v4229_v56  ;;  %v4243_v29 = vrot.slane %v10253_v26, %v7119_v18  ;;  %v4381_v8 = vrot.slane %v8661_v4, %v7084_v49  ;;  %v10259_v48 = vld [vmem:[#allocation42_spill] sm:$0xff]  ;;  %v10261_v11 = vld [vmem:[#allocation37_spill] sm:$0xff]  ;;  %vm10265_vm15 = vmmov %vm10260_vm2 }
 0x619   :  { %v4372_v47 = vsel %vm1309_vm5, %v4371_v21, %v4367_v62  ;;  %v4174_v40 = vrot.slane %v10255_v0, %v10254_v13  ;;  %v4238_v39 = vrot.slane %v10256_v9, %v7091_v10  ;;  %v4298_v43 = vsel %vm1316_vm6, %v4297_v12, %v4293_v61  ;;  %v10258_v21 = vld [vmem:[#allocation90_spill] sm:$0xff]  ;;  %v10263_v12 = vld [vmem:[#allocation32_spill] sm:$0xff] }
 0x61a   :  { %v4376_v1 = vrot.slane %v8652_v36, %v7072_v6  ;;  %v8894_v28 = vrot.slane %v10257_v31, %v8686_v32  ;;  %v4179_v4 = vrot.slane %v10259_v48, %v10258_v21  ;;  %v4303_v44 = vsel %vm10260_vm2, %v4302_v60, %v4298_v43  ;;  %v10264_v9 = vld [vmem:[#allocation30_spill] sm:$0xff] }
 0x61b   :  { %v8811_v5 = vpop.permute.xlu1 %4055  ;;  %v8816_v33 = vpop.permute.xlu0 %4064  ;;  %v4312_v56 = vrot.slane %v10261_v11, %v7102_v45  ;;  %vm10262_vm8 = vcmask 720512   ;;  %v4239_v36 = vsel %vm1344_vm10, %v4238_v39, %v4234_v30  ;;  %v4307_v62 = vrot.slane %v10263_v12, %v7078_v25 }
 0x61c   :  { %v4170_v61 = vsel %vm10262_vm8, %v4169_v46, %v4165_v51  ;;  %v4377_v26 = vsel %vm1316_vm6, %v4376_v1, %v4372_v47  ;;  %v4244_v0 = vsel %vm1351_vm11, %v4243_v29, %v4239_v36  ;;  %v4253_v31 = vrot.slane %v10264_v9, %v10254_v13  ;;  %v10266_v46 = vld [vmem:[#allocation40_spill] sm:$0xff]  ;;  %v10268_v29 = vld [vmem:[#allocation93_spill] sm:$0xff]  ;;  %v10269_v1 = vld [vmem:[#allocation43_spill] sm:$0xff] }
 0x61d   :  { %v4382_v60 = vsel %vm10265_vm15, %v4381_v8, %v4377_v26  ;;  %v4391_v43 = vrot.slane %v8667_v7, %v7102_v45  ;;  %v4175_v48 = vsel %vm1365_vm13, %v4174_v40, %v4170_v61  ;;  %v4248_v51 = vrot.slane %v10266_v46, %v7109_v16  ;;  %v10270_v36 = vld [vmem:[#allocation94_spill] sm:$0xff]  ;;  %v10271_v8 = vld [vmem:[#allocation35_spill] sm:$0xff] }
 0x61e   :  { %vm10267_vm7 = vcmask 458112   ;;  %v4386_v47 = vrot.slane %v8658_v27, %v7078_v25  ;;  %v4189_v11 = vrot.slane %v10269_v1, %v10268_v29  ;;  %v4184_v12 = vrot.slane %v10271_v8, %v10270_v36  ;;  %v10273_v40 = vld [vmem:[#allocation54_spill] sm:$0xff] }
 0x61f   :  { %v8835_v19 = vpop.permute.xlu1 %4061  ;;  %v8843_v42 = vpop.permute.xlu0 %4070  ;;  %v4308_v30 = vsel %vm10267_vm7, %v4307_v62, %v4303_v44  ;;  %vm10272_vm2 = vcmask 523712   ;;  %v4322_v61 = vrot.slane %v10273_v40, %v7119_v18  ;;  %v4249_v44 = vsel %vm10262_vm8, %v4248_v51, %v4244_v0  ;;  %v10274_v62 = vld [vmem:[#allocation53_spill] sm:$0xff]  ;;  %vm10275_vm15 = vmmov %vm10267_vm7  ;;  %v10277_v40 = vld [vmem:[#allocation31_spill] sm:$0xff] }
 0x620   :  { %v4313_v7 = vsel %vm10272_vm2, %v4312_v56, %v4308_v30  ;;  %v4317_v27 = vrot.slane %v10274_v62, %v7091_v10  ;;  %v4387_v9 = vsel %vm10275_vm15, %v4386_v47, %v4382_v60  ;;  %v4440_v46 = vrot.slane %v8703_v57, %v7064_v17  ;;  %vm10276_vm7 = vmmov %vm10272_vm2 }
 0x621   :  { %v4180_v1 = vsel %vm1372_vm14, %v4179_v4, %v4175_v48  ;;  %v4254_v8 = vsel %vm1365_vm13, %v4253_v31, %v4249_v44  ;;  %v4392_v56 = vsel %vm10276_vm7, %v4391_v43, %v4387_v9  ;;  %v4401_v30 = vrot.slane %v8673_v34, %v7119_v18  ;;  %v10279_v31 = vld [vmem:[#allocation44_spill] sm:$0xff]  ;;  %v10280_v48 = vld [vmem:[#allocation39_spill] sm:$0xff] }
 0x622   :  { %v4263_v0 = vrot.slane %v10277_v40, %v10270_v36  ;;  %v4318_v51 = vsel %vm1344_vm10, %v4317_v27, %v4313_v7  ;;  %v4396_v60 = vrot.slane %v8664_v15, %v7091_v10  ;;  %v4436_v57 = vrot.slane %v8691_v2, %v7061_v24  ;;  %v10281_v7 = vld [vmem:[#allocation46_spill] sm:$0xff] }
 0x623   :  { %v8862_v58 = vpop.permute.xlu1 %4067  ;;  %v8870_v53 = vpop.permute.xlu0 %4076  ;;  %vm10278_vm2 = vcmask 917312   ;;  %v4258_v43 = vrot.slane %v10279_v31, %v10258_v21  ;;  %v4323_v34 = vsel %vm1351_vm11, %v4322_v61, %v4318_v51  ;;  %v4332_v44 = vrot.slane %v10280_v48, %v10254_v13  ;;  %v10282_v51 = vld [vmem:[#allocation27_spill] sm:$0xff] }
 0x624   :  { %v4185_v4 = vsel %vm10278_vm2, %v4184_v12, %v4180_v1  ;;  %v4327_v15 = vrot.slane %v10281_v7, %v7109_v16  ;;  %v4397_v27 = vsel %vm1344_vm10, %v4396_v60, %v4392_v56  ;;  %v4441_v2 = vsel %vm1295_vm3, %v4440_v46, %v4436_v57  ;;  %vm10283_vm8 = vmmov %vm10278_vm2 }
 0x625   :  { %v4450_v12 = vrot.slane %v8707_v52, %v7075_v20  ;;  %v4259_v9 = vsel %vm1372_vm14, %v4258_v43, %v4254_v8  ;;  %v4402_v1 = vsel %vm1351_vm11, %v4401_v30, %v4397_v27  ;;  %v4411_v61 = vrot.slane %v8679_v37, %v10254_v13  ;;  %v10285_v8 = vld [vmem:[#allocation36_spill] sm:$0xff]  ;;  %v10286_v30 = vld [vmem:[#allocation33_spill] sm:$0xff] }
 0x626   :  { %v4445_v40 = vrot.slane %v8700_v41, %v7068_v23  ;;  %v4268_v31 = vrot.slane %v10282_v51, %v10268_v29  ;;  %v4264_v56 = vsel %vm10283_vm8, %v4263_v0, %v4259_v9  ;;  %vm10284_vm15 = vcmask 720512   ;;  %v10287_v43 = vld [vmem:[#allocation72_spill] sm:$0xff]  ;;  %v10288_v0 = vld [vmem:[#allocation51_spill] sm:$0xff]  ;;  %v10290_v9 = vld [vmem:[#allocation45_spill] sm:$0xff] }
 0x627   :  { %v8890_v63 = vpop.permute.xlu1 %4073  ;;  %v8901_v3 = vpop.permute.xlu0 %4082  ;;  %v4328_v46 = vsel %vm10284_vm15, %v4327_v15, %v4323_v34  ;;  %v4406_v52 = vrot.slane %v8670_v22, %v7109_v16  ;;  %v4273_v57 = vrot.slane %v10286_v30, %v10285_v8  ;;  %v4342_v41 = vrot.slane %v10287_v43, %v10270_v36  ;;  %vm10289_vm7 = vmmov %vm10284_vm15 }
 0x628   :  { %v4333_v37 = vsel %vm1365_vm13, %v4332_v44, %v4328_v46  ;;  %v4446_v48 = vsel %vm1302_vm4, %v4445_v40, %v4441_v2  ;;  %v4337_v34 = vrot.slane %v10288_v0, %v10258_v21  ;;  %v4460_v27 = vrot.slane %v8711_v54, %v7084_v49  ;;  %v10291_v40 = vld [vmem:[#allocation63_spill] sm:$0xff]  ;;  %vm10297_vm15 = vmmov %vm10278_vm2 }
 0x629   :  { %v4407_v15 = vsel %vm10289_vm7, %v4406_v52, %v4402_v1  ;;  %v4451_v22 = vsel %vm1309_vm5, %v4450_v12, %v4446_v48  ;;  %v4194_v44 = vrot.slane %v10290_v9, %v10285_v8  ;;  %v4421_v2 = vrot.slane %v8688_v38, %v10270_v36  ;;  %v10292_v52 = vld [vmem:[#allocation52_spill] sm:$0xff] }
 0x62a   :  { %v4412_v51 = vsel %vm1365_vm13, %v4411_v61, %v4407_v15  ;;  %v4455_v46 = vrot.slane %v10291_v40, %v7072_v6  ;;  %v4190_v30 = vsel %vm1386_vm0, %v4189_v11, %v4185_v4  ;;  %v4269_v1 = vsel %vm1386_vm0, %v4268_v31, %v4264_v56  ;;  %v10293_v61 = vld [vmem:[#allocation56_spill] sm:$0xff]  ;;  %v10294_v11 = vld [vmem:[#allocation75_spill] sm:$0xff] }
 0x62b   :  { %v8920_v39 = vpop.permute.xlu1 %4079  ;;  %v8929_v26 = vpop.permute.xlu0 %4088  ;;  %v4338_v12 = vsel %vm1372_vm14, %v4337_v34, %v4333_v37  ;;  %v4416_v54 = vrot.slane %v10292_v52, %v10258_v21  ;;  %v4274_v48 = vsel %vm1393_vm1, %v4273_v57, %v4269_v1  ;;  %v4347_v0 = vrot.slane %v10293_v61, %v10268_v29  ;;  %v10296_v37 = vld [vmem:[#allocation64_spill] sm:$0xff] }
 0x62c   :  { %v4343_v38 = vsel %vm10278_vm2, %v4342_v41, %v4338_v12  ;;  %v4456_v15 = vsel %vm1316_vm6, %v4455_v46, %v4451_v22  ;;  %v4352_v4 = vrot.slane %v10294_v11, %v10285_v8  ;;  %vm10295_vm8 = vcmask 392512   ;;  %v10298_v41 = vld [vmem:[#allocation60_spill] sm:$0xff]  ;;  %v10299_v22 = vld [vmem:[#allocation91_spill] sm:$0xff] }
 0x62d   :  { %v4417_v31 = vsel %vm1372_vm14, %v4416_v54, %v4412_v51  ;;  %v4461_v56 = vsel %vm10295_vm8, %v4460_v27, %v4456_v15  ;;  %v4470_v34 = vrot.slane %v10296_v37, %v7102_v45  ;;  %v4195_v57 = vsel %vm1393_vm1, %v4194_v44, %v4190_v30  ;;  %v10301_v27 = vld [vmem:[#allocation74_spill] sm:$0xff]  ;;  %v10304_v15 = vld [vmem:[#allocation65_spill] sm:$0xff] }
 0x62e   :  { %v4422_v40 = vsel %vm10297_vm15, %v4421_v2, %v4417_v31  ;;  %v4465_v1 = vrot.slane %v10298_v41, %v7078_v25  ;;  %v4519_v46 = vrot.slane %v10299_v22, %v7064_v17  ;;  %vm10300_vm7 = vcmask 1041409   ;;  %v10302_v2 = vld [vmem:[#allocation77_spill] sm:$0xff] }
 0x62f   :  { %v8949_v47 = vpop.permute.xlu1 %4085  ;;  %v8957_v62 = vpop.permute.xlu0 %4094  ;;  %v9027_v12 = vsel %vm10300_vm7, %v4274_v48, %v4195_v57  ;;  %v4348_v51 = vsel %vm1386_vm0, %v4347_v0, %v4343_v38  ;;  %v4426_v52 = vrot.slane %v10301_v27, %v10268_v29  ;;  %v4598_v54 = vrot.slane %v8767_v59, %v7064_v17 }
 0x630   :  { %v4431_v30 = vrot.slane %v10302_v2, %v10285_v8  ;;  %vm10303_vm2 = vcmask 458112   ;;  %v4515_v11 = vrot.slane %v10304_v15, %v7061_v24  ;;  %v4677_v48 = vrot.slane %v8890_v63, %v7064_v17 }
 0x631   :  { %v4466_v61 = vsel %vm10303_vm2, %v4465_v1, %v4461_v56  ;;  %v9046_v38 = vsel %vm1393_vm1, %v4352_v4, %v4348_v51  ;;  %v4427_v59 = vsel %vm1386_vm0, %v4426_v52, %v4422_v40  ;;  %vm10305_vm8 = vcmask 523712   ;;  %v10306_v56 = vld [vmem:[#allocation83_spill] sm:$0xff]  ;;  %v10307_v1 = vld [vmem:[#allocation62_spill] sm:$0xff]  ;;  %v10308_v4 = vld [vmem:[#allocation88_spill] sm:$0xff] }
 0x632   :  { %v4471_v31 = vsel %vm10305_vm8, %v4470_v34, %v4466_v61  ;;  %v4594_v37 = vrot.slane %v8761_v55, %v7061_v24  ;;  %v4480_v57 = vrot.slane %v10306_v56, %v7119_v18  ;;  %v4520_v41 = vsel %vm1295_vm3, %v4519_v46, %v4515_v11  ;;  %v10309_v40 = vld [vmem:[#allocation17_spill] sm:$0xff]  ;;  %v10310_v55 = vld [vmem:[#allocation70_spill] sm:$0xff] }
 0x633   :  { %v8977_v60 = vpop.permute.xlu1 %4091  ;;  %v8985_v7 = vpop.permute.xlu0 %4100  ;;  %v4529_v63 = vrot.slane %v10307_v1, %v7075_v20  ;;  %v4673_v22 = vrot.slane %v8843_v42, %v7061_v24  ;;  %v4475_v51 = vrot.slane %v10308_v4, %v7091_v10  ;;  %v4524_v34 = vrot.slane %v10309_v40, %v7068_v23  ;;  %v10311_v61 = vld [vmem:[#allocation82_spill] sm:$0xff] }
 0x634   :  { %v4599_v27 = vsel %vm1295_vm3, %v4598_v54, %v4594_v37  ;;  %v4608_v52 = vrot.slane %v10310_v55, %v7075_v20  ;;  %v9069_v46 = vsel %vm1393_vm1, %v4431_v30, %v4427_v59  ;;  %v4603_v15 = vrot.slane %v10311_v61, %v7068_v23  ;;  %v10313_v40 = vld [vmem:[#allocation86_spill] sm:$0xff]  ;;  %v10316_v61 = vld [vmem:[#allocation21_spill] sm:$0xff] }
 0x635   :  { %v4678_v42 = vsel %vm1295_vm3, %v4677_v48, %v4673_v22  ;;  %v4687_v11 = vrot.slane %v8920_v39, %v7075_v20  ;;  %v4476_v54 = vsel %vm1344_vm10, %v4475_v51, %v4471_v31  ;;  %v4525_v37 = vsel %vm1302_vm4, %v4524_v34, %v4520_v41  ;;  %v10312_v48 = vld [vmem:[#allocation80_spill] sm:$0xff] }
 0x636   :  { %v4682_v1 = vrot.slane %v8870_v53, %v7068_v23  ;;  %v4481_v59 = vsel %vm1351_vm11, %v4480_v57, %v4476_v54  ;;  %v4530_v4 = vsel %vm1309_vm5, %v4529_v63, %v4525_v37  ;;  %v4539_v22 = vrot.slane %v10312_v48, %v7084_v49  ;;  %v10314_v51 = vld [vmem:[#allocation20_spill] sm:$0xff]  ;;  %v10315_v57 = vld [vmem:[#allocation58_spill] sm:$0xff]  ;;  %v10317_v37 = vld [vmem:[#allocation55_spill] sm:$0xff] }
 0x637   :  { %v9005_v43 = vpop.permute.xlu1 %4097  ;;  %v9012_v9 = vpop.permute.xlu0 %4106  ;;  %v4604_v39 = vsel %vm1302_vm4, %v4603_v15, %v4599_v27  ;;  %v4534_v31 = vrot.slane %v10313_v40, %v7072_v6  ;;  %v4618_v53 = vrot.slane %v10314_v51, %v7084_v49  ;;  %v4485_v63 = vrot.slane %v10315_v57, %v7109_v16  ;;  %v10320_v40 = vld [vmem:[#allocation79_spill] sm:$0xff] }
 0x638   :  { %v4609_v41 = vsel %vm1309_vm5, %v4608_v52, %v4604_v39  ;;  %v4683_v34 = vsel %vm1302_vm4, %v4682_v1, %v4678_v42  ;;  %v4613_v54 = vrot.slane %v10316_v61, %v7072_v6  ;;  %v4697_v15 = vrot.slane %v8949_v47, %v7084_v49 }
 0x639   :  { %v4688_v27 = vsel %vm1309_vm5, %v4687_v11, %v4683_v34  ;;  %v4495_v48 = vrot.slane %v10317_v37, %v10258_v21  ;;  %v4535_v42 = vsel %vm1316_vm6, %v4534_v31, %v4530_v4  ;;  %v4692_v1 = vrot.slane %v8901_v3, %v7072_v6  ;;  %v10321_v34 = vld [vmem:[#allocation85_spill] sm:$0xff] }
 0x63a   :  { %vm10318_vm15 = vcmask 720512   ;;  %vm10319_vm7 = vcmask 392512   ;;  %v4549_v47 = vrot.slane %v10320_v40, %v7102_v45  ;;  %v4614_v51 = vsel %vm1316_vm6, %v4613_v54, %v4609_v41  ;;  %v10323_v31 = vld [vmem:[#allocation73_spill] sm:$0xff] }
 0x63b   :  { %v9034_v44 = vpop.permute.xlu1 %4103  ;;  %v9043_v0 = vpop.permute.xlu0 %4112  ;;  %v4486_v39 = vsel %vm10318_vm15, %v4485_v63, %v4481_v59  ;;  %v4540_v11 = vsel %vm10319_vm7, %v4539_v22, %v4535_v42  ;;  %v4544_v57 = vrot.slane %v10321_v34, %v7078_v25  ;;  %vm10322_vm2 = vmmov %vm10319_vm7  ;;  %v4628_v3 = vrot.slane %v10323_v31, %v7102_v45  ;;  %v10324_v59 = vld [vmem:[#allocation71_spill] sm:$0xff]  ;;  %v10326_v42 = vld [vmem:[#allocation78_spill] sm:$0xff] }
 0x63c   :  { %v4619_v4 = vsel %vm10322_vm2, %v4618_v53, %v4614_v51  ;;  %v4693_v61 = vsel %vm1316_vm6, %v4692_v1, %v4688_v27  ;;  %v4623_v22 = vrot.slane %v10324_v59, %v7078_v25  ;;  %vm10325_vm8 = vmmov %vm10322_vm2  ;;  %v4707_v41 = vrot.slane %v8977_v60, %v7102_v45  ;;  %v10330_v34 = vld [vmem:[#allocation68_spill] sm:$0xff]  ;;  %v10332_v59 = vld [vmem:[#allocation59_spill] sm:$0xff] }
 0x63d   :  { %v4698_v63 = vsel %vm10325_vm8, %v4697_v15, %v4693_v61  ;;  %v4490_v40 = vrot.slane %v10326_v42, %v10254_v13  ;;  %vm10327_vm15 = vcmask 458112   ;;  %v4702_v1 = vrot.slane %v8929_v26, %v7078_v25  ;;  %v10328_v15 = vld [vmem:[#allocation66_spill] sm:$0xff] }
 0x63e   :  { %v4545_v27 = vsel %vm10327_vm15, %v4544_v57, %v4540_v11  ;;  %v4505_v51 = vrot.slane %v10328_v15, %v10268_v29  ;;  %vm10329_vm7 = vcmask 523712   ;;  %v4559_v31 = vrot.slane %v10330_v34, %v7119_v18  ;;  %vm10331_vm2 = vmmov %vm10327_vm15 }
 0x63f   :  { %v9066_v2 = vpop.permute.xlu1 %4109  ;;  %v9076_v56 = vpop.permute.xlu0 %4796  ;;  %v4550_v60 = vsel %vm10329_vm7, %v4549_v47, %v4545_v27  ;;  %v4624_v61 = vsel %vm10331_vm2, %v4623_v22, %v4619_v4  ;;  %v4554_v11 = vrot.slane %v10332_v59, %v7091_v10  ;;  %vm10333_vm8 = vmmov %vm10329_vm7  ;;  %v4638_v26 = vrot.slane %v8794_v50, %v7119_v18  ;;  %v10335_v47 = vld [vmem:[#allocation81_spill] sm:$0xff] }
 0x640   :  { %v4874_v30 = vmul.f32 %v9076_v56, %v8894_v28  ;;  %v4629_v57 = vsel %vm10333_vm8, %v4628_v3, %v4624_v61  ;;  %vm10334_vm15 = vmmov %vm10331_vm2  ;;  %v4633_v27 = vrot.slane %v10335_v47, %v7091_v10  ;;  %v4717_v4 = vrot.slane %v9005_v43, %v7119_v18  ;;  %v10337_v61 = vld [vmem:[#allocation18_spill] sm:$0xff] }
 0x641   :  { %v4703_v42 = vsel %vm10334_vm15, %v4702_v1, %v4698_v63  ;;  %v4491_v50 = vsel %vm1365_vm13, %v4490_v40, %v4486_v39  ;;  %v4555_v63 = vsel %vm1344_vm10, %v4554_v11, %v4550_v60  ;;  %v4569_v59 = vrot.slane %v10337_v61, %v10254_v13  ;;  %v10338_v39 = vld [vmem:[#allocation76_spill] sm:$0xff] }
 0x642   :  { %5131 = vperm.xlu0 %6266, %v4874_v30   ;;  %v4708_v34 = vsel %vm10329_vm7, %v4707_v41, %v4703_v42  ;;  %v10336_v41 = vld [vmem:[#allocation89_spill] sm:$0xff]  ;;  %v4560_v43 = vsel %vm1351_vm11, %v4559_v31, %v4555_v63  ;;  %v4634_v42 = vsel %vm1344_vm10, %v4633_v27, %v4629_v57  ;;  %v4564_v40 = vrot.slane %v10338_v39, %v7109_v16 }
 0x643   :  { %v9095_v55 = vpop.permute.xlu1 %4115  ;;  %v9104_v52 = vpop.permute.xlu0 %4804  ;;  %v4639_v60 = vsel %vm1351_vm11, %v4638_v26, %v4634_v42  ;;  %v4643_v31 = vrot.slane %v8785_v35, %v7109_v16  ;;  %v4727_v57 = vrot.slane %v9034_v44, %v10254_v13  ;;  %vm10339_vm2 = vcmask 720512   ;;  %v10341_v44 = vld [vmem:[#allocation61_spill] sm:$0xff] }
 0x644   :  { %v4876_v30 = vmul.f32 %v9104_v52, %v8894_v28  ;;  %vm10340_vm8 = vcmask 917312   ;;  %vm10342_vm15 = vmmov %vm10339_vm2  ;;  %v4737_v39 = vrot.slane %v9066_v2, %v10270_v36 }
 0x645   :  { %vm10344_vm7 = vmmov %vm10339_vm2 }
 0x646   :  { %5137 = vperm.xlu0 %6266, %v4876_v30  }
 0x647   :  { %v9124_v37 = vpop.permute.xlu1 %4800  ;;  %v9131_v54 = vpop.permute.xlu0 %4812 }
 0x648   :  { %v4875_v53 = vmul.f32 %v9124_v37, %v8894_v28  ;;  %v4878_v30 = vmul.f32 %v9131_v54, %v8894_v28 }
 0x64a   :  { %5134 = vperm.xlu1 %6265, %v4875_v53   ;;  %5143 = vperm.xlu0 %6266, %v4878_v30   ;;  %v4712_v53 = vrot.slane %v8957_v62, %v7091_v10  ;;  %v4500_v30 = vrot.slane %v10336_v41, %v10270_v36  ;;  %v4648_v62 = vrot.slane %v8811_v5, %v10254_v13 }
 0x64b   :  { %v9154_v15 = vpop.permute.xlu1 %4808  ;;  %v9161_v22 = vpop.permute.xlu0 %4820  ;;  %v4496_v5 = vsel %vm1372_vm14, %v4495_v48, %v4491_v50  ;;  %v4644_v41 = vsel %vm10342_vm15, %v4643_v31, %v4639_v60  ;;  %v10343_v48 = vld [vmem:[#allocation69_spill] sm:$0xff]  ;;  %v4732_v31 = vrot.slane %v9012_v9, %v10258_v21  ;;  %v4668_v9 = vrot.slane %v8862_v58, %v10285_v8 }
 0x64c   :  { %v4877_v3 = vmul.f32 %v9154_v15, %v8894_v28  ;;  %v4880_v1 = vmul.f32 %v9161_v22, %v8894_v28  ;;  %v4713_v11 = vsel %vm1344_vm10, %v4712_v53, %v4708_v34  ;;  %v4565_v34 = vsel %vm10339_vm2, %v4564_v40, %v4560_v43  ;;  %vm10346_vm2 = vmmov %vm10340_vm8 }
 0x64d   :  { %v4718_v63 = vsel %vm1351_vm11, %v4717_v4, %v4713_v11  ;;  %v4501_v4 = vsel %vm10340_vm8, %v4500_v30, %v4496_v5  ;;  %v4570_v53 = vsel %vm1365_vm13, %v4569_v59, %v4565_v34  ;;  %v4574_v50 = vrot.slane %v10343_v48, %v10258_v21  ;;  %v10348_v34 = vld [vmem:[#allocation19_spill] sm:$0xff]  ;;  %vm10349_vm8 = vmmov %vm10346_vm2 }
 0x64e   :  { %5140 = vperm.xlu1 %6265, %v4877_v3   ;;  %5149 = vperm.xlu0 %6266, %v4880_v1   ;;  %v4722_v3 = vrot.slane %v8985_v7, %v7109_v16  ;;  %v4579_v1 = vrot.slane %v10341_v44, %v10270_v36  ;;  %v4649_v43 = vsel %vm1365_vm13, %v4648_v62, %v4644_v41  ;;  %vm10350_vm15 = vmmov %vm10346_vm2 }
 0x64f   :  { %v9183_v47 = vpop.permute.xlu1 %4816  ;;  %v9190_v27 = vpop.permute.xlu0 %4828  ;;  %v4658_v7 = vrot.slane %v8835_v19, %v10270_v36  ;;  %v4653_v59 = vrot.slane %v8799_v14, %v10258_v21  ;;  %v10345_v19 = vld [vmem:[#allocation67_spill] sm:$0xff]  ;;  %v4575_v11 = vsel %vm1372_vm14, %v4574_v50, %v4570_v53 }
 0x650   :  { %v4879_v26 = vmul.f32 %v9183_v47, %v8894_v28  ;;  %v4882_v35 = vmul.f32 %v9190_v27, %v8894_v28  ;;  %v4723_v61 = vsel %vm10344_vm7, %v4722_v3, %v4718_v63  ;;  %v4510_v62 = vrot.slane %v10345_v19, %v10285_v8 }
 0x651   :  { %v4728_v42 = vsel %vm1365_vm13, %v4727_v57, %v4723_v61  ;;  %v4506_v63 = vsel %vm1386_vm0, %v4505_v51, %v4501_v4  ;;  %v4580_v2 = vsel %vm10346_vm2, %v4579_v1, %v4575_v11  ;;  %v10347_v57 = vld [vmem:[#allocation87_spill] sm:$0xff]  ;;  %v4654_v5 = vsel %vm1372_vm14, %v4653_v59, %v4649_v43 }
 0x652   :  { %5146 = vperm.xlu1 %6265, %v4879_v26   ;;  %5155 = vperm.xlu0 %6266, %v4882_v35   ;;  %v4589_v26 = vrot.slane %v10347_v57, %v10285_v8  ;;  %v4584_v3 = vrot.slane %v10348_v34, %v10268_v29  ;;  %v4659_v35 = vsel %vm10349_vm8, %v4658_v7, %v4654_v5  ;;  %vm10351_vm7 = vcmask 1042434   ;;  %v10356_v5 = vld [vmem:[#allocation50_spill] sm:$0xff] }
 0x653   :  { %v9211_v30 = vpop.permute.xlu1 %4824  ;;  %v9218_v40 = vpop.permute.xlu0 %4836  ;;  %v4733_v53 = vsel %vm1372_vm14, %v4732_v31, %v4728_v42  ;;  %v4663_v4 = vrot.slane %v8816_v33, %v10268_v29  ;;  %v4747_v1 = vrot.slane %v9095_v55, %v10285_v8  ;;  %v4511_v58 = vsel %vm1393_vm1, %v4510_v62, %v4506_v63  ;;  %v10354_v31 = vld [vmem:[#allocation23_spill] sm:$0xff] }
 0x654   :  { %v4881_v60 = vmul.f32 %v9211_v30, %v8894_v28  ;;  %v4884_v14 = vmul.f32 %v9218_v40, %v8894_v28  ;;  %v4738_v44 = vsel %vm10350_vm15, %v4737_v39, %v4733_v53  ;;  %v4585_v50 = vsel %vm1386_vm0, %v4584_v3, %v4580_v2 }
 0x655   :  { %v4742_v43 = vrot.slane %v9043_v0, %v10268_v29  ;;  %v4750_v7 = vsel %vm10351_vm7, %v9046_v38, %v9027_v12  ;;  %v4590_v55 = vsel %vm1393_vm1, %v4589_v26, %v4585_v50  ;;  %v4664_v61 = vsel %vm1386_vm0, %v4663_v4, %v4659_v35 }
 0x656   :  { %5152 = vperm.xlu1 %6265, %v4881_v60   ;;  %5161 = vperm.xlu0 %6266, %v4884_v14   ;;  %v4751_v59 = vsel %vm1952_vm12, %v9069_v46, %v4750_v7  ;;  %v4669_v42 = vsel %vm1393_vm1, %v4668_v9, %v4664_v61  ;;  %vm10352_vm2 = vcmask 1045509   ;;  %vm10353_vm8 = vcmask 1046534   ;;  %v10358_v61 = vld [vmem:[#allocation24_spill] sm:$0xff] }
 0x657   :  { %v9240_v51 = vpop.permute.xlu1 %4832  ;;  %v9247_v41 = vpop.permute.xlu0 %4844  ;;  %v4743_v39 = vsel %vm1386_vm0, %v4742_v43, %v4738_v44  ;;  %v4752_v60 = vsel %vm1954_vm9, %v4511_v58, %v4751_v59  ;;  %v4765_v14 = vrot.slane %v10354_v31, %v8686_v32  ;;  %vm10355_vm15 = vcmask 1047559  }
 0x658   :  { %v4883_v48 = vmul.f32 %v9240_v51, %v8894_v28  ;;  %v4886_v33 = vmul.f32 %v9247_v41, %v8894_v28  ;;  %v4748_v19 = vsel %vm1393_vm1, %v4747_v1, %v4743_v39  ;;  %v4753_v62 = vsel %vm10352_vm2, %v4590_v55, %v4752_v60 }
 0x659   :  { %v4754_v11 = vsel %vm10353_vm8, %v4669_v42, %v4753_v62  ;;  %v4890_v26 = vmul.f32 %v9076_v56, %v4765_v14  ;;  %v4892_v9 = vmul.f32 %v9104_v52, %v4765_v14  ;;  %v4891_v53 = vmul.f32 %v9124_v37, %v4765_v14 }
 0x65a   :  { %5158 = vperm.xlu1 %6265, %v4883_v48   ;;  %5167 = vperm.xlu0 %6266, %v4886_v33   ;;  %v4755_v2 = vsel %vm10355_vm15, %v4748_v19, %v4754_v11  ;;  %v4894_v4 = vmul.f32 %v9131_v54, %v4765_v14  ;;  %v4893_v44 = vmul.f32 %v9154_v15, %v4765_v14  ;;  %vm10362_vm7 = vcmask 392512  }
 0x65b   :  { %v9266_v0 = vpop.permute.xlu1 %4840  ;;  %v9270_v12 = vpop.permute.xlu0 %4852  ;;  %v9287_v34 = vadd.f32 %v4755_v2, %v10356_v5  ;;  %v4896_v1 = vmul.f32 %v9161_v22, %v4765_v14  ;;  %v4895_v48 = vmul.f32 %v9183_v47, %v4765_v14  ;;  %v4897_v58 = vmul.f32 %v9211_v30, %v4765_v14  ;;  %vm10363_vm2 = vmmov %vm10362_vm7 }
 0x65c   :  { %v4885_v38 = vmul.f32 %v9266_v0, %v8894_v28  ;;  %v4888_v46 = vmul.f32 %v9270_v12, %v8894_v28  ;;  %v4900_v50 = vmul.f32 %v9218_v40, %v4765_v14  ;;  %v4899_v43 = vmul.f32 %v9240_v51, %v4765_v14 }
 0x65d   :  { %10357 = vst [vmem:[#allocation84_spill] sm:$0xff] %v9287_v34  ;;  %v4902_v33 = vmul.f32 %v9247_v41, %v4765_v14  ;;  %v4901_v7 = vmul.f32 %v9266_v0, %v4765_v14  ;;  %v4904_v55 = vmul.f32 %v9270_v12, %v4765_v14  ;;  %v4769_v59 = vrot.slane %v10358_v61, %v8686_v32 }
 0x65e   :  { %5164 = vperm.xlu1 %6265, %v4885_v38   ;;  %5173 = vperm.xlu0 %6266, %v4888_v46   ;;  %vm10364_vm8 = vcmask 458112  }
 0x65f   :  { %v9280_v63 = vpop.permute.xlu1 %4848  ;;  %v4906_v39 = vmul.f32 %v9076_v56, %v4769_v59  ;;  %v4908_v19 = vmul.f32 %v9104_v52, %v4769_v59  ;;  %v4907_v38 = vmul.f32 %v9124_v37, %v4769_v59  ;;  %v4910_v62 = vmul.f32 %v9131_v54, %v4769_v59  ;;  %vm10365_vm15 = vmmov %vm10364_vm8 }
 0x660   :  { %v4887_v57 = vmul.f32 %v9280_v63, %v8894_v28  ;;  %v4903_v42 = vmul.f32 %v9280_v63, %v4765_v14  ;;  %v4909_v46 = vmul.f32 %v9154_v15, %v4769_v59  ;;  %v4912_v11 = vmul.f32 %v9161_v22, %v4769_v59 }
 0x661   :  { %v4911_v31 = vmul.f32 %v9183_v47, %v4769_v59  ;;  %v4913_v2 = vmul.f32 %v9211_v30, %v4769_v59  ;;  %v4918_v5 = vmul.f32 %v9247_v41, %v4769_v59 }
 0x662   :  { %5170 = vperm.xlu1 %6265, %v4887_v57   ;;  %5179 = vperm.xlu0 %6266, %v4890_v26   ;;  %v4916_v57 = vmul.f32 %v9218_v40, %v4769_v59  ;;  %v4915_v26 = vmul.f32 %v9240_v51, %v4769_v59 }
 0x663   :  { %v9289_v3 = vpop.permute.xlu1 %4856 }
 0x664   :  { %v4889_v35 = vmul.f32 %v9289_v3, %v8894_v28  ;;  %v4898_v28 = vmul.f32 %v9190_v27, %v4765_v14  ;;  %v4905_v60 = vmul.f32 %v9289_v3, %v4765_v14  ;;  %v4914_v14 = vmul.f32 %v9190_v27, %v4769_v59 }
 0x666   :  { %5176 = vperm.xlu1 %6265, %v4889_v35   ;;  %5185 = vperm.xlu0 %6266, %v4892_v9   ;;  %v4917_v35 = vmul.f32 %v9266_v0, %v4769_v59  ;;  %v4920_v9 = vmul.f32 %v9270_v12, %v4769_v59 }
 0x66a   :  { %5182 = vperm.xlu1 %6265, %v4891_v53   ;;  %5191 = vperm.xlu0 %6266, %v4894_v4   ;;  %v10359_v53 = vld [vmem:[#allocation25_spill] sm:$0xff] }
 0x66b   :  { %v4773_v4 = vrot.slane %v10359_v53, %v8686_v32 }
 0x66d   :  { %v4929_v61 = vmul.f32 %v9211_v30, %v4773_v4 }
 0x66e   :  { %5188 = vperm.xlu1 %6265, %v4893_v44   ;;  %5197 = vperm.xlu0 %6266, %v4896_v1   ;;  %v4919_v44 = vmul.f32 %v9280_v63, %v4769_v59  ;;  %v4922_v1 = vmul.f32 %v9076_v56, %v4773_v4 }
 0x672   :  { %5194 = vperm.xlu1 %6265, %v4895_v48   ;;  %5203 = vperm.xlu0 %6266, %v4898_v28   ;;  %v4921_v48 = vmul.f32 %v9289_v3, %v4769_v59  ;;  %v4924_v28 = vmul.f32 %v9104_v52, %v4773_v4  ;;  %v4932_v59 = vmul.f32 %v9218_v40, %v4773_v4 }
 0x676   :  { %5200 = vperm.xlu1 %6265, %v4897_v58   ;;  %5209 = vperm.xlu0 %6266, %v4900_v50   ;;  %v4923_v58 = vmul.f32 %v9124_v37, %v4773_v4  ;;  %v4926_v50 = vmul.f32 %v9131_v54, %v4773_v4 }
 0x67a   :  { %5206 = vperm.xlu1 %6265, %v4899_v43   ;;  %5215 = vperm.xlu0 %6266, %v4902_v33   ;;  %v4925_v43 = vmul.f32 %v9154_v15, %v4773_v4  ;;  %v4928_v33 = vmul.f32 %v9161_v22, %v4773_v4 }
 0x67e   :  { %5212 = vperm.xlu1 %6265, %v4901_v7   ;;  %5221 = vperm.xlu0 %6266, %v4904_v55   ;;  %v4927_v7 = vmul.f32 %v9183_v47, %v4773_v4  ;;  %v4930_v55 = vmul.f32 %v9190_v27, %v4773_v4 }
 0x682   :  { %5218 = vperm.xlu1 %6265, %v4903_v42   ;;  %5227 = vperm.xlu0 %6266, %v4906_v39   ;;  %v4931_v42 = vmul.f32 %v9240_v51, %v4773_v4  ;;  %v4934_v39 = vmul.f32 %v9247_v41, %v4773_v4 }
 0x686   :  { %5224 = vperm.xlu1 %6265, %v4905_v60   ;;  %5233 = vperm.xlu0 %6266, %v4908_v19   ;;  %v4933_v60 = vmul.f32 %v9266_v0, %v4773_v4  ;;  %v4936_v19 = vmul.f32 %v9270_v12, %v4773_v4 }
 0x68a   :  { %5230 = vperm.xlu1 %6265, %v4907_v38   ;;  %5239 = vperm.xlu0 %6266, %v4910_v62   ;;  %v10360_v62 = vld [vmem:[#allocation26_spill] sm:$0xff] }
 0x68e   :  { %5236 = vperm.xlu1 %6265, %v4909_v46   ;;  %5245 = vperm.xlu0 %6266, %v4912_v11   ;;  %v4777_v46 = vrot.slane %v10360_v62, %v8686_v32  ;;  %v4935_v11 = vmul.f32 %v9280_v63, %v4773_v4 }
 0x690   :  { %v4942_v53 = vmul.f32 %v9131_v54, %v4777_v46  ;;  %v4949_v62 = vmul.f32 %v9266_v0, %v4777_v46 }
 0x692   :  { %5242 = vperm.xlu1 %6265, %v4911_v31   ;;  %5251 = vperm.xlu0 %6266, %v4914_v14   ;;  %v4938_v31 = vmul.f32 %v9076_v56, %v4777_v46 }
 0x696   :  { %5248 = vperm.xlu1 %6265, %v4913_v2   ;;  %5257 = vperm.xlu0 %6266, %v4916_v57   ;;  %v4937_v2 = vmul.f32 %v9289_v3, %v4773_v4 }
 0x69a   :  { %5254 = vperm.xlu1 %6265, %v4915_v26   ;;  %5263 = vperm.xlu0 %6266, %v4918_v5   ;;  %v4940_v26 = vmul.f32 %v9104_v52, %v4777_v46 }
 0x69e   :  { %5260 = vperm.xlu1 %6265, %v4917_v35   ;;  %5269 = vperm.xlu0 %6266, %v4920_v9   ;;  %v4939_v35 = vmul.f32 %v9124_v37, %v4777_v46 }
 0x6a2   :  { %5266 = vperm.xlu1 %6265, %v4919_v44   ;;  %5275 = vperm.xlu0 %6266, %v4922_v1   ;;  %v4941_v1 = vmul.f32 %v9154_v15, %v4777_v46 }
 0x6a6   :  { %5272 = vperm.xlu1 %6265, %v4921_v48   ;;  %5281 = vperm.xlu0 %6266, %v4924_v28   ;;  %v4944_v48 = vmul.f32 %v9161_v22, %v4777_v46 }
 0x6aa   :  { %5278 = vperm.xlu1 %6265, %v4923_v58   ;;  %5287 = vperm.xlu0 %6266, %v4926_v50   ;;  %v4943_v58 = vmul.f32 %v9183_v47, %v4777_v46 }
 0x6ae   :  { %5284 = vperm.xlu1 %6265, %v4925_v43   ;;  %5293 = vperm.xlu0 %6266, %v4928_v33   ;;  %v4946_v43 = vmul.f32 %v9190_v27, %v4777_v46 }
 0x6b2   :  { %5290 = vperm.xlu1 %6265, %v4927_v7   ;;  %5299 = vperm.xlu0 %6266, %v4930_v55   ;;  %v4945_v7 = vmul.f32 %v9211_v30, %v4777_v46 }
 0x6b6   :  { %5296 = vperm.xlu1 %6265, %v4929_v61   ;;  %5305 = vperm.xlu0 %6266, %v4932_v59   ;;  %v4948_v61 = vmul.f32 %v9218_v40, %v4777_v46 }
 0x6ba   :  { %5302 = vperm.xlu1 %6265, %v4931_v42   ;;  %5311 = vperm.xlu0 %6266, %v4934_v39   ;;  %v4947_v42 = vmul.f32 %v9240_v51, %v4777_v46 }
 0x6bd   :  { %v9342_v38 = vpop.permute.xlu0 %5131 }
 0x6be   :  { %5308 = vperm.xlu1 %6265, %v4933_v60   ;;  %5317 = vperm.xlu0 %6266, %v4936_v19   ;;  %v4950_v60 = vmul.f32 %v9247_v41, %v4777_v46 }
 0x6c1   :  { %v9348_v14 = vpop.permute.xlu0 %5137 }
 0x6c2   :  { %5314 = vperm.xlu1 %6265, %v4935_v11   ;;  %5323 = vperm.xlu0 %6266, %v4938_v31   ;;  %v4952_v31 = vmul.f32 %v9270_v12, %v4777_v46 }
 0x6c5   :  { %v5135_v57 = vpop.permute.xlu1 %5134  ;;  %v9352_v5 = vpop.permute.xlu0 %5143 }
 0x6c6   :  { %5320 = vperm.xlu1 %6265, %v4937_v2   ;;  %5329 = vperm.xlu0 %6266, %v4940_v26   ;;  %v10361_v26 = vld [vmem:[#allocation29_spill] sm:$0xff] }
 0x6c9   :  { %v9355_v9 = vpop.permute.xlu1 %5140  ;;  %v9358_v44 = vpop.permute.xlu0 %5149 }
 0x6ca   :  { %5326 = vperm.xlu1 %6265, %v4939_v35   ;;  %5335 = vperm.xlu0 %6266, %v4942_v53   ;;  %v9390_v35 = vrot.slane %v10361_v26, %v8686_v32  ;;  %v4951_v53 = vmul.f32 %v9280_v63, %v4777_v46 }
 0x6cd   :  { %v9361_v4 = vpop.permute.xlu1 %5146  ;;  %v9364_v28 = vpop.permute.xlu0 %5155 }
 0x6ce   :  { %5332 = vperm.xlu1 %6265, %v4941_v1   ;;  %5341 = vperm.xlu0 %6266, %v4944_v48   ;;  %v4954_v48 = vmul.f32 %v9076_v56, %v9390_v35 }
 0x6d1   :  { %v9367_v50 = vpop.permute.xlu1 %5152  ;;  %v9370_v33 = vpop.permute.xlu0 %5161 }
 0x6d2   :  { %5338 = vperm.xlu1 %6265, %v4943_v58   ;;  %5347 = vperm.xlu0 %6266, %v4946_v43   ;;  %v5521_v43 = vrot.slane %v5135_v57, %v7064_v17  ;;  %v5531_v57 = vrot.slane %v9355_v9, %v7075_v20 }
 0x6d5   :  { %v9373_v55 = vpop.permute.xlu1 %5158  ;;  %v9376_v59 = vpop.permute.xlu0 %5167 }
 0x6d6   :  { %5344 = vperm.xlu1 %6265, %v4945_v7   ;;  %5353 = vperm.xlu0 %6266, %v4948_v61   ;;  %v4953_v7 = vmul.f32 %v9289_v3, %v4777_v46 }
 0x6d9   :  { %v9379_v39 = vpop.permute.xlu1 %5164  ;;  %v9382_v19 = vpop.permute.xlu0 %5173 }
 0x6da   :  { %5350 = vperm.xlu1 %6265, %v4947_v42   ;;  %5359 = vperm.xlu0 %6266, %v4950_v60   ;;  %v4956_v42 = vmul.f32 %v9104_v52, %v9390_v35  ;;  %v5517_v60 = vrot.slane %v9342_v38, %v7061_v24  ;;  %v5526_v38 = vrot.slane %v9348_v14, %v7068_v23 }
 0x6db   :  { %v5541_v14 = vrot.slane %v9361_v4, %v7084_v49 }
 0x6dd   :  { %v9385_v11 = vpop.permute.xlu1 %5170  ;;  %v5180_v2 = vpop.permute.xlu0 %5179 }
 0x6de   :  { %5356 = vperm.xlu1 %6265, %v4949_v62   ;;  %5365 = vperm.xlu0 %6266, %v4952_v31   ;;  %v5596_v62 = vrot.slane %v5180_v2, %v7061_v24 }
 0x6e1   :  { %v9393_v1 = vpop.permute.xlu1 %5176  ;;  %v5186_v58 = vpop.permute.xlu0 %5185 }
 0x6e2   :  { %5362 = vperm.xlu1 %6265, %v4951_v53   ;;  %5371 = vperm.xlu0 %6266, %v4954_v48   ;;  %v5522_v53 = vsel %vm1295_vm3, %v5521_v43, %v5517_v60  ;;  %v4955_v48 = vmul.f32 %v9124_v37, %v9390_v35  ;;  %v5605_v2 = vrot.slane %v5186_v58, %v7068_v23 }
 0x6e3   :  { %v5527_v9 = vsel %vm1302_vm4, %v5526_v38, %v5522_v53  ;;  %v4960_v53 = vmul.f32 %v9161_v22, %v9390_v35 }
 0x6e4   :  { %v5532_v60 = vsel %vm1309_vm5, %v5531_v57, %v5527_v9 }
 0x6e5   :  { %v5183_v61 = vpop.permute.xlu1 %5182  ;;  %v5192_v26 = vpop.permute.xlu0 %5191 }
 0x6e6   :  { %v5600_v31 = vrot.slane %v5183_v61, %v7064_v17  ;;  %5368 = vperm.xlu1 %6265, %v4953_v7   ;;  %5377 = vperm.xlu0 %6266, %v4956_v42   ;;  %v4958_v7 = vmul.f32 %v9131_v54, %v9390_v35 }
 0x6e8   :  { %v5601_v46 = vsel %vm1295_vm3, %v5600_v31, %v5596_v62  ;;  %v4957_v62 = vmul.f32 %v9154_v15, %v9390_v35  ;;  %v5615_v31 = vrot.slane %v5192_v26, %v7072_v6 }
 0x6e9   :  { %v5189_v34 = vpop.permute.xlu1 %5188  ;;  %v5198_v43 = vpop.permute.xlu0 %5197  ;;  %v5606_v42 = vsel %vm1302_vm4, %v5605_v2, %v5601_v46 }
 0x6ea   :  { %v5610_v61 = vrot.slane %v5189_v34, %v7075_v20  ;;  %5374 = vperm.xlu1 %6265, %v4955_v48   ;;  %5383 = vperm.xlu0 %6266, %v4958_v7   ;;  %v5536_v34 = vrot.slane %v9352_v5, %v7072_v6  ;;  %v5551_v5 = vrot.slane %v9367_v50, %v7102_v45 }
 0x6eb   :  { %v4959_v7 = vmul.f32 %v9183_v47, %v9390_v35  ;;  %v5625_v9 = vrot.slane %v5198_v43, %v7078_v25 }
 0x6ec   :  { %v5611_v58 = vsel %vm1309_vm5, %v5610_v61, %v5606_v42  ;;  %v5537_v4 = vsel %vm1316_vm6, %v5536_v34, %v5532_v60  ;;  %v5546_v61 = vrot.slane %v9358_v44, %v7078_v25  ;;  %v4962_v60 = vmul.f32 %v9190_v27, %v9390_v35 }
 0x6ed   :  { %v5195_v48 = vpop.permute.xlu1 %5194  ;;  %v5204_v57 = vpop.permute.xlu0 %5203  ;;  %v5616_v38 = vsel %vm1316_vm6, %v5615_v31, %v5611_v58  ;;  %v5542_v2 = vsel %vm10362_vm7, %v5541_v14, %v5537_v4  ;;  %vm10366_vm7 = vcmask 523712   ;;  %v5561_v44 = vrot.slane %v9373_v55, %v7119_v18 }
 0x6ee   :  { %v5620_v46 = vrot.slane %v5195_v48, %v7084_v49  ;;  %5380 = vperm.xlu1 %6265, %v4957_v62   ;;  %5389 = vperm.xlu0 %6266, %v4960_v53   ;;  %v5547_v50 = vsel %vm10364_vm8, %v5546_v61, %v5542_v2  ;;  %v4961_v31 = vmul.f32 %v9211_v30, %v9390_v35  ;;  %vm10368_vm8 = vcmask 720512  }
 0x6ef   :  { %v5552_v34 = vsel %vm10366_vm7, %v5551_v5, %v5547_v50  ;;  %v5556_v48 = vrot.slane %v9364_v28, %v7091_v10  ;;  %v5635_v53 = vrot.slane %v5204_v57, %v7091_v10  ;;  %v4964_v4 = vmul.f32 %v9218_v40, %v9390_v35 }
 0x6f0   :  { %v5621_v26 = vsel %vm10363_vm2, %v5620_v46, %v5616_v38  ;;  %vm10367_vm2 = vmmov %vm10366_vm7  ;;  %v5571_v28 = vrot.slane %v9379_v39, %v10254_v13  ;;  %v5566_v61 = vrot.slane %v9370_v33, %v7109_v16  ;;  %v5581_v33 = vrot.slane %v9385_v11, %v10270_v36  ;;  %v10370_v11 = vld [vmem:[#allocation38_spill] sm:$0xff] }
 0x6f1   :  { %v5201_v42 = vpop.permute.xlu1 %5200  ;;  %v5210_v14 = vpop.permute.xlu0 %5209  ;;  %v5626_v62 = vsel %vm10365_vm15, %v5625_v9, %v5621_v26  ;;  %v5557_v55 = vsel %vm1344_vm10, %v5556_v48, %v5552_v34  ;;  %vm10369_vm15 = vmmov %vm10368_vm8  ;;  %vm10371_vm7 = vcmask 917312  }
 0x6f2   :  { %v5630_v58 = vrot.slane %v5201_v42, %v7102_v45  ;;  %5386 = vperm.xlu1 %6265, %v4959_v7   ;;  %5395 = vperm.xlu0 %6266, %v4962_v60   ;;  %v5562_v26 = vsel %vm1351_vm11, %v5561_v44, %v5557_v55  ;;  %v4963_v7 = vmul.f32 %v9240_v51, %v9390_v35 }
 0x6f3   :  { %v5645_v9 = vrot.slane %v5210_v14, %v7109_v16  ;;  %v4966_v60 = vmul.f32 %v9247_v41, %v9390_v35  ;;  %v5567_v39 = vsel %vm10368_vm8, %v5566_v61, %v5562_v26  ;;  %v9490_v55 = vrot.slane %v10370_v11, %v8686_v32 }
 0x6f4   :  { %v5631_v43 = vsel %vm10367_vm2, %v5630_v58, %v5626_v62  ;;  %v5572_v44 = vsel %vm1365_vm13, %v5571_v28, %v5567_v39  ;;  %v5591_v28 = vrot.slane %v9393_v1, %v10285_v8  ;;  %vm10372_vm2 = vmmov %vm10371_vm7  ;;  %v5586_v61 = vrot.slane %v9382_v19, %v10268_v29 }
 0x6f5   :  { %v5207_v46 = vpop.permute.xlu1 %5206  ;;  %v5216_v2 = vpop.permute.xlu0 %5215  ;;  %v5636_v5 = vsel %vm1344_vm10, %v5635_v53, %v5631_v43  ;;  %v4965_v43 = vmul.f32 %v9266_v0, %v9390_v35  ;;  %v4969_v19 = vmul.f32 %v9289_v3, %v9390_v35  ;;  %vm10373_vm8 = vcmask 1041409  }
 0x6f6   :  { %v5640_v38 = vrot.slane %v5207_v46, %v7119_v18  ;;  %5392 = vperm.xlu1 %6265, %v4961_v31   ;;  %5401 = vperm.xlu0 %6266, %v4964_v4   ;;  %v5576_v31 = vrot.slane %v9376_v59, %v10258_v21  ;;  %v5655_v48 = vrot.slane %v5216_v2, %v10258_v21 }
 0x6f7   :  { %v4968_v46 = vmul.f32 %v9270_v12, %v9390_v35 }
 0x6f8   :  { %v5641_v57 = vsel %vm1351_vm11, %v5640_v38, %v5636_v5  ;;  %v5577_v5 = vsel %vm1372_vm14, %v5576_v31, %v5572_v44 }
 0x6f9   :  { %v5213_v42 = vpop.permute.xlu1 %5212  ;;  %v5222_v50 = vpop.permute.xlu0 %5221  ;;  %v5646_v62 = vsel %vm10369_vm15, %v5645_v9, %v5641_v57  ;;  %v5582_v2 = vsel %vm10371_vm7, %v5581_v33, %v5577_v5  ;;  %vm10374_vm15 = vcmask 392512   ;;  %vm10375_vm7 = vcmask 458112  }
 0x6fa   :  { %v5650_v58 = vrot.slane %v5213_v42, %v10254_v13  ;;  %5398 = vperm.xlu1 %6265, %v4963_v7   ;;  %v5665_v34 = vrot.slane %v5222_v50, %v10268_v29  ;;  %5407 = vperm.xlu0 %6266, %v4966_v60   ;;  %v4967_v7 = vmul.f32 %v9280_v63, %v9390_v35 }
 0x6fb   :  { %v4970_v60 = vmul.f32 %v9076_v56, %v9490_v55  ;;  %v5587_v1 = vsel %vm1386_vm0, %v5586_v61, %v5582_v2 }
 0x6fc   :  { %v5651_v14 = vsel %vm1365_vm13, %v5650_v58, %v5646_v62  ;;  %v5592_v62 = vsel %vm1393_vm1, %v5591_v28, %v5587_v1 }
 0x6fd   :  { %v5219_v53 = vpop.permute.xlu1 %5218  ;;  %v5228_v38 = vpop.permute.xlu0 %5227  ;;  %v5656_v26 = vsel %vm1372_vm14, %v5655_v48, %v5651_v14  ;;  %v4972_v14 = vmul.f32 %v9104_v52, %v9490_v55 }
 0x6fe   :  { %v5660_v4 = vrot.slane %v5219_v53, %v10270_v36  ;;  %5404 = vperm.xlu1 %6265, %v4965_v43   ;;  %v5675_v59 = vrot.slane %v5228_v38, %v7061_v24  ;;  %5413 = vperm.xlu0 %6266, %v4968_v46   ;;  %v4971_v46 = vmul.f32 %v9124_v37, %v9490_v55 }
 0x6ff   :  { %v4974_v38 = vmul.f32 %v9131_v54, %v9490_v55 }
 0x700   :  { %v5661_v57 = vsel %vm10372_vm2, %v5660_v4, %v5656_v26  ;;  %vm10376_vm2 = vcmask 523712  }
 0x701   :  { %v5225_v9 = vpop.permute.xlu1 %5224  ;;  %v5666_v42 = vsel %vm1386_vm0, %v5665_v34, %v5661_v57  ;;  %v5234_v50 = vpop.permute.xlu0 %5233 }
 0x702   :  { %v5670_v58 = vrot.slane %v5225_v9, %v10285_v8  ;;  %5410 = vperm.xlu1 %6265, %v4967_v7   ;;  %v5684_v39 = vrot.slane %v5234_v50, %v7068_v23  ;;  %5419 = vperm.xlu0 %6266, %v4970_v60   ;;  %v4976_v7 = vmul.f32 %v9161_v22, %v9490_v55 }
 0x704   :  { %v5671_v44 = vsel %vm1393_vm1, %v5670_v58, %v5666_v42  ;;  %v4975_v58 = vmul.f32 %v9183_v47, %v9490_v55 }
 0x705   :  { %v9514_v34 = vsel %vm10373_vm8, %v5671_v44, %v5592_v62  ;;  %v5231_v33 = vpop.permute.xlu1 %5230  ;;  %v5240_v31 = vpop.permute.xlu0 %5239  ;;  %vm10378_vm8 = vcmask 720512  }
 0x706   :  { %v5679_v43 = vrot.slane %v5231_v33, %v7064_v17  ;;  %5416 = vperm.xlu1 %6265, %v4969_v19   ;;  %v5694_v48 = vrot.slane %v5240_v31, %v7072_v6  ;;  %5425 = vperm.xlu0 %6266, %v4972_v14   ;;  %v4977_v14 = vmul.f32 %v9211_v30, %v9490_v55 }
 0x708   :  { %v5680_v53 = vsel %vm1295_vm3, %v5679_v43, %v5675_v59  ;;  %v4973_v59 = vmul.f32 %v9154_v15, %v9490_v55 }
 0x709   :  { %v5237_v35 = vpop.permute.xlu1 %5236  ;;  %v5685_v4 = vsel %vm1302_vm4, %v5684_v39, %v5680_v53  ;;  %v5246_v5 = vpop.permute.xlu0 %5245  ;;  %v4978_v39 = vmul.f32 %v9190_v27, %v9490_v55 }
 0x70a   :  { %v5689_v11 = vrot.slane %v5237_v35, %v7075_v20  ;;  %5422 = vperm.xlu1 %6265, %v4971_v46   ;;  %v5704_v26 = vrot.slane %v5246_v5, %v7078_v25  ;;  %5431 = vperm.xlu0 %6266, %v4974_v38   ;;  %v10377_v35 = vld [vmem:[#allocation47_spill] sm:$0xff]  ;;  %v4979_v5 = vmul.f32 %v9240_v51, %v9490_v55 }
 0x70c   :  { %v5690_v2 = vsel %vm1309_vm5, %v5689_v11, %v5685_v4  ;;  %v9553_v4 = vrot.slane %v10377_v35, %v8686_v32 }
 0x70d   :  { %v5243_v28 = vpop.permute.xlu1 %5242  ;;  %v5695_v57 = vsel %vm1316_vm6, %v5694_v48, %v5690_v2  ;;  %v5252_v9 = vpop.permute.xlu0 %5251  ;;  %v4980_v48 = vmul.f32 %v9218_v40, %v9490_v55 }
 0x70e   :  { %v5699_v61 = vrot.slane %v5243_v28, %v7084_v49  ;;  %5428 = vperm.xlu1 %6265, %v4973_v59   ;;  %v5714_v42 = vrot.slane %v5252_v9, %v7091_v10  ;;  %5437 = vperm.xlu0 %6266, %v4976_v7   ;;  %v4987_v59 = vmul.f32 %v9124_v37, %v9553_v4 }
 0x710   :  { %v5700_v60 = vsel %vm10374_vm15, %v5699_v61, %v5695_v57  ;;  %v4986_v61 = vmul.f32 %v9076_v56, %v9553_v4  ;;  %vm10379_vm15 = vcmask 917312  }
 0x711   :  { %v5249_v50 = vpop.permute.xlu1 %5248  ;;  %v5705_v1 = vsel %vm10375_vm7, %v5704_v26, %v5700_v60  ;;  %v5258_v44 = vpop.permute.xlu0 %5257  ;;  %v4989_v60 = vmul.f32 %v9154_v15, %v9553_v4  ;;  %vm10380_vm7 = vcmask 1042434  }
 0x712   :  { %v5709_v62 = vrot.slane %v5249_v50, %v7102_v45  ;;  %5434 = vperm.xlu1 %6265, %v4975_v58   ;;  %v5724_v19 = vrot.slane %v5258_v44, %v7109_v16  ;;  %5443 = vperm.xlu0 %6266, %v4978_v39   ;;  %v4988_v39 = vmul.f32 %v9104_v52, %v9553_v4 }
 0x713   :  { %v4991_v44 = vmul.f32 %v9183_v47, %v9553_v4  ;;  %v4993_v47 = vmul.f32 %v9211_v30, %v9553_v4 }
 0x714   :  { %v5710_v33 = vsel %vm10376_vm2, %v5709_v62, %v5705_v1  ;;  %vm10381_vm2 = vcmask 392512  }
 0x715   :  { %v5255_v43 = vpop.permute.xlu1 %5254  ;;  %v5715_v31 = vsel %vm1344_vm10, %v5714_v42, %v5710_v33  ;;  %v5264_v46 = vpop.permute.xlu0 %5263 }
 0x716   :  { %v5719_v53 = vrot.slane %v5255_v43, %v7119_v18  ;;  %5440 = vperm.xlu1 %6265, %v4977_v14   ;;  %v5734_v38 = vrot.slane %v5264_v46, %v10258_v21  ;;  %5449 = vperm.xlu0 %6266, %v4980_v48   ;;  %v4990_v43 = vmul.f32 %v9131_v54, %v9553_v4 }
 0x717   :  { %v4992_v54 = vmul.f32 %v9161_v22, %v9553_v4 }
 0x718   :  { %v5720_v11 = vsel %vm1351_vm11, %v5719_v53, %v5715_v31 }
 0x719   :  { %v5261_v26 = vpop.permute.xlu1 %5260  ;;  %v5725_v2 = vsel %vm10378_vm8, %v5724_v19, %v5720_v11  ;;  %v5270_v57 = vpop.permute.xlu0 %5269  ;;  %v4995_v11 = vmul.f32 %v9240_v51, %v9553_v4  ;;  %vm10382_vm8 = vcmask 458112  }
 0x71a   :  { %v5729_v28 = vrot.slane %v5261_v26, %v10254_v13  ;;  %5446 = vperm.xlu1 %6265, %v4979_v5   ;;  %v5744_v32 = vrot.slane %v5270_v57, %v10268_v29  ;;  %5470 = vperm.xlu0 %6266, %v4987_v59   ;;  %v4994_v59 = vmul.f32 %v9190_v27, %v9553_v4 }
 0x71b   :  { %v4996_v57 = vmul.f32 %v9218_v40, %v9553_v4 }
 0x71c   :  { %v5730_v7 = vsel %vm1365_vm13, %v5729_v28, %v5725_v2 }
 0x71d   :  { %v5267_v9 = vpop.permute.xlu1 %5266  ;;  %v5735_v42 = vsel %vm1372_vm14, %v5734_v38, %v5730_v7  ;;  %v5276_v58 = vpop.permute.xlu0 %5275 }
 0x71e   :  { %v5739_v37 = vrot.slane %v5267_v9, %v10270_v36  ;;  %5467 = vperm.xlu1 %6265, %v4986_v61   ;;  %v5754_v50 = vrot.slane %v5276_v58, %v7061_v24  ;;  %5476 = vperm.xlu0 %6266, %v4989_v60   ;;  %v4981_v9 = vmul.f32 %v9266_v0, %v9490_v55 }
 0x71f   :  { %v4997_v60 = vmul.f32 %v9266_v0, %v9553_v4 }
 0x720   :  { %v5740_v1 = vsel %vm10379_vm15, %v5739_v37, %v5735_v42  ;;  %vm10383_vm15 = vcmask 523712  }
 0x721   :  { %v5273_v62 = vpop.permute.xlu1 %5272  ;;  %v5745_v56 = vsel %vm1386_vm0, %v5744_v32, %v5740_v1  ;;  %v5282_v19 = vpop.permute.xlu0 %5281  ;;  %v4982_v1 = vmul.f32 %v9247_v41, %v9490_v55 }
 0x722   :  { %v5749_v15 = vrot.slane %v5273_v62, %v10285_v8  ;;  %5473 = vperm.xlu1 %6265, %v4988_v39   ;;  %v5763_v33 = vrot.slane %v5282_v19, %v7068_v23  ;;  %5482 = vperm.xlu0 %6266, %v4991_v44  }
 0x724   :  { %v5750_v14 = vsel %vm1393_vm1, %v5749_v15, %v5745_v56  ;;  %v4998_v56 = vmul.f32 %v9247_v41, %v9553_v4 }
 0x725   :  { %v9585_v52 = vsel %vm10380_vm7, %v5750_v14, %v9514_v34  ;;  %v5279_v31 = vpop.permute.xlu1 %5278  ;;  %v5288_v53 = vpop.permute.xlu0 %5287  ;;  %vm10384_vm7 = vcmask 720512  }
 0x726   :  { %v5758_v48 = vrot.slane %v5279_v31, %v7064_v17  ;;  %5479 = vperm.xlu1 %6265, %v4990_v43   ;;  %v5773_v46 = vrot.slane %v5288_v53, %v7072_v6  ;;  %5488 = vperm.xlu0 %6266, %v4993_v47   ;;  %v4999_v31 = vmul.f32 %v9280_v63, %v9553_v4 }
 0x728   :  { %v5759_v35 = vsel %vm1295_vm3, %v5758_v48, %v5754_v50 }
 0x729   :  { %v5285_v38 = vpop.permute.xlu1 %5284  ;;  %v5764_v34 = vsel %vm1302_vm4, %v5763_v33, %v5759_v35  ;;  %v5294_v5 = vpop.permute.xlu0 %5293  ;;  %v4983_v33 = vmul.f32 %v9280_v63, %v9490_v55 }
 0x72a   :  { %v5768_v30 = vrot.slane %v5285_v38, %v7075_v20  ;;  %5485 = vperm.xlu1 %6265, %v4992_v54   ;;  %v5783_v26 = vrot.slane %v5294_v5, %v7078_v25  ;;  %5494 = vperm.xlu0 %6266, %v4995_v11   ;;  %v5000_v38 = vmul.f32 %v9270_v12, %v9553_v4 }
 0x72b   :  { %v4985_v5 = vmul.f32 %v9289_v3, %v9490_v55 }
 0x72c   :  { %v5769_v2 = vsel %vm1309_vm5, %v5768_v30, %v5764_v34 }
 0x72d   :  { %v5291_v28 = vpop.permute.xlu1 %5290  ;;  %v5774_v22 = vsel %vm1316_vm6, %v5773_v46, %v5769_v2  ;;  %v5300_v32 = vpop.permute.xlu0 %5299  ;;  %v4984_v46 = vmul.f32 %v9270_v12, %v9490_v55 }
 0x72e   :  { %v5778_v51 = vrot.slane %v5291_v28, %v7084_v49  ;;  %5491 = vperm.xlu1 %6265, %v4994_v59   ;;  %v5793_v7 = vrot.slane %v5300_v32, %v7091_v10  ;;  %5497 = vperm.xlu0 %6266, %v4996_v57   ;;  %v5001_v57 = vmul.f32 %v9289_v3, %v9553_v4 }
 0x730   :  { %v5779_v61 = vsel %vm10381_vm2, %v5778_v51, %v5774_v22  ;;  %vm10385_vm2 = vcmask 917312  }
 0x731   :  { %v5297_v42 = vpop.permute.xlu1 %5296  ;;  %v5784_v27 = vsel %vm10382_vm8, %v5783_v26, %v5779_v61  ;;  %v5306_v37 = vpop.permute.xlu0 %5305 }
 0x732   :  { %v5788_v40 = vrot.slane %v5297_v42, %v7102_v45  ;;  %5452 = vperm.xlu1 %6265, %v4981_v9   ;;  %v5803_v58 = vrot.slane %v5306_v37, %v7109_v16  ;;  %5500 = vperm.xlu0 %6266, %v4997_v60  }
 0x734   :  { %v5789_v50 = vsel %vm10383_vm15, %v5788_v40, %v5784_v27 }
 0x735   :  { %v5303_v39 = vpop.permute.xlu1 %5302  ;;  %v5794_v62 = vsel %vm1344_vm10, %v5793_v7, %v5789_v50  ;;  %v5312_v44 = vpop.permute.xlu0 %5311 }
 0x736   :  { %v5798_v0 = vrot.slane %v5303_v39, %v7119_v18  ;;  %5455 = vperm.xlu1 %6265, %v4982_v1   ;;  %v5813_v15 = vrot.slane %v5312_v44, %v10258_v21  ;;  %5503 = vperm.xlu0 %6266, %v4998_v56  }
 0x738   :  { %v5799_v19 = vsel %vm1351_vm11, %v5798_v0, %v5794_v62 }
 0x739   :  { %v5309_v14 = vpop.permute.xlu1 %5308  ;;  %v5804_v43 = vsel %vm10384_vm7, %v5803_v58, %v5799_v19  ;;  %v5318_v47 = vpop.permute.xlu0 %5317 }
 0x73a   :  { %v5808_v41 = vrot.slane %v5309_v14, %v10254_v13  ;;  %5458 = vperm.xlu1 %6265, %v4983_v33   ;;  %v5823_v48 = vrot.slane %v5318_v47, %v10268_v29  ;;  %5506 = vperm.xlu0 %6266, %v4999_v31  }
 0x73c   :  { %v5809_v53 = vsel %vm1365_vm13, %v5808_v41, %v5804_v43 }
 0x73d   :  { %v5315_v35 = vpop.permute.xlu1 %5314  ;;  %v5814_v54 = vsel %vm1372_vm14, %v5813_v15, %v5809_v53  ;;  %v5324_v34 = vpop.permute.xlu0 %5323 }
 0x73e   :  { %v5818_v63 = vrot.slane %v5315_v35, %v10270_v36  ;;  %5461 = vperm.xlu1 %6265, %v4984_v46   ;;  %v5833_v11 = vrot.slane %v5324_v34, %v7061_v24  ;;  %5509 = vperm.xlu0 %6266, %v5000_v38  }
 0x740   :  { %v5819_v30 = vsel %vm10385_vm2, %v5818_v63, %v5814_v54 }
 0x741   :  { %v5321_v26 = vpop.permute.xlu1 %5320  ;;  %v5824_v2 = vsel %vm1386_vm0, %v5823_v48, %v5819_v30  ;;  %v5330_v28 = vpop.permute.xlu0 %5329 }
 0x742   :  { %v5828_v59 = vrot.slane %v5321_v26, %v10285_v8  ;;  %5464 = vperm.xlu1 %6265, %v4985_v5   ;;  %v5842_v12 = vrot.slane %v5330_v28, %v7068_v23 }
 0x744   :  { %v5829_v22 = vsel %vm1393_vm1, %v5828_v59, %v5824_v2 }
 0x745   :  { %v6148_v51 = vsel %vm1952_vm12, %v5829_v22, %v9585_v52  ;;  %v5327_v32 = vpop.permute.xlu1 %5326  ;;  %v5336_v7 = vpop.permute.xlu0 %5335  ;;  %vm10386_vm12 = vcmask 392512  }
 0x746   :  { %v5837_v55 = vrot.slane %v5327_v32, %v7064_v17  ;;  %5512 = vperm.xlu1 %6265, %v5001_v57   ;;  %v5852_v61 = vrot.slane %v5336_v7, %v7072_v6 }
 0x748   :  { %v5838_v9 = vsel %vm1295_vm3, %v5837_v55, %v5833_v11 }
 0x749   :  { %v5333_v42 = vpop.permute.xlu1 %5332  ;;  %v5843_v27 = vsel %vm1302_vm4, %v5842_v12, %v5838_v9  ;;  %v5342_v40 = vpop.permute.xlu0 %5341 }
 0x74a   :  { %v5847_v60 = vrot.slane %v5333_v42, %v7075_v20  ;;  %v5862_v3 = vrot.slane %v5342_v40, %v7078_v25 }
 0x74c   :  { %v5848_v4 = vsel %vm1309_vm5, %v5847_v60, %v5843_v27 }
 0x74d   :  { %v5339_v52 = vpop.permute.xlu1 %5338  ;;  %v5853_v37 = vsel %vm1316_vm6, %v5852_v61, %v5848_v4  ;;  %v5348_v50 = vpop.permute.xlu0 %5347 }
 0x74e   :  { %v5857_v58 = vrot.slane %v5339_v52, %v7084_v49  ;;  %v5872_v1 = vrot.slane %v5348_v50, %v7091_v10 }
 0x750   :  { %v5858_v39 = vsel %vm10386_vm12, %v5857_v58, %v5853_v37 }
 0x751   :  { %v5345_v62 = vpop.permute.xlu1 %5344  ;;  %v5863_v56 = vsel %vm10382_vm8, %v5862_v3, %v5858_v39  ;;  %v5354_v44 = vpop.permute.xlu0 %5353 }
 0x752   :  { %v5867_v0 = vrot.slane %v5345_v62, %v7102_v45  ;;  %v5882_v15 = vrot.slane %v5354_v44, %v7109_v16 }
 0x754   :  { %v5868_v19 = vsel %vm10383_vm15, %v5867_v0, %v5863_v56 }
 0x755   :  { %v5351_v33 = vpop.permute.xlu1 %5350  ;;  %v5873_v14 = vsel %vm1344_vm10, %v5872_v1, %v5868_v19  ;;  %v5360_v31 = vpop.permute.xlu0 %5359 }
 0x756   :  { %v5877_v43 = vrot.slane %v5351_v33, %v7119_v18  ;;  %v5892_v41 = vrot.slane %v5360_v31, %v10258_v21 }
 0x758   :  { %v5878_v47 = vsel %vm1351_vm11, %v5877_v43, %v5873_v14 }
 0x759   :  { %v5357_v48 = vpop.permute.xlu1 %5356  ;;  %v5883_v53 = vsel %vm10384_vm7, %v5882_v15, %v5878_v47  ;;  %v5366_v35 = vpop.permute.xlu0 %5365 }
 0x75a   :  { %v5887_v46 = vrot.slane %v5357_v48, %v10254_v13  ;;  %v5902_v54 = vrot.slane %v5366_v35, %v10268_v29 }
 0x75c   :  { %v5888_v38 = vsel %vm1365_vm13, %v5887_v46, %v5883_v53 }
 0x75d   :  { %v5363_v63 = vpop.permute.xlu1 %5362  ;;  %v5893_v34 = vsel %vm1372_vm14, %v5892_v41, %v5888_v38  ;;  %v5372_v30 = vpop.permute.xlu0 %5371 }
 0x75e   :  { %v5897_v11 = vrot.slane %v5363_v63, %v10270_v36  ;;  %v5912_v5 = vrot.slane %v5372_v30, %v7061_v24 }
 0x760   :  { %v5898_v26 = vsel %vm10385_vm2, %v5897_v11, %v5893_v34 }
 0x761   :  { %v5369_v2 = vpop.permute.xlu1 %5368  ;;  %v5903_v59 = vsel %vm1386_vm0, %v5902_v54, %v5898_v26  ;;  %v5378_v12 = vpop.permute.xlu0 %5377 }
 0x762   :  { %v5907_v28 = vrot.slane %v5369_v2, %v10285_v8  ;;  %v5921_v22 = vrot.slane %v5378_v12, %v7068_v23 }
 0x764   :  { %v5908_v57 = vsel %vm1393_vm1, %v5907_v28, %v5903_v59 }
 0x765   :  { %v6149_v32 = vsel %vm1954_vm9, %v5908_v57, %v6148_v51  ;;  %v5375_v55 = vpop.permute.xlu1 %5374  ;;  %v5384_v61 = vpop.permute.xlu0 %5383  ;;  %vm10387_vm9 = vmmov %vm10386_vm12 }
 0x766   :  { %v5916_v7 = vrot.slane %v5375_v55, %v7064_v17  ;;  %v5931_v9 = vrot.slane %v5384_v61, %v7072_v6  ;;  %vm10388_vm12 = vmmov %vm10382_vm8 }
 0x767   :  { %vm10389_vm8 = vmmov %vm10383_vm15 }
 0x768   :  { %v5917_v42 = vsel %vm1295_vm3, %v5916_v7, %v5912_v5  ;;  %vm10390_vm15 = vmmov %vm10384_vm7 }
 0x769   :  { %v5381_v27 = vpop.permute.xlu1 %5380  ;;  %v5922_v60 = vsel %vm1302_vm4, %v5921_v22, %v5917_v42  ;;  %v5390_v3 = vpop.permute.xlu0 %5389  ;;  %vm10391_vm7 = vmmov %vm10385_vm2  ;;  %vm10392_vm2 = vcmask 1045509  }
 0x76a   :  { %v5926_v40 = vrot.slane %v5381_v27, %v7075_v20  ;;  %v5941_v4 = vrot.slane %v5390_v3, %v7078_v25 }
 0x76c   :  { %v5927_v52 = vsel %vm1309_vm5, %v5926_v40, %v5922_v60 }
 0x76d   :  { %v5387_v37 = vpop.permute.xlu1 %5386  ;;  %v5932_v51 = vsel %vm1316_vm6, %v5931_v9, %v5927_v52  ;;  %v5396_v50 = vpop.permute.xlu0 %5395 }
 0x76e   :  { %v5936_v58 = vrot.slane %v5387_v37, %v7084_v49  ;;  %v5951_v1 = vrot.slane %v5396_v50, %v7091_v10 }
 0x770   :  { %v5937_v39 = vsel %vm10387_vm9, %v5936_v58, %v5932_v51 }
 0x771   :  { %v5393_v62 = vpop.permute.xlu1 %5392  ;;  %v5942_v56 = vsel %vm10388_vm12, %v5941_v4, %v5937_v39  ;;  %v5402_v44 = vpop.permute.xlu0 %5401 }
 0x772   :  { %v5946_v0 = vrot.slane %v5393_v62, %v7102_v45  ;;  %v5961_v15 = vrot.slane %v5402_v44, %v7109_v16 }
 0x774   :  { %v5947_v19 = vsel %vm10389_vm8, %v5946_v0, %v5942_v56 }
 0x775   :  { %v5399_v33 = vpop.permute.xlu1 %5398  ;;  %v5952_v14 = vsel %vm1344_vm10, %v5951_v1, %v5947_v19  ;;  %v5408_v31 = vpop.permute.xlu0 %5407 }
 0x776   :  { %v5956_v43 = vrot.slane %v5399_v33, %v7119_v18  ;;  %v5971_v41 = vrot.slane %v5408_v31, %v10258_v21 }
 0x778   :  { %v5957_v47 = vsel %vm1351_vm11, %v5956_v43, %v5952_v14 }
 0x779   :  { %v5405_v48 = vpop.permute.xlu1 %5404  ;;  %v5962_v53 = vsel %vm10390_vm15, %v5961_v15, %v5957_v47  ;;  %v5414_v35 = vpop.permute.xlu0 %5413 }
 0x77a   :  { %v5966_v46 = vrot.slane %v5405_v48, %v10254_v13  ;;  %v5981_v30 = vrot.slane %v5414_v35, %v10268_v29 }
 0x77c   :  { %v5967_v54 = vsel %vm1365_vm13, %v5966_v46, %v5962_v53 }
 0x77d   :  { %v5411_v38 = vpop.permute.xlu1 %5410  ;;  %v5972_v63 = vsel %vm1372_vm14, %v5971_v41, %v5967_v54  ;;  %v5420_v11 = vpop.permute.xlu0 %5419 }
 0x77e   :  { %v5976_v34 = vrot.slane %v5411_v38, %v10270_v36  ;;  %v5991_v39 = vrot.slane %v5420_v11, %v7061_v24 }
 0x780   :  { %v5977_v5 = vsel %vm10391_vm7, %v5976_v34, %v5972_v63 }
 0x781   :  { %v5417_v26 = vpop.permute.xlu1 %5416  ;;  %v5982_v2 = vsel %vm1386_vm0, %v5981_v30, %v5977_v5  ;;  %v5426_v28 = vpop.permute.xlu0 %5425 }
 0x782   :  { %v5986_v59 = vrot.slane %v5417_v26, %v10285_v8  ;;  %v6000_v33 = vrot.slane %v5426_v28, %v7068_v23 }
 0x784   :  { %v5987_v12 = vsel %vm1393_vm1, %v5986_v59, %v5982_v2 }
 0x785   :  { %v9712_v22 = vsel %vm10392_vm2, %v5987_v12, %v6149_v32  ;;  %v5423_v57 = vpop.permute.xlu1 %5422  ;;  %v5432_v55 = vpop.permute.xlu0 %5431  ;;  %vm10403_vm2 = vcmask 1047559  }
 0x786   :  { %v5995_v32 = vrot.slane %v5423_v57, %v7064_v17 }
 0x788   :  { %v5996_v44 = vsel %vm1295_vm3, %v5995_v32, %v5991_v39 }
 0x789   :  { %v5429_v7 = vpop.permute.xlu1 %5428  ;;  %v5438_v61 = vpop.permute.xlu0 %5437  ;;  %v6001_v41 = vsel %vm1302_vm4, %v6000_v33, %v5996_v44 }
 0x78a   :  { %v6005_v15 = vrot.slane %v5429_v7, %v7075_v20 }
 0x78c   :  { %v6006_v48 = vsel %vm1309_vm5, %v6005_v15, %v6001_v41 }
 0x78d   :  { %v5435_v9 = vpop.permute.xlu1 %5434  ;;  %v5444_v42 = vpop.permute.xlu0 %5443 }
 0x78e   :  { %v6015_v53 = vrot.slane %v5435_v9, %v7084_v49 }
 0x791   :  { %v5441_v27 = vpop.permute.xlu1 %5440  ;;  %v9714_v60 = vpop.permute.xlu0 %5449 }
 0x792   :  { %v6025_v30 = vrot.slane %v5441_v27, %v7102_v45 }
 0x795   :  { %v5447_v40 = vpop.permute.xlu1 %5446  ;;  %v5471_v3 = vpop.permute.xlu0 %5470 }
 0x796   :  { %v6074_v19 = vrot.slane %v5471_v3, %v7064_v17  ;;  %v6010_v17 = vrot.slane %v5432_v55, %v7072_v6  ;;  %v6035_v55 = vrot.slane %v5447_v40, %v7119_v18  ;;  %v6040_v40 = vrot.slane %v9714_v60, %v7109_v16 }
 0x798   :  { %v6011_v38 = vsel %vm1316_vm6, %v6010_v17, %v6006_v48  ;;  %v10404_v48 = vld [vmem:[#allocation84_spill] sm:$0xff] }
 0x799   :  { %v5468_v4 = vpop.permute.xlu1 %5467  ;;  %v5477_v52 = vpop.permute.xlu0 %5476 }
 0x79a   :  { %v6070_v62 = vrot.slane %v5468_v4, %v7061_v24  ;;  %v6084_v46 = vrot.slane %v5477_v52, %v7075_v20  ;;  %v6020_v20 = vrot.slane %v5438_v61, %v7078_v25 }
 0x79c   :  { %v6075_v43 = vsel %vm1295_vm3, %v6074_v19, %v6070_v62  ;;  %vm10393_vm3 = vmmov %vm10387_vm9 }
 0x79d   :  { %v5474_v37 = vpop.permute.xlu1 %5473  ;;  %v5483_v51 = vpop.permute.xlu0 %5482  ;;  %v6016_v11 = vsel %vm10393_vm3, %v6015_v53, %v6011_v38 }
 0x79e   :  { %v6079_v0 = vrot.slane %v5474_v37, %v7068_v23  ;;  %v6094_v5 = vrot.slane %v5483_v51, %v7084_v49  ;;  %v6030_v49 = vrot.slane %v5444_v42, %v7091_v10 }
 0x7a0   :  { %v6080_v47 = vsel %vm1302_vm4, %v6079_v0, %v6075_v43  ;;  %vm10394_vm4 = vmmov %vm10393_vm3 }
 0x7a1   :  { %v5480_v58 = vpop.permute.xlu1 %5479  ;;  %v5489_v50 = vpop.permute.xlu0 %5488  ;;  %v6085_v23 = vsel %vm1309_vm5, %v6084_v46, %v6080_v47  ;;  %vm10395_vm5 = vmmov %vm10388_vm12 }
 0x7a2   :  { %v6089_v24 = vrot.slane %v5480_v58, %v7072_v6  ;;  %v6021_v59 = vsel %vm10395_vm5, %v6020_v20, %v6016_v11  ;;  %vm10396_vm9 = vmmov %vm10395_vm5  ;;  %v6104_v7 = vrot.slane %v5489_v50, %v7102_v45 }
 0x7a4   :  { %v6090_v63 = vsel %vm1316_vm6, %v6089_v24, %v6085_v23  ;;  %vm10397_vm6 = vmmov %vm10389_vm8 }
 0x7a5   :  { %v5486_v1 = vpop.permute.xlu1 %5485  ;;  %v5495_v56 = vpop.permute.xlu0 %5494  ;;  %v6095_v6 = vsel %vm10394_vm4, %v6094_v5, %v6090_v63  ;;  %v6026_v57 = vsel %vm10397_vm6, %v6025_v30, %v6021_v59  ;;  %vm10398_vm12 = vmmov %vm10397_vm6 }
 0x7a6   :  { %v6099_v34 = vrot.slane %v5486_v1, %v7078_v25  ;;  %v6031_v27 = vsel %vm1344_vm10, %v6030_v49, %v6026_v57  ;;  %v6114_v52 = vrot.slane %v5495_v56, %v7119_v18  ;;  %vm10399_vm8 = vmmov %vm10390_vm15  ;;  %vm10402_vm15 = vcmask 1046534  }
 0x7a7   :  { %v6036_v4 = vsel %vm1351_vm11, %v6035_v55, %v6031_v27 }
 0x7a8   :  { %v6100_v28 = vsel %vm10396_vm9, %v6099_v34, %v6095_v6  ;;  %v6041_v50 = vsel %vm10399_vm8, %v6040_v40, %v6036_v4 }
 0x7a9   :  { %v5492_v14 = vpop.permute.xlu1 %5491  ;;  %v5498_v31 = vpop.permute.xlu0 %5497  ;;  %v6105_v25 = vsel %vm10398_vm12, %v6104_v7, %v6100_v28 }
 0x7aa   :  { %v6109_v12 = vrot.slane %v5492_v14, %v7091_v10  ;;  %v6119_v58 = vrot.slane %v5498_v31, %v7109_v16 }
 0x7ac   :  { %v6110_v3 = vsel %vm1344_vm10, %v6109_v12, %v6105_v25  ;;  %vm10400_vm10 = vmmov %vm10399_vm8 }
 0x7ad   :  { %v5453_v35 = vpop.permute.xlu1 %5452  ;;  %v5501_v54 = vpop.permute.xlu0 %5500  ;;  %v6115_v42 = vsel %vm1351_vm11, %v6114_v52, %v6110_v3  ;;  %vm10401_vm11 = vmmov %vm10391_vm7 }
 0x7ae   :  { %v6045_v37 = vrot.slane %v5453_v35, %v10254_v13  ;;  %v6124_v1 = vrot.slane %v5501_v54, %v10254_v13  ;;  %v6120_v60 = vsel %vm10400_vm10, %v6119_v58, %v6115_v42 }
 0x7b0   :  { %v6046_v18 = vsel %vm1365_vm13, %v6045_v37, %v6041_v50  ;;  %v6125_v13 = vsel %vm1365_vm13, %v6124_v1, %v6120_v60 }
 0x7b1   :  { %v5456_v26 = vpop.permute.xlu1 %5455  ;;  %v5504_v2 = vpop.permute.xlu0 %5503 }
 0x7b2   :  { %v6050_v45 = vrot.slane %v5456_v26, %v10258_v21  ;;  %v6129_v56 = vrot.slane %v5504_v2, %v10258_v21 }
 0x7b4   :  { %v6051_v62 = vsel %vm1372_vm14, %v6050_v45, %v6046_v18  ;;  %v6130_v43 = vsel %vm1372_vm14, %v6129_v56, %v6125_v13 }
 0x7b5   :  { %v5459_v9 = vpop.permute.xlu1 %5458  ;;  %v5507_v61 = vpop.permute.xlu0 %5506 }
 0x7b6   :  { %v6055_v51 = vrot.slane %v5459_v9, %v10270_v36  ;;  %v6134_v16 = vrot.slane %v5507_v61, %v10270_v36 }
 0x7b8   :  { %v6056_v44 = vsel %vm10401_vm11, %v6055_v51, %v6051_v62  ;;  %v6135_v41 = vsel %vm10391_vm7, %v6134_v16, %v6130_v43 }
 0x7b9   :  { %v5462_v10 = vpop.permute.xlu1 %5461  ;;  %v5510_v39 = vpop.permute.xlu0 %5509 }
 0x7ba   :  { %v6060_v32 = vrot.slane %v5462_v10, %v10268_v29  ;;  %v6139_v33 = vrot.slane %v5510_v39, %v10268_v29 }
 0x7bc   :  { %v6061_v19 = vsel %vm1386_vm0, %v6060_v32, %v6056_v44  ;;  %v6140_v47 = vsel %vm1386_vm0, %v6139_v33, %v6135_v41 }
 0x7bd   :  { %v5465_v0 = vpop.permute.xlu1 %5464 }
 0x7be   :  { %v6065_v15 = vrot.slane %v5465_v0, %v10285_v8 }
 0x7c0   :  { %v6066_v14 = vsel %vm1393_vm1, %v6065_v15, %v6061_v19 }
 0x7c1   :  { %v6151_v21 = vsel %vm10402_vm15, %v6066_v14, %v9712_v22  ;;  %v5513_v31 = vpop.permute.xlu1 %5512 }
 0x7c2   :  { %v6144_v36 = vrot.slane %v5513_v31, %v10285_v8 }
 0x7c4   :  { %v6145_v24 = vsel %vm1393_vm1, %v6144_v36, %v6140_v47 }
 0x7c5   :  { %v6152_v29 = vsel %vm10403_vm2, %v6145_v24, %v6151_v21 }
 0x7c6   :  { %v6154_v53 = vadd.f32 %v6152_v29, %v10404_v48 }
 0x7c8   :  { %v6155_v46 = vmax.f32 %v6154_v53, 0.0 }
 0x7ca   :  { %6156 = vst [vmem:[#allocation11] sm:$0xff] %v6155_v46 }
 0x7cb   :  { %6381 = shalt.err (!%p6378_p1)
}
 0x7cc   :  { %6166 = dma.vmem_to_hbm [thread:$0]  %s6164_s22, 128, %s9795_s9, [#allocation4]  }
 0x7cd   :  { %6396 = dma.done.wait [#allocation4], 128  }
 0x7ce   :  { %6397 = vsyncadd [#allocation4], 4294967168 }
 0x7cf   :  { %6170 = vsyncpa [#allocation3], 1 }
 0x7d0   :  { %6171 = vsyncpa [#allocation6], 1 }
 0x7d1   :  { %6172 = vsyncpa [#allocation9], 1 }
 0x7d2   :  { %6173 = vsyncpa [#allocation4], 1 }

</bundles_post_ra>
